<compile_context>
chip_gen: v5e
topology: v5e:2x2
jax: 0.10.0
libtpu: 0.0.40
codegen_flags: <defaults>
</compile_context>

<pallas_src>
import functools

import jax
import jax.numpy as jnp
from jax import lax
from jax.experimental import pallas as pl
from jax.experimental.pallas import tpu as pltpu


HP = 128          # padded hidden width: one full 128-lane block per gate
OP = 128          # padded output width (lane-dense, unmasked store)
B_TILE = 8        # batch rows per tile (sublane multiple; grid axis 0)
MAX_T_CHUNK = 32  # max timesteps streamed / fully unrolled per grid step


def _round_up(x, m):
    return ((x + m - 1) // m) * m


def lstm_kernel(x_ref, wih_ref, whh_ref, b_ref, wout_ref, bout_ref,
                out_ref, pg_scr, h_scr, c_scr,
                *, t_chunk, t_total, t_pad, b_tile):
    """One (batch-tile, time-chunk) grid step.

    x_ref:    (t_chunk*b_tile, D)     bf16  time-major rows of this chunk
    wih_ref:  (D, 4*HP)               bf16  gate-padded input weights
    whh_ref:  (HP, 4*HP)              bf16  gate-padded recurrent weights
    b_ref:    (1, 4*HP)               f32   b_ih + b_hh
    wout_ref: (HP, OP), bout_ref: (1, OP)   f32 linear head
    out_ref:  (b_tile, OP)            f32   written at the last chunk only
    pg_scr:   (t_chunk, b_tile, 4*HP) bf16  hoisted pre-gates for this chunk
    h_scr/c_scr: (b_tile, HP)         f32   recurrent state carried across chunks
    """
    chunk = pl.program_id(1)
    n_chunks = pl.num_programs(1)
    hp = h_scr.shape[1]

    # ---- init recurrent state at the start of each batch tile's chunk sweep.
    @pl.when(chunk == 0)
    def _():
        h_scr[...] = jnp.zeros_like(h_scr)
        c_scr[...] = jnp.zeros_like(c_scr)

    # ---- Phase 1: hoisted input projection for the whole chunk (one bf16 MXU
    # matmul, f32 accumulation), bias folded in, stored as bf16 pre-gates.
    pg = (jnp.dot(x_ref[...], wih_ref[...], preferred_element_type=jnp.float32)
          + b_ref[...])
    pg_scr[...] = pg.reshape(t_chunk, b_tile, 4 * hp).astype(pg_scr.dtype)

    def sigmoid(v):
        # one EUP op per gate (tanh) instead of exp + divide
        return 0.5 * jnp.tanh(0.5 * v) + 0.5

    needs_mask = (t_pad != t_total)  # static: only trace masking if T was padded

    # ---- Phase 2: serial recurrence over this chunk, fully unrolled.
    # Elementwise math in f32 (v5e-safe); only the MXU operands are bf16.
    def step(j, carry):
        h, c = carry
        gates = (pg_scr[j].astype(jnp.float32)
                 + jnp.dot(h.astype(jnp.bfloat16), whh_ref[...],
                           preferred_element_type=jnp.float32))
        # 128-lane-aligned gate slices -> pure vreg selects, no cross-lane work.
        i = sigmoid(gates[:, 0 * hp:1 * hp])
        f = sigmoid(gates[:, 1 * hp:2 * hp])
        g = jnp.tanh(gates[:, 2 * hp:3 * hp])
        o = sigmoid(gates[:, 3 * hp:4 * hp])
        c_new = f * c + i * g
        h_new = o * jnp.tanh(c_new)
        if needs_mask:
            valid = (chunk * t_chunk + j) < t_total
            h_new = jnp.where(valid, h_new, h)
            c_new = jnp.where(valid, c_new, c)
        return h_new, c_new

    h_last, c_last = lax.fori_loop(0, t_chunk, step, (h_scr[...], c_scr[...]),
                                   unroll=True)
    h_scr[...] = h_last
    c_scr[...] = c_last

    # ---- Phase 3: linear head on the final hidden state (unmasked 128-lane store).
    @pl.when(chunk == n_chunks - 1)
    def _():
        out_ref[...] = (
            jnp.dot(h_last, wout_ref[...], preferred_element_type=jnp.float32)
            + bout_ref[...])


def pack_params(w_ih_t, w_hh_t, b_ih, b_hh, w_out, b_out):
    """Pad parameters into the lane-aligned layout the kernel expects.

    w_ih_t: (D, 4H) (transposed PyTorch weight_ih_l0), w_hh_t: (H, 4H),
    b_ih/b_hh: (4H,), w_out: (H, O), b_out: (O,). Gate order (i, f, g, o).
    Zero padding keeps padded hidden/cell columns identically zero.
    Matmul operands (w_ih, w_hh) are returned in bf16; everything else stays f32.
    """
    D, four_h = w_ih_t.shape
    H = four_h // 4
    O = w_out.shape[1]
    assert H <= HP and O <= OP

    wih_p = jnp.zeros((D, 4 * HP), jnp.float32)
    whh_p = jnp.zeros((HP, 4 * HP), jnp.float32)
    b_p = jnp.zeros((1, 4 * HP), jnp.float32)
    for g in range(4):
        wih_p = wih_p.at[:, g * HP:g * HP + H].set(w_ih_t[:, g * H:(g + 1) * H])
        whh_p = whh_p.at[:H, g * HP:g * HP + H].set(w_hh_t[:, g * H:(g + 1) * H])
        b_p = b_p.at[0, g * HP:g * HP + H].set(
            b_ih[g * H:(g + 1) * H] + b_hh[g * H:(g + 1) * H])
    wout_p = jnp.zeros((HP, OP), jnp.float32).at[:H, :O].set(w_out)
    bout_p = jnp.zeros((1, OP), jnp.float32).at[0, :O].set(b_out)
    return (wih_p.astype(jnp.bfloat16), whh_p.astype(jnp.bfloat16),
            b_p, wout_p, bout_p)


@functools.partial(jax.jit, static_argnums=(6,))
def lstm_forward(x, wih_p, whh_p, b_p, wout_p, bout_p, output_dim):
    """x: (B, T, D) float32 (batch_first). Returns (B, output_dim) float32."""
    B, T, D = x.shape
    B_pad = _round_up(B, B_TILE)
    nb = B_pad // B_TILE
    t_chunk = min(_round_up(T, 2), MAX_T_CHUNK)     # even -> bf16 sublane friendly
    n_chunks = (T + t_chunk - 1) // t_chunk
    T_pad = n_chunks * t_chunk

    # Lay x out as (nb, T_pad*B_TILE, D): per batch tile, time-major with the
    # tile's 8 batch rows contiguous per timestep; cast to bf16 for the MXU.
    # TODO(synk): at large T*B feed x via allow_input_fusion / strided DMA instead
    # of this wrapper-side pad+transpose copy.
    x_p = jnp.pad(x, ((0, B_pad - B), (0, T_pad - T), (0, 0)))
    x_p = x_p.reshape(nb, B_TILE, T_pad, D).transpose(0, 2, 1, 3)
    x_p = x_p.reshape(nb, T_pad * B_TILE, D).astype(jnp.bfloat16)

    kernel = functools.partial(lstm_kernel, t_chunk=t_chunk, t_total=T,
                               t_pad=T_pad, b_tile=B_TILE)

    # Explicit VMEM budget: double-buffered in/out blocks + scratch + headroom.
    blk_bytes = (2 * (t_chunk * B_TILE * D * 2        # x chunk (bf16)
                      + D * 4 * HP * 2                # wih (bf16)
                      + HP * 4 * HP * 2               # whh (bf16)
                      + 4 * HP * 4 + HP * OP * 4 + OP * 4
                      + B_TILE * OP * 4)              # out block
                 + t_chunk * B_TILE * 4 * HP * 2      # pg scratch (bf16)
                 + 2 * B_TILE * HP * 4)               # h/c scratch
    vmem_limit = int(min(48 * 2**20, max(16 * 2**20, 2 * blk_bytes)))

    H4 = 4 * HP
    cost = pl.CostEstimate(
        flops=(2 * T_pad * B_pad * D * H4
               + 2 * T_pad * B_pad * HP * H4
               + 2 * B_pad * HP * OP),
        transcendentals=5 * T_pad * B_pad * HP,
        bytes_accessed=(x_p.size * 2 + wih_p.size * 2 + whh_p.size * 2
                        + (b_p.size + wout_p.size + bout_p.size) * 4
                        + B_pad * OP * 4))

    out_p = pl.pallas_call(
        kernel,
        out_shape=jax.ShapeDtypeStruct((nb, B_TILE, OP), jnp.float32),
        grid=(nb, n_chunks),
        in_specs=[
            pl.BlockSpec((None, t_chunk * B_TILE, D), lambda bi, c: (bi, c, 0)),
            pl.BlockSpec((D, 4 * HP), lambda bi, c: (0, 0)),
            pl.BlockSpec((HP, 4 * HP), lambda bi, c: (0, 0)),
            pl.BlockSpec((1, 4 * HP), lambda bi, c: (0, 0)),
            pl.BlockSpec((HP, OP), lambda bi, c: (0, 0)),
            pl.BlockSpec((1, OP), lambda bi, c: (0, 0)),
        ],
        out_specs=pl.BlockSpec((None, B_TILE, OP), lambda bi, c: (bi, 0, 0)),
        scratch_shapes=[
            pltpu.VMEM((t_chunk, B_TILE, 4 * HP), jnp.bfloat16),  # pre-gates
            pltpu.VMEM((B_TILE, HP), jnp.float32),                # h
            pltpu.VMEM((B_TILE, HP), jnp.float32),                # c
        ],
        compiler_params=pltpu.CompilerParams(
            dimension_semantics=("parallel", "arbitrary"),
            vmem_limit_bytes=vmem_limit),
        cost_estimate=cost,
    )(x_p, wih_p, whh_p, b_p, wout_p, bout_p)

    return out_p.reshape(B_pad, OP)[:B, :output_dim]


def lstm_reference(x, w_ih_t, w_hh_t, b_ih, b_hh, w_out, b_out):
    """Pure-JAX f32 reference matching PyTorch nn.LSTM + nn.Linear semantics."""
    B = x.shape[0]
    H = w_hh_t.shape[0]
    b = (b_ih + b_hh)[None, :]

    def step(carry, x_t):
        h, c = carry
        gates = x_t @ w_ih_t + h @ w_hh_t + b
        i = jax.nn.sigmoid(gates[:, 0:H])
        f = jax.nn.sigmoid(gates[:, H:2 * H])
        g = jnp.tanh(gates[:, 2 * H:3 * H])
        o = jax.nn.sigmoid(gates[:, 3 * H:4 * H])
        c = f * c + i * g
        h = o * jnp.tanh(c)
        return (h, c), None

    init = (jnp.zeros((B, H), jnp.float32), jnp.zeros((B, H), jnp.float32))
    (h_last, _), _ = lax.scan(step, init, jnp.transpose(x, (1, 0, 2)))
    return h_last @ w_out + b_out[None, :]


if __name__ == "__main__":
    # Model hyperparams from the PyTorch module
    input_dim = 7 * 96   # 672
    hidden_dim = 48
    output_dim = 96
    batch = 2
    seq = 8

    key = jax.random.PRNGKey(0)
    k_x, k_wih, k_whh, k_bih, k_bhh, k_wo, k_bo = jax.random.split(key, 7)

    bound = 1.0 / jnp.sqrt(jnp.float32(hidden_dim))
    w_ih_t = jax.random.uniform(k_wih, (input_dim, 4 * hidden_dim),
                                jnp.float32, -bound, bound)
    w_hh_t = jax.random.uniform(k_whh, (hidden_dim, 4 * hidden_dim),
                                jnp.float32, -bound, bound)
    b_ih = jax.random.uniform(k_bih, (4 * hidden_dim,), jnp.float32, -bound, bound)
    b_hh = jax.random.uniform(k_bhh, (4 * hidden_dim,), jnp.float32, -bound, bound)
    w_out = jax.random.uniform(k_wo, (hidden_dim, output_dim),
                               jnp.float32, -bound, bound)
    b_out = jax.random.uniform(k_bo, (output_dim,), jnp.float32, -bound, bound)

    x = jax.random.normal(k_x, (batch, seq, input_dim), jnp.float32)

    wih_p, whh_p, b_p, wout_p, bout_p = pack_params(
        w_ih_t, w_hh_t, b_ih, b_hh, w_out, b_out)

    out = lstm_forward(x, wih_p, whh_p, b_p, wout_p, bout_p, output_dim)
    out = jax.block_until_ready(out)

    ref = lstm_reference(x, w_ih_t, w_hh_t, b_ih, b_hh, w_out, b_out)
    assert out.shape == (batch, output_dim), out.shape
    err = float(jnp.max(jnp.abs(out - ref)))
    # bf16 MXU operands + bf16 pre-gate storage (f32 accumulation) -> looser tol
    assert err < 5e-2, f"max abs err {err}"

    print("KERNEL_OK")
</pallas_src>

<mosaic_0001>
module attributes {stable_mosaic.version = 11 : i64} {
  func.func @lstm_kernel(%arg0: i32, %arg1: i32, %arg2: memref<1x64x672xbf16, #tpu.memory_space<vmem>>, %arg3: memref<672x512xbf16, #tpu.memory_space<vmem>>, %arg4: memref<128x512xbf16, #tpu.memory_space<vmem>>, %arg5: memref<1x512xf32, #tpu.memory_space<vmem>>, %arg6: memref<128x128xf32, #tpu.memory_space<vmem>>, %arg7: memref<1x128xf32, #tpu.memory_space<vmem>>, %arg8: memref<1x8x128xf32, #tpu.memory_space<vmem>>, %arg9: memref<8x8x512xbf16, #tpu.memory_space<vmem>>, %arg10: memref<8x128xf32, #tpu.memory_space<vmem>>, %arg11: memref<8x128xf32, #tpu.memory_space<vmem>>) attributes {dimension_semantics = [#tpu.dimension_semantics<parallel>, #tpu.dimension_semantics<arbitrary>], iteration_bounds = array<i64: 1, 1>, scalar_prefetch = 0 : i64, scratch_operands = 3 : i64, tpu.core_type = #tpu.core_type<tc>, window_params = [{transform_indices = @transform_0, window_bounds = array<i64: 1, 64, 672>}, {pipeline_mode = #tpu.pipeline_mode<synchronous>, transform_indices = @transform_1, window_bounds = array<i64: 672, 512>}, {pipeline_mode = #tpu.pipeline_mode<synchronous>, transform_indices = @transform_2, window_bounds = array<i64: 128, 512>}, {pipeline_mode = #tpu.pipeline_mode<synchronous>, transform_indices = @transform_3, window_bounds = array<i64: 1, 512>}, {pipeline_mode = #tpu.pipeline_mode<synchronous>, transform_indices = @transform_4, window_bounds = array<i64: 128, 128>}, {pipeline_mode = #tpu.pipeline_mode<synchronous>, transform_indices = @transform_5, window_bounds = array<i64: 1, 128>}, {transform_indices = @transform_6, window_bounds = array<i64: 1, 8, 128>}]} {
    %c0_i32 = arith.constant 0 : i32
    %0 = arith.cmpi eq, %arg1, %c0_i32 : i32
    %1 = arith.extui %0 : i1 to i32
    %c0_i32_0 = arith.constant 0 : i32
    %2 = arith.cmpi ne, %1, %c0_i32_0 : i32
    scf.if %2 {
      %cst_133 = arith.constant 0.000000e+00 : f32
      %332 = vector.broadcast %cst_133 : f32 to vector<8x128xf32>
      %c0_134 = arith.constant 0 : index
      %c0_135 = arith.constant 0 : index
      %333 = vector.load %arg10[%c0_134, %c0_135] : memref<8x128xf32, #tpu.memory_space<vmem>>, vector<8x128xf32>
      tpu.vector_store %arg10[%c0_134, %c0_135], %332 {strides = array<i32>} : memref<8x128xf32, #tpu.memory_space<vmem>>, vector<8x128xf32>,
      %cst_136 = arith.constant 0.000000e+00 : f32
      %334 = vector.broadcast %cst_136 : f32 to vector<8x128xf32>
      %c0_137 = arith.constant 0 : index
      %c0_138 = arith.constant 0 : index
      %335 = vector.load %arg11[%c0_137, %c0_138] : memref<8x128xf32, #tpu.memory_space<vmem>>, vector<8x128xf32>
      tpu.vector_store %arg11[%c0_137, %c0_138], %334 {strides = array<i32>} : memref<8x128xf32, #tpu.memory_space<vmem>>, vector<8x128xf32>,
    } else {
    }
    %c0 = arith.constant 0 : index
    %c0_1 = arith.constant 0 : index
    %c0_2 = arith.constant 0 : index
    %3 = vector.load %arg2[%c0, %c0_1, %c0_2] : memref<1x64x672xbf16, #tpu.memory_space<vmem>>, vector<1x64x672xbf16>
    %4 = vector.shape_cast %3 : vector<1x64x672xbf16> to vector<64x672xbf16>
    %c0_3 = arith.constant 0 : index
    %c0_4 = arith.constant 0 : index
    %5 = vector.load %arg3[%c0_3, %c0_4] : memref<672x512xbf16, #tpu.memory_space<vmem>>, vector<672x512xbf16>
    %cst = arith.constant dense<0.000000e+00> : vector<64x512xf32>
    %6 = tpu.matmul %4, %5, %cst {dimension_numbers = #tpu.dot_dimension_numbers<[1], [0], [0], [1], [0, 0, 1, 1], [], []>} : vector<64x672xbf16>, vector<672x512xbf16>, vector<64x512xf32> -> vector<64x512xf32>
    %c0_5 = arith.constant 0 : index
    %c0_6 = arith.constant 0 : index
    %7 = vector.load %arg5[%c0_5, %c0_6] : memref<1x512xf32, #tpu.memory_space<vmem>>, vector<1x512xf32>
    %8 = vector.broadcast %7 : vector<1x512xf32> to vector<64x512xf32>
    %9 = arith.addf %6, %8 : vector<64x512xf32>
    %10 = vector.shape_cast %9 : vector<64x512xf32> to vector<8x8x512xf32>
    %11 = arith.truncf %10 : vector<8x8x512xf32> to vector<8x8x512xbf16>
    %c0_7 = arith.constant 0 : index
    %c0_8 = arith.constant 0 : index
    %c0_9 = arith.constant 0 : index
    %12 = vector.load %arg9[%c0_7, %c0_8, %c0_9] : memref<8x8x512xbf16, #tpu.memory_space<vmem>>, vector<8x8x512xbf16>
    tpu.vector_store %arg9[%c0_7, %c0_8, %c0_9], %11 {strides = array<i32>} : memref<8x8x512xbf16, #tpu.memory_space<vmem>>, vector<8x8x512xbf16>,
    %c0_10 = arith.constant 0 : index
    %c0_11 = arith.constant 0 : index
    %13 = vector.load %arg10[%c0_10, %c0_11] : memref<8x128xf32, #tpu.memory_space<vmem>>, vector<8x128xf32>
    %c0_12 = arith.constant 0 : index
    %c0_13 = arith.constant 0 : index
    %14 = vector.load %arg11[%c0_12, %c0_13] : memref<8x128xf32, #tpu.memory_space<vmem>>, vector<8x128xf32>
    %c0_i32_14 = arith.constant 0 : i32
    %15 = arith.index_cast %c0_i32_14 : i32 to index
    %c0_15 = arith.constant 0 : index
    %c0_16 = arith.constant 0 : index
    %16 = vector.load %arg9[%15, %c0_15, %c0_16] : memref<8x8x512xbf16, #tpu.memory_space<vmem>>, vector<1x8x512xbf16>
    %17 = vector.shape_cast %16 : vector<1x8x512xbf16> to vector<8x512xbf16>
    %18 = arith.extf %17 : vector<8x512xbf16> to vector<8x512xf32>
    %19 = arith.truncf %13 : vector<8x128xf32> to vector<8x128xbf16>
    %c0_17 = arith.constant 0 : index
    %c0_18 = arith.constant 0 : index
    %20 = vector.load %arg4[%c0_17, %c0_18] : memref<128x512xbf16, #tpu.memory_space<vmem>>, vector<128x512xbf16>
    %cst_19 = arith.constant dense<0.000000e+00> : vector<8x512xf32>
    %21 = tpu.matmul %19, %20, %cst_19 {dimension_numbers = #tpu.dot_dimension_numbers<[1], [0], [0], [1], [0, 0, 1, 1], [], []>} : vector<8x128xbf16>, vector<128x512xbf16>, vector<8x512xf32> -> vector<8x512xf32>
    %22 = arith.addf %18, %21 : vector<8x512xf32>
    %23 = vector.extract_strided_slice %22 {offsets = [0, 0], sizes = [8, 128], strides = [1, 1]} : vector<8x512xf32> to vector<8x128xf32>
    %cst_20 = arith.constant 5.000000e-01 : f32
    %24 = vector.broadcast %cst_20 : f32 to vector<8x128xf32>
    %25 = arith.mulf %24, %23 : vector<8x128xf32>
    %26 = math.tanh %25 : vector<8x128xf32>
    %cst_21 = arith.constant 5.000000e-01 : f32
    %27 = vector.broadcast %cst_21 : f32 to vector<8x128xf32>
    %28 = arith.mulf %27, %26 : vector<8x128xf32>
    %cst_22 = arith.constant 5.000000e-01 : f32
    %29 = vector.broadcast %cst_22 : f32 to vector<8x128xf32>
    %30 = arith.addf %28, %29 : vector<8x128xf32>
    %31 = vector.extract_strided_slice %22 {offsets = [0, 128], sizes = [8, 128], strides = [1, 1]} : vector<8x512xf32> to vector<8x128xf32>
    %cst_23 = arith.constant 5.000000e-01 : f32
    %32 = vector.broadcast %cst_23 : f32 to vector<8x128xf32>
    %33 = arith.mulf %32, %31 : vector<8x128xf32>
    %34 = math.tanh %33 : vector<8x128xf32>
    %cst_24 = arith.constant 5.000000e-01 : f32
    %35 = vector.broadcast %cst_24 : f32 to vector<8x128xf32>
    %36 = arith.mulf %35, %34 : vector<8x128xf32>
    %cst_25 = arith.constant 5.000000e-01 : f32
    %37 = vector.broadcast %cst_25 : f32 to vector<8x128xf32>
    %38 = arith.addf %36, %37 : vector<8x128xf32>
    %39 = vector.extract_strided_slice %22 {offsets = [0, 256], sizes = [8, 128], strides = [1, 1]} : vector<8x512xf32> to vector<8x128xf32>
    %40 = math.tanh %39 : vector<8x128xf32>
    %41 = vector.extract_strided_slice %22 {offsets = [0, 384], sizes = [8, 128], strides = [1, 1]} : vector<8x512xf32> to vector<8x128xf32>
    %cst_26 = arith.constant 5.000000e-01 : f32
    %42 = vector.broadcast %cst_26 : f32 to vector<8x128xf32>
    %43 = arith.mulf %42, %41 : vector<8x128xf32>
    %44 = math.tanh %43 : vector<8x128xf32>
    %cst_27 = arith.constant 5.000000e-01 : f32
    %45 = vector.broadcast %cst_27 : f32 to vector<8x128xf32>
    %46 = arith.mulf %45, %44 : vector<8x128xf32>
    %cst_28 = arith.constant 5.000000e-01 : f32
    %47 = vector.broadcast %cst_28 : f32 to vector<8x128xf32>
    %48 = arith.addf %46, %47 : vector<8x128xf32>
    %49 = arith.mulf %38, %14 : vector<8x128xf32>
    %50 = arith.mulf %30, %40 : vector<8x128xf32>
    %51 = arith.addf %49, %50 : vector<8x128xf32>
    %52 = math.tanh %51 : vector<8x128xf32>
    %53 = arith.mulf %48, %52 : vector<8x128xf32>
    %c1_i32 = arith.constant 1 : i32
    %54 = arith.index_cast %c1_i32 : i32 to index
    %c0_29 = arith.constant 0 : index
    %c0_30 = arith.constant 0 : index
    %55 = vector.load %arg9[%54, %c0_29, %c0_30] : memref<8x8x512xbf16, #tpu.memory_space<vmem>>, vector<1x8x512xbf16>
    %56 = vector.shape_cast %55 : vector<1x8x512xbf16> to vector<8x512xbf16>
    %57 = arith.extf %56 : vector<8x512xbf16> to vector<8x512xf32>
    %58 = arith.truncf %53 : vector<8x128xf32> to vector<8x128xbf16>
    %c0_31 = arith.constant 0 : index
    %c0_32 = arith.constant 0 : index
    %59 = vector.load %arg4[%c0_31, %c0_32] : memref<128x512xbf16, #tpu.memory_space<vmem>>, vector<128x512xbf16>
    %cst_33 = arith.constant dense<0.000000e+00> : vector<8x512xf32>
    %60 = tpu.matmul %58, %59, %cst_33 {dimension_numbers = #tpu.dot_dimension_numbers<[1], [0], [0], [1], [0, 0, 1, 1], [], []>} : vector<8x128xbf16>, vector<128x512xbf16>, vector<8x512xf32> -> vector<8x512xf32>
    %61 = arith.addf %57, %60 : vector<8x512xf32>
    %62 = vector.extract_strided_slice %61 {offsets = [0, 0], sizes = [8, 128], strides = [1, 1]} : vector<8x512xf32> to vector<8x128xf32>
    %cst_34 = arith.constant 5.000000e-01 : f32
    %63 = vector.broadcast %cst_34 : f32 to vector<8x128xf32>
    %64 = arith.mulf %63, %62 : vector<8x128xf32>
    %65 = math.tanh %64 : vector<8x128xf32>
    %cst_35 = arith.constant 5.000000e-01 : f32
    %66 = vector.broadcast %cst_35 : f32 to vector<8x128xf32>
    %67 = arith.mulf %66, %65 : vector<8x128xf32>
    %cst_36 = arith.constant 5.000000e-01 : f32
    %68 = vector.broadcast %cst_36 : f32 to vector<8x128xf32>
    %69 = arith.addf %67, %68 : vector<8x128xf32>
    %70 = vector.extract_strided_slice %61 {offsets = [0, 128], sizes = [8, 128], strides = [1, 1]} : vector<8x512xf32> to vector<8x128xf32>
    %cst_37 = arith.constant 5.000000e-01 : f32
    %71 = vector.broadcast %cst_37 : f32 to vector<8x128xf32>
    %72 = arith.mulf %71, %70 : vector<8x128xf32>
    %73 = math.tanh %72 : vector<8x128xf32>
    %cst_38 = arith.constant 5.000000e-01 : f32
    %74 = vector.broadcast %cst_38 : f32 to vector<8x128xf32>
    %75 = arith.mulf %74, %73 : vector<8x128xf32>
    %cst_39 = arith.constant 5.000000e-01 : f32
    %76 = vector.broadcast %cst_39 : f32 to vector<8x128xf32>
    %77 = arith.addf %75, %76 : vector<8x128xf32>
    %78 = vector.extract_strided_slice %61 {offsets = [0, 256], sizes = [8, 128], strides = [1, 1]} : vector<8x512xf32> to vector<8x128xf32>
    %79 = math.tanh %78 : vector<8x128xf32>
    %80 = vector.extract_strided_slice %61 {offsets = [0, 384], sizes = [8, 128], strides = [1, 1]} : vector<8x512xf32> to vector<8x128xf32>
    %cst_40 = arith.constant 5.000000e-01 : f32
    %81 = vector.broadcast %cst_40 : f32 to vector<8x128xf32>
    %82 = arith.mulf %81, %80 : vector<8x128xf32>
    %83 = math.tanh %82 : vector<8x128xf32>
    %cst_41 = arith.constant 5.000000e-01 : f32
    %84 = vector.broadcast %cst_41 : f32 to vector<8x128xf32>
    %85 = arith.mulf %84, %83 : vector<8x128xf32>
    %cst_42 = arith.constant 5.000000e-01 : f32
    %86 = vector.broadcast %cst_42 : f32 to vector<8x128xf32>
    %87 = arith.addf %85, %86 : vector<8x128xf32>
    %88 = arith.mulf %77, %51 : vector<8x128xf32>
    %89 = arith.mulf %69, %79 : vector<8x128xf32>
    %90 = arith.addf %88, %89 : vector<8x128xf32>
    %91 = math.tanh %90 : vector<8x128xf32>
    %92 = arith.mulf %87, %91 : vector<8x128xf32>
    %c2_i32 = arith.constant 2 : i32
    %93 = arith.index_cast %c2_i32 : i32 to index
    %c0_43 = arith.constant 0 : index
    %c0_44 = arith.constant 0 : index
    %94 = vector.load %arg9[%93, %c0_43, %c0_44] : memref<8x8x512xbf16, #tpu.memory_space<vmem>>, vector<1x8x512xbf16>
    %95 = vector.shape_cast %94 : vector<1x8x512xbf16> to vector<8x512xbf16>
    %96 = arith.extf %95 : vector<8x512xbf16> to vector<8x512xf32>
    %97 = arith.truncf %92 : vector<8x128xf32> to vector<8x128xbf16>
    %c0_45 = arith.constant 0 : index
    %c0_46 = arith.constant 0 : index
    %98 = vector.load %arg4[%c0_45, %c0_46] : memref<128x512xbf16, #tpu.memory_space<vmem>>, vector<128x512xbf16>
    %cst_47 = arith.constant dense<0.000000e+00> : vector<8x512xf32>
    %99 = tpu.matmul %97, %98, %cst_47 {dimension_numbers = #tpu.dot_dimension_numbers<[1], [0], [0], [1], [0, 0, 1, 1], [], []>} : vector<8x128xbf16>, vector<128x512xbf16>, vector<8x512xf32> -> vector<8x512xf32>
    %100 = arith.addf %96, %99 : vector<8x512xf32>
    %101 = vector.extract_strided_slice %100 {offsets = [0, 0], sizes = [8, 128], strides = [1, 1]} : vector<8x512xf32> to vector<8x128xf32>
    %cst_48 = arith.constant 5.000000e-01 : f32
    %102 = vector.broadcast %cst_48 : f32 to vector<8x128xf32>
    %103 = arith.mulf %102, %101 : vector<8x128xf32>
    %104 = math.tanh %103 : vector<8x128xf32>
    %cst_49 = arith.constant 5.000000e-01 : f32
    %105 = vector.broadcast %cst_49 : f32 to vector<8x128xf32>
    %106 = arith.mulf %105, %104 : vector<8x128xf32>
    %cst_50 = arith.constant 5.000000e-01 : f32
    %107 = vector.broadcast %cst_50 : f32 to vector<8x128xf32>
    %108 = arith.addf %106, %107 : vector<8x128xf32>
    %109 = vector.extract_strided_slice %100 {offsets = [0, 128], sizes = [8, 128], strides = [1, 1]} : vector<8x512xf32> to vector<8x128xf32>
    %cst_51 = arith.constant 5.000000e-01 : f32
    %110 = vector.broadcast %cst_51 : f32 to vector<8x128xf32>
    %111 = arith.mulf %110, %109 : vector<8x128xf32>
    %112 = math.tanh %111 : vector<8x128xf32>
    %cst_52 = arith.constant 5.000000e-01 : f32
    %113 = vector.broadcast %cst_52 : f32 to vector<8x128xf32>
    %114 = arith.mulf %113, %112 : vector<8x128xf32>
    %cst_53 = arith.constant 5.000000e-01 : f32
    %115 = vector.broadcast %cst_53 : f32 to vector<8x128xf32>
    %116 = arith.addf %114, %115 : vector<8x128xf32>
    %117 = vector.extract_strided_slice %100 {offsets = [0, 256], sizes = [8, 128], strides = [1, 1]} : vector<8x512xf32> to vector<8x128xf32>
    %118 = math.tanh %117 : vector<8x128xf32>
    %119 = vector.extract_strided_slice %100 {offsets = [0, 384], sizes = [8, 128], strides = [1, 1]} : vector<8x512xf32> to vector<8x128xf32>
    %cst_54 = arith.constant 5.000000e-01 : f32
    %120 = vector.broadcast %cst_54 : f32 to vector<8x128xf32>
    %121 = arith.mulf %120, %119 : vector<8x128xf32>
    %122 = math.tanh %121 : vector<8x128xf32>
    %cst_55 = arith.constant 5.000000e-01 : f32
    %123 = vector.broadcast %cst_55 : f32 to vector<8x128xf32>
    %124 = arith.mulf %123, %122 : vector<8x128xf32>
    %cst_56 = arith.constant 5.000000e-01 : f32
    %125 = vector.broadcast %cst_56 : f32 to vector<8x128xf32>
    %126 = arith.addf %124, %125 : vector<8x128xf32>
    %127 = arith.mulf %116, %90 : vector<8x128xf32>
    %128 = arith.mulf %108, %118 : vector<8x128xf32>
    %129 = arith.addf %127, %128 : vector<8x128xf32>
    %130 = math.tanh %129 : vector<8x128xf32>
    %131 = arith.mulf %126, %130 : vector<8x128xf32>
    %c3_i32 = arith.constant 3 : i32
    %132 = arith.index_cast %c3_i32 : i32 to index
    %c0_57 = arith.constant 0 : index
    %c0_58 = arith.constant 0 : index
    %133 = vector.load %arg9[%132, %c0_57, %c0_58] : memref<8x8x512xbf16, #tpu.memory_space<vmem>>, vector<1x8x512xbf16>
    %134 = vector.shape_cast %133 : vector<1x8x512xbf16> to vector<8x512xbf16>
    %135 = arith.extf %134 : vector<8x512xbf16> to vector<8x512xf32>
    %136 = arith.truncf %131 : vector<8x128xf32> to vector<8x128xbf16>
    %c0_59 = arith.constant 0 : index
    %c0_60 = arith.constant 0 : index
    %137 = vector.load %arg4[%c0_59, %c0_60] : memref<128x512xbf16, #tpu.memory_space<vmem>>, vector<128x512xbf16>
    %cst_61 = arith.constant dense<0.000000e+00> : vector<8x512xf32>
    %138 = tpu.matmul %136, %137, %cst_61 {dimension_numbers = #tpu.dot_dimension_numbers<[1], [0], [0], [1], [0, 0, 1, 1], [], []>} : vector<8x128xbf16>, vector<128x512xbf16>, vector<8x512xf32> -> vector<8x512xf32>
    %139 = arith.addf %135, %138 : vector<8x512xf32>
    %140 = vector.extract_strided_slice %139 {offsets = [0, 0], sizes = [8, 128], strides = [1, 1]} : vector<8x512xf32> to vector<8x128xf32>
    %cst_62 = arith.constant 5.000000e-01 : f32
    %141 = vector.broadcast %cst_62 : f32 to vector<8x128xf32>
    %142 = arith.mulf %141, %140 : vector<8x128xf32>
    %143 = math.tanh %142 : vector<8x128xf32>
    %cst_63 = arith.constant 5.000000e-01 : f32
    %144 = vector.broadcast %cst_63 : f32 to vector<8x128xf32>
    %145 = arith.mulf %144, %143 : vector<8x128xf32>
    %cst_64 = arith.constant 5.000000e-01 : f32
    %146 = vector.broadcast %cst_64 : f32 to vector<8x128xf32>
    %147 = arith.addf %145, %146 : vector<8x128xf32>
    %148 = vector.extract_strided_slice %139 {offsets = [0, 128], sizes = [8, 128], strides = [1, 1]} : vector<8x512xf32> to vector<8x128xf32>
    %cst_65 = arith.constant 5.000000e-01 : f32
    %149 = vector.broadcast %cst_65 : f32 to vector<8x128xf32>
    %150 = arith.mulf %149, %148 : vector<8x128xf32>
    %151 = math.tanh %150 : vector<8x128xf32>
    %cst_66 = arith.constant 5.000000e-01 : f32
    %152 = vector.broadcast %cst_66 : f32 to vector<8x128xf32>
    %153 = arith.mulf %152, %151 : vector<8x128xf32>
    %cst_67 = arith.constant 5.000000e-01 : f32
    %154 = vector.broadcast %cst_67 : f32 to vector<8x128xf32>
    %155 = arith.addf %153, %154 : vector<8x128xf32>
    %156 = vector.extract_strided_slice %139 {offsets = [0, 256], sizes = [8, 128], strides = [1, 1]} : vector<8x512xf32> to vector<8x128xf32>
    %157 = math.tanh %156 : vector<8x128xf32>
    %158 = vector.extract_strided_slice %139 {offsets = [0, 384], sizes = [8, 128], strides = [1, 1]} : vector<8x512xf32> to vector<8x128xf32>
    %cst_68 = arith.constant 5.000000e-01 : f32
    %159 = vector.broadcast %cst_68 : f32 to vector<8x128xf32>
    %160 = arith.mulf %159, %158 : vector<8x128xf32>
    %161 = math.tanh %160 : vector<8x128xf32>
    %cst_69 = arith.constant 5.000000e-01 : f32
    %162 = vector.broadcast %cst_69 : f32 to vector<8x128xf32>
    %163 = arith.mulf %162, %161 : vector<8x128xf32>
    %cst_70 = arith.constant 5.000000e-01 : f32
    %164 = vector.broadcast %cst_70 : f32 to vector<8x128xf32>
    %165 = arith.addf %163, %164 : vector<8x128xf32>
    %166 = arith.mulf %155, %129 : vector<8x128xf32>
    %167 = arith.mulf %147, %157 : vector<8x128xf32>
    %168 = arith.addf %166, %167 : vector<8x128xf32>
    %169 = math.tanh %168 : vector<8x128xf32>
    %170 = arith.mulf %165, %169 : vector<8x128xf32>
    %c4_i32 = arith.constant 4 : i32
    %171 = arith.index_cast %c4_i32 : i32 to index
    %c0_71 = arith.constant 0 : index
    %c0_72 = arith.constant 0 : index
    %172 = vector.load %arg9[%171, %c0_71, %c0_72] : memref<8x8x512xbf16, #tpu.memory_space<vmem>>, vector<1x8x512xbf16>
    %173 = vector.shape_cast %172 : vector<1x8x512xbf16> to vector<8x512xbf16>
    %174 = arith.extf %173 : vector<8x512xbf16> to vector<8x512xf32>
    %175 = arith.truncf %170 : vector<8x128xf32> to vector<8x128xbf16>
    %c0_73 = arith.constant 0 : index
    %c0_74 = arith.constant 0 : index
    %176 = vector.load %arg4[%c0_73, %c0_74] : memref<128x512xbf16, #tpu.memory_space<vmem>>, vector<128x512xbf16>
    %cst_75 = arith.constant dense<0.000000e+00> : vector<8x512xf32>
    %177 = tpu.matmul %175, %176, %cst_75 {dimension_numbers = #tpu.dot_dimension_numbers<[1], [0], [0], [1], [0, 0, 1, 1], [], []>} : vector<8x128xbf16>, vector<128x512xbf16>, vector<8x512xf32> -> vector<8x512xf32>
    %178 = arith.addf %174, %177 : vector<8x512xf32>
    %179 = vector.extract_strided_slice %178 {offsets = [0, 0], sizes = [8, 128], strides = [1, 1]} : vector<8x512xf32> to vector<8x128xf32>
    %cst_76 = arith.constant 5.000000e-01 : f32
    %180 = vector.broadcast %cst_76 : f32 to vector<8x128xf32>
    %181 = arith.mulf %180, %179 : vector<8x128xf32>
    %182 = math.tanh %181 : vector<8x128xf32>
    %cst_77 = arith.constant 5.000000e-01 : f32
    %183 = vector.broadcast %cst_77 : f32 to vector<8x128xf32>
    %184 = arith.mulf %183, %182 : vector<8x128xf32>
    %cst_78 = arith.constant 5.000000e-01 : f32
    %185 = vector.broadcast %cst_78 : f32 to vector<8x128xf32>
    %186 = arith.addf %184, %185 : vector<8x128xf32>
    %187 = vector.extract_strided_slice %178 {offsets = [0, 128], sizes = [8, 128], strides = [1, 1]} : vector<8x512xf32> to vector<8x128xf32>
    %cst_79 = arith.constant 5.000000e-01 : f32
    %188 = vector.broadcast %cst_79 : f32 to vector<8x128xf32>
    %189 = arith.mulf %188, %187 : vector<8x128xf32>
    %190 = math.tanh %189 : vector<8x128xf32>
    %cst_80 = arith.constant 5.000000e-01 : f32
    %191 = vector.broadcast %cst_80 : f32 to vector<8x128xf32>
    %192 = arith.mulf %191, %190 : vector<8x128xf32>
    %cst_81 = arith.constant 5.000000e-01 : f32
    %193 = vector.broadcast %cst_81 : f32 to vector<8x128xf32>
    %194 = arith.addf %192, %193 : vector<8x128xf32>
    %195 = vector.extract_strided_slice %178 {offsets = [0, 256], sizes = [8, 128], strides = [1, 1]} : vector<8x512xf32> to vector<8x128xf32>
    %196 = math.tanh %195 : vector<8x128xf32>
    %197 = vector.extract_strided_slice %178 {offsets = [0, 384], sizes = [8, 128], strides = [1, 1]} : vector<8x512xf32> to vector<8x128xf32>
    %cst_82 = arith.constant 5.000000e-01 : f32
    %198 = vector.broadcast %cst_82 : f32 to vector<8x128xf32>
    %199 = arith.mulf %198, %197 : vector<8x128xf32>
    %200 = math.tanh %199 : vector<8x128xf32>
    %cst_83 = arith.constant 5.000000e-01 : f32
    %201 = vector.broadcast %cst_83 : f32 to vector<8x128xf32>
    %202 = arith.mulf %201, %200 : vector<8x128xf32>
    %cst_84 = arith.constant 5.000000e-01 : f32
    %203 = vector.broadcast %cst_84 : f32 to vector<8x128xf32>
    %204 = arith.addf %202, %203 : vector<8x128xf32>
    %205 = arith.mulf %194, %168 : vector<8x128xf32>
    %206 = arith.mulf %186, %196 : vector<8x128xf32>
    %207 = arith.addf %205, %206 : vector<8x128xf32>
    %208 = math.tanh %207 : vector<8x128xf32>
    %209 = arith.mulf %204, %208 : vector<8x128xf32>
    %c5_i32 = arith.constant 5 : i32
    %210 = arith.index_cast %c5_i32 : i32 to index
    %c0_85 = arith.constant 0 : index
    %c0_86 = arith.constant 0 : index
    %211 = vector.load %arg9[%210, %c0_85, %c0_86] : memref<8x8x512xbf16, #tpu.memory_space<vmem>>, vector<1x8x512xbf16>
    %212 = vector.shape_cast %211 : vector<1x8x512xbf16> to vector<8x512xbf16>
    %213 = arith.extf %212 : vector<8x512xbf16> to vector<8x512xf32>
    %214 = arith.truncf %209 : vector<8x128xf32> to vector<8x128xbf16>
    %c0_87 = arith.constant 0 : index
    %c0_88 = arith.constant 0 : index
    %215 = vector.load %arg4[%c0_87, %c0_88] : memref<128x512xbf16, #tpu.memory_space<vmem>>, vector<128x512xbf16>
    %cst_89 = arith.constant dense<0.000000e+00> : vector<8x512xf32>
    %216 = tpu.matmul %214, %215, %cst_89 {dimension_numbers = #tpu.dot_dimension_numbers<[1], [0], [0], [1], [0, 0, 1, 1], [], []>} : vector<8x128xbf16>, vector<128x512xbf16>, vector<8x512xf32> -> vector<8x512xf32>
    %217 = arith.addf %213, %216 : vector<8x512xf32>
    %218 = vector.extract_strided_slice %217 {offsets = [0, 0], sizes = [8, 128], strides = [1, 1]} : vector<8x512xf32> to vector<8x128xf32>
    %cst_90 = arith.constant 5.000000e-01 : f32
    %219 = vector.broadcast %cst_90 : f32 to vector<8x128xf32>
    %220 = arith.mulf %219, %218 : vector<8x128xf32>
    %221 = math.tanh %220 : vector<8x128xf32>
    %cst_91 = arith.constant 5.000000e-01 : f32
    %222 = vector.broadcast %cst_91 : f32 to vector<8x128xf32>
    %223 = arith.mulf %222, %221 : vector<8x128xf32>
    %cst_92 = arith.constant 5.000000e-01 : f32
    %224 = vector.broadcast %cst_92 : f32 to vector<8x128xf32>
    %225 = arith.addf %223, %224 : vector<8x128xf32>
    %226 = vector.extract_strided_slice %217 {offsets = [0, 128], sizes = [8, 128], strides = [1, 1]} : vector<8x512xf32> to vector<8x128xf32>
    %cst_93 = arith.constant 5.000000e-01 : f32
    %227 = vector.broadcast %cst_93 : f32 to vector<8x128xf32>
    %228 = arith.mulf %227, %226 : vector<8x128xf32>
    %229 = math.tanh %228 : vector<8x128xf32>
    %cst_94 = arith.constant 5.000000e-01 : f32
    %230 = vector.broadcast %cst_94 : f32 to vector<8x128xf32>
    %231 = arith.mulf %230, %229 : vector<8x128xf32>
    %cst_95 = arith.constant 5.000000e-01 : f32
    %232 = vector.broadcast %cst_95 : f32 to vector<8x128xf32>
    %233 = arith.addf %231, %232 : vector<8x128xf32>
    %234 = vector.extract_strided_slice %217 {offsets = [0, 256], sizes = [8, 128], strides = [1, 1]} : vector<8x512xf32> to vector<8x128xf32>
    %235 = math.tanh %234 : vector<8x128xf32>
    %236 = vector.extract_strided_slice %217 {offsets = [0, 384], sizes = [8, 128], strides = [1, 1]} : vector<8x512xf32> to vector<8x128xf32>
    %cst_96 = arith.constant 5.000000e-01 : f32
    %237 = vector.broadcast %cst_96 : f32 to vector<8x128xf32>
    %238 = arith.mulf %237, %236 : vector<8x128xf32>
    %239 = math.tanh %238 : vector<8x128xf32>
    %cst_97 = arith.constant 5.000000e-01 : f32
    %240 = vector.broadcast %cst_97 : f32 to vector<8x128xf32>
    %241 = arith.mulf %240, %239 : vector<8x128xf32>
    %cst_98 = arith.constant 5.000000e-01 : f32
    %242 = vector.broadcast %cst_98 : f32 to vector<8x128xf32>
    %243 = arith.addf %241, %242 : vector<8x128xf32>
    %244 = arith.mulf %233, %207 : vector<8x128xf32>
    %245 = arith.mulf %225, %235 : vector<8x128xf32>
    %246 = arith.addf %244, %245 : vector<8x128xf32>
    %247 = math.tanh %246 : vector<8x128xf32>
    %248 = arith.mulf %243, %247 : vector<8x128xf32>
    %c6_i32 = arith.constant 6 : i32
    %249 = arith.index_cast %c6_i32 : i32 to index
    %c0_99 = arith.constant 0 : index
    %c0_100 = arith.constant 0 : index
    %250 = vector.load %arg9[%249, %c0_99, %c0_100] : memref<8x8x512xbf16, #tpu.memory_space<vmem>>, vector<1x8x512xbf16>
    %251 = vector.shape_cast %250 : vector<1x8x512xbf16> to vector<8x512xbf16>
    %252 = arith.extf %251 : vector<8x512xbf16> to vector<8x512xf32>
    %253 = arith.truncf %248 : vector<8x128xf32> to vector<8x128xbf16>
    %c0_101 = arith.constant 0 : index
    %c0_102 = arith.constant 0 : index
    %254 = vector.load %arg4[%c0_101, %c0_102] : memref<128x512xbf16, #tpu.memory_space<vmem>>, vector<128x512xbf16>
    %cst_103 = arith.constant dense<0.000000e+00> : vector<8x512xf32>
    %255 = tpu.matmul %253, %254, %cst_103 {dimension_numbers = #tpu.dot_dimension_numbers<[1], [0], [0], [1], [0, 0, 1, 1], [], []>} : vector<8x128xbf16>, vector<128x512xbf16>, vector<8x512xf32> -> vector<8x512xf32>
    %256 = arith.addf %252, %255 : vector<8x512xf32>
    %257 = vector.extract_strided_slice %256 {offsets = [0, 0], sizes = [8, 128], strides = [1, 1]} : vector<8x512xf32> to vector<8x128xf32>
    %cst_104 = arith.constant 5.000000e-01 : f32
    %258 = vector.broadcast %cst_104 : f32 to vector<8x128xf32>
    %259 = arith.mulf %258, %257 : vector<8x128xf32>
    %260 = math.tanh %259 : vector<8x128xf32>
    %cst_105 = arith.constant 5.000000e-01 : f32
    %261 = vector.broadcast %cst_105 : f32 to vector<8x128xf32>
    %262 = arith.mulf %261, %260 : vector<8x128xf32>
    %cst_106 = arith.constant 5.000000e-01 : f32
    %263 = vector.broadcast %cst_106 : f32 to vector<8x128xf32>
    %264 = arith.addf %262, %263 : vector<8x128xf32>
    %265 = vector.extract_strided_slice %256 {offsets = [0, 128], sizes = [8, 128], strides = [1, 1]} : vector<8x512xf32> to vector<8x128xf32>
    %cst_107 = arith.constant 5.000000e-01 : f32
    %266 = vector.broadcast %cst_107 : f32 to vector<8x128xf32>
    %267 = arith.mulf %266, %265 : vector<8x128xf32>
    %268 = math.tanh %267 : vector<8x128xf32>
    %cst_108 = arith.constant 5.000000e-01 : f32
    %269 = vector.broadcast %cst_108 : f32 to vector<8x128xf32>
    %270 = arith.mulf %269, %268 : vector<8x128xf32>
    %cst_109 = arith.constant 5.000000e-01 : f32
    %271 = vector.broadcast %cst_109 : f32 to vector<8x128xf32>
    %272 = arith.addf %270, %271 : vector<8x128xf32>
    %273 = vector.extract_strided_slice %256 {offsets = [0, 256], sizes = [8, 128], strides = [1, 1]} : vector<8x512xf32> to vector<8x128xf32>
    %274 = math.tanh %273 : vector<8x128xf32>
    %275 = vector.extract_strided_slice %256 {offsets = [0, 384], sizes = [8, 128], strides = [1, 1]} : vector<8x512xf32> to vector<8x128xf32>
    %cst_110 = arith.constant 5.000000e-01 : f32
    %276 = vector.broadcast %cst_110 : f32 to vector<8x128xf32>
    %277 = arith.mulf %276, %275 : vector<8x128xf32>
    %278 = math.tanh %277 : vector<8x128xf32>
    %cst_111 = arith.constant 5.000000e-01 : f32
    %279 = vector.broadcast %cst_111 : f32 to vector<8x128xf32>
    %280 = arith.mulf %279, %278 : vector<8x128xf32>
    %cst_112 = arith.constant 5.000000e-01 : f32
    %281 = vector.broadcast %cst_112 : f32 to vector<8x128xf32>
    %282 = arith.addf %280, %281 : vector<8x128xf32>
    %283 = arith.mulf %272, %246 : vector<8x128xf32>
    %284 = arith.mulf %264, %274 : vector<8x128xf32>
    %285 = arith.addf %283, %284 : vector<8x128xf32>
    %286 = math.tanh %285 : vector<8x128xf32>
    %287 = arith.mulf %282, %286 : vector<8x128xf32>
    %c7_i32 = arith.constant 7 : i32
    %288 = arith.index_cast %c7_i32 : i32 to index
    %c0_113 = arith.constant 0 : index
    %c0_114 = arith.constant 0 : index
    %289 = vector.load %arg9[%288, %c0_113, %c0_114] : memref<8x8x512xbf16, #tpu.memory_space<vmem>>, vector<1x8x512xbf16>
    %290 = vector.shape_cast %289 : vector<1x8x512xbf16> to vector<8x512xbf16>
    %291 = arith.extf %290 : vector<8x512xbf16> to vector<8x512xf32>
    %292 = arith.truncf %287 : vector<8x128xf32> to vector<8x128xbf16>
    %c0_115 = arith.constant 0 : index
    %c0_116 = arith.constant 0 : index
    %293 = vector.load %arg4[%c0_115, %c0_116] : memref<128x512xbf16, #tpu.memory_space<vmem>>, vector<128x512xbf16>
    %cst_117 = arith.constant dense<0.000000e+00> : vector<8x512xf32>
    %294 = tpu.matmul %292, %293, %cst_117 {dimension_numbers = #tpu.dot_dimension_numbers<[1], [0], [0], [1], [0, 0, 1, 1], [], []>} : vector<8x128xbf16>, vector<128x512xbf16>, vector<8x512xf32> -> vector<8x512xf32>
    %295 = arith.addf %291, %294 : vector<8x512xf32>
    %296 = vector.extract_strided_slice %295 {offsets = [0, 0], sizes = [8, 128], strides = [1, 1]} : vector<8x512xf32> to vector<8x128xf32>
    %cst_118 = arith.constant 5.000000e-01 : f32
    %297 = vector.broadcast %cst_118 : f32 to vector<8x128xf32>
    %298 = arith.mulf %297, %296 : vector<8x128xf32>
    %299 = math.tanh %298 : vector<8x128xf32>
    %cst_119 = arith.constant 5.000000e-01 : f32
    %300 = vector.broadcast %cst_119 : f32 to vector<8x128xf32>
    %301 = arith.mulf %300, %299 : vector<8x128xf32>
    %cst_120 = arith.constant 5.000000e-01 : f32
    %302 = vector.broadcast %cst_120 : f32 to vector<8x128xf32>
    %303 = arith.addf %301, %302 : vector<8x128xf32>
    %304 = vector.extract_strided_slice %295 {offsets = [0, 128], sizes = [8, 128], strides = [1, 1]} : vector<8x512xf32> to vector<8x128xf32>
    %cst_121 = arith.constant 5.000000e-01 : f32
    %305 = vector.broadcast %cst_121 : f32 to vector<8x128xf32>
    %306 = arith.mulf %305, %304 : vector<8x128xf32>
    %307 = math.tanh %306 : vector<8x128xf32>
    %cst_122 = arith.constant 5.000000e-01 : f32
    %308 = vector.broadcast %cst_122 : f32 to vector<8x128xf32>
    %309 = arith.mulf %308, %307 : vector<8x128xf32>
    %cst_123 = arith.constant 5.000000e-01 : f32
    %310 = vector.broadcast %cst_123 : f32 to vector<8x128xf32>
    %311 = arith.addf %309, %310 : vector<8x128xf32>
    %312 = vector.extract_strided_slice %295 {offsets = [0, 256], sizes = [8, 128], strides = [1, 1]} : vector<8x512xf32> to vector<8x128xf32>
    %313 = math.tanh %312 : vector<8x128xf32>
    %314 = vector.extract_strided_slice %295 {offsets = [0, 384], sizes = [8, 128], strides = [1, 1]} : vector<8x512xf32> to vector<8x128xf32>
    %cst_124 = arith.constant 5.000000e-01 : f32
    %315 = vector.broadcast %cst_124 : f32 to vector<8x128xf32>
    %316 = arith.mulf %315, %314 : vector<8x128xf32>
    %317 = math.tanh %316 : vector<8x128xf32>
    %cst_125 = arith.constant 5.000000e-01 : f32
    %318 = vector.broadcast %cst_125 : f32 to vector<8x128xf32>
    %319 = arith.mulf %318, %317 : vector<8x128xf32>
    %cst_126 = arith.constant 5.000000e-01 : f32
    %320 = vector.broadcast %cst_126 : f32 to vector<8x128xf32>
    %321 = arith.addf %319, %320 : vector<8x128xf32>
    %322 = arith.mulf %311, %285 : vector<8x128xf32>
    %323 = arith.mulf %303, %313 : vector<8x128xf32>
    %324 = arith.addf %322, %323 : vector<8x128xf32>
    %325 = math.tanh %324 : vector<8x128xf32>
    %326 = arith.mulf %321, %325 : vector<8x128xf32>
    %c8_i32 = arith.constant 8 : i32
    %c0_127 = arith.constant 0 : index
    %c0_128 = arith.constant 0 : index
    %327 = vector.load %arg10[%c0_127, %c0_128] : memref<8x128xf32, #tpu.memory_space<vmem>>, vector<8x128xf32>
    tpu.vector_store %arg10[%c0_127, %c0_128], %326 {strides = array<i32>} : memref<8x128xf32, #tpu.memory_space<vmem>>, vector<8x128xf32>,
    %c0_129 = arith.constant 0 : index
    %c0_130 = arith.constant 0 : index
    %328 = vector.load %arg11[%c0_129, %c0_130] : memref<8x128xf32, #tpu.memory_space<vmem>>, vector<8x128xf32>
    tpu.vector_store %arg11[%c0_129, %c0_130], %324 {strides = array<i32>} : memref<8x128xf32, #tpu.memory_space<vmem>>, vector<8x128xf32>,
    %c0_i32_131 = arith.constant 0 : i32
    %329 = arith.cmpi eq, %arg1, %c0_i32_131 : i32
    %330 = arith.extui %329 : i1 to i32
    %c0_i32_132 = arith.constant 0 : i32
    %331 = arith.cmpi ne, %330, %c0_i32_132 : i32
    scf.if %331 {
      %c0_133 = arith.constant 0 : index
      %c0_134 = arith.constant 0 : index
      %332 = vector.load %arg6[%c0_133, %c0_134] : memref<128x128xf32, #tpu.memory_space<vmem>>, vector<128x128xf32>
      %cst_135 = arith.constant dense<0.000000e+00> : vector<8x128xf32>
      %333 = tpu.matmul %326, %332, %cst_135 {dimension_numbers = #tpu.dot_dimension_numbers<[1], [0], [0], [1], [0, 0, 1, 1], [], []>} : vector<8x128xf32>, vector<128x128xf32>, vector<8x128xf32> -> vector<8x128xf32>
      %c0_136 = arith.constant 0 : index
      %c0_137 = arith.constant 0 : index
      %334 = vector.load %arg7[%c0_136, %c0_137] : memref<1x128xf32, #tpu.memory_space<vmem>>, vector<1x128xf32>
      %335 = vector.broadcast %334 : vector<1x128xf32> to vector<8x128xf32>
      %336 = arith.addf %333, %335 : vector<8x128xf32>
      %c0_138 = arith.constant 0 : index
      %c0_139 = arith.constant 0 : index
      %c0_140 = arith.constant 0 : index
      %337 = vector.load %arg8[%c0_138, %c0_139, %c0_140] : memref<1x8x128xf32, #tpu.memory_space<vmem>>, vector<1x8x128xf32>
      %338 = vector.shape_cast %337 : vector<1x8x128xf32> to vector<8x128xf32>
      %339 = vector.shape_cast %336 : vector<8x128xf32> to vector<1x8x128xf32>
      tpu.vector_store %arg8[%c0_138, %c0_139, %c0_140], %339 {strides = array<i32>} : memref<1x8x128xf32, #tpu.memory_space<vmem>>, vector<1x8x128xf32>,
    } else {
    }
    return
  }
  func.func @transform_0(%arg0: i32, %arg1: i32) -> (i32, i32, i32) {
    %c0_i32 = arith.constant 0 : i32
    %c0_i32_0 = arith.constant 0 : i32
    return %arg0, %arg1, %c0_i32 : i32, i32, i32
  }
  func.func @transform_1(%arg0: i32, %arg1: i32) -> (i32, i32) {
    %c0_i32 = arith.constant 0 : i32
    %c0_i32_0 = arith.constant 0 : i32
    %c0_i32_1 = arith.constant 0 : i32
    return %c0_i32, %c0_i32_0 : i32, i32
  }
  func.func @transform_2(%arg0: i32, %arg1: i32) -> (i32, i32) {
    %c0_i32 = arith.constant 0 : i32
    %c0_i32_0 = arith.constant 0 : i32
    %c0_i32_1 = arith.constant 0 : i32
    return %c0_i32, %c0_i32_0 : i32, i32
  }
  func.func @transform_3(%arg0: i32, %arg1: i32) -> (i32, i32) {
    %c0_i32 = arith.constant 0 : i32
    %c0_i32_0 = arith.constant 0 : i32
    %c0_i32_1 = arith.constant 0 : i32
    return %c0_i32, %c0_i32_0 : i32, i32
  }
  func.func @transform_4(%arg0: i32, %arg1: i32) -> (i32, i32) {
    %c0_i32 = arith.constant 0 : i32
    %c0_i32_0 = arith.constant 0 : i32
    %c0_i32_1 = arith.constant 0 : i32
    return %c0_i32, %c0_i32_0 : i32, i32
  }
  func.func @transform_5(%arg0: i32, %arg1: i32) -> (i32, i32) {
    %c0_i32 = arith.constant 0 : i32
    %c0_i32_0 = arith.constant 0 : i32
    %c0_i32_1 = arith.constant 0 : i32
    return %c0_i32, %c0_i32_0 : i32, i32
  }
  func.func @transform_6(%arg0: i32, %arg1: i32) -> (i32, i32, i32) {
    %c0_i32 = arith.constant 0 : i32
    %c0_i32_0 = arith.constant 0 : i32
    %c0_i32_1 = arith.constant 0 : i32
    return %arg0, %c0_i32, %c0_i32_0 : i32, i32, i32
  }
}

</mosaic_0001>

<bundles_post_ra>
// kernel: lstm_forward.1
= control target key start
LH: loop header
LB: loop body
LE: loop exit
PB: predicated region body
PF: predicated region fallthrough
CT: control target
= control target key end

     0   :  { %11 = vsyncpa [#allocation6], 0  ;;  %s4101_s24 = smov [#allocation5]   ;;  %s4102_s26 = smov 256   ;;  %s5354_s0 = inlined_call_operand.vmem [shape: bf16[1,64,672], index: 0, kind: input, shape index: {}]   ;;  %s5355_s1 = inlined_call_operand.hbm [shape: bf16[672,512], index: 1, kind: input, shape index: {}]   ;;  %s5356_s2 = inlined_call_operand.vmem [shape: bf16[128,512], index: 2, kind: input, shape index: {}]   ;;  %s5357_s3 = inlined_call_operand.vmem [shape: f32[1,512], index: 3, kind: input, shape index: {}]   ;;  %s5358_s4 = inlined_call_operand.vmem [shape: f32[128,128], index: 4, kind: input, shape index: {}]   ;;  %s5359_s5 = inlined_call_operand.vmem [shape: f32[1,128], index: 5, kind: input, shape index: {}]   ;;  %s5360_s6 = inlined_call_operand.vmem [shape: f32[1,8,128], index: 6, kind: output, shape index: {}]  }
   0x1   :  { %s18_s23 = sshll.u32 %s5355_s1, 4  ;;  %s20_s25 = sshll.u32 %s4101_s24, 4  ;;  %s19_s23 = int_to_ptr.hbm [resolvable:$true] %s18_s23  ;;  %s21_s25 = int_to_ptr.vmem [resolvable:$true] %s20_s25 }
   0x2   :  { %s4103_s27 = smov 16  }
   0x3   :  { %26 = dma.hbm_to_vmem [thread:$0]  %s19_s23, 21504, %s21_s25, [#allocation6], %s4102_s26, %s4102_s26, %s4103_s27  }
   0x4   :  { %4099 = dma.done.wait [#allocation6], 21504  }
   0x5   :  { %4100 = vsyncadd [#allocation6], 4294945792  ;;  %v3055_v0 = vld [vmem:[#allocation5 + $0xe0] sm:$0xf]  ;;  %v3811_v1 = vld [vmem:[#allocation5 + $0xec] sm:$0xf0] }
   0x6   :  { %v3183_v2 = vld [vmem:[#allocation5 + $0x1e0] sm:$0xf]  ;;  %v3056_v3 = vor.u32 %v3811_v1, %v3055_v0  ;;  %v3843_v4 = vld [vmem:[#allocation5 + $0x1ec] sm:$0xf0]  ;;  %vm1204_vm0 = vcmask 261120  }
   0x7   :  { %v3311_v5 = vld [vmem:[#allocation5 + $0x2e0] sm:$0xf]  ;;  %v3875_v6 = vld [vmem:[#allocation5 + $0x2ec] sm:$0xf0]  ;;  %v3184_v7 = vor.u32 %v3843_v4, %v3183_v2 }
   0x8   :  { %v3312_v8 = vor.u32 %v3875_v6, %v3311_v5  ;;  %v3439_v9 = vld [vmem:[#allocation5 + $0x3e0] sm:$0xf]  ;;  %v3907_v10 = vld [vmem:[#allocation5 + $0x3ec] sm:$0xf0]  ;;  %1217 = vmatpush.bf16.msra.mxu0 %v3056_v3 }
   0x9   :  { %v3039_v11 = vld [vmem:[#allocation5 + $0xc0] sm:$0xf]  ;;  %v3440_v12 = vor.u32 %v3907_v10, %v3439_v9  ;;  %v3807_v13 = vld [vmem:[#allocation5 + $0xcc] sm:$0xf0]  ;;  %1246 = vmatpush.bf16.msra.mxu1 %v3184_v7 }
   0xa   :  { %v3167_v14 = vld [vmem:[#allocation5 + $0x1c0] sm:$0xf]  ;;  %v3839_v15 = vld [vmem:[#allocation5 + $0x1cc] sm:$0xf0]  ;;  %1275 = vmatpush.bf16.msra.mxu2 %v3312_v8  ;;  %v3040_v16 = vor.u32 %v3807_v13, %v3039_v11 }
   0xb   :  { %v3168_v17 = vor.u32 %v3839_v15, %v3167_v14  ;;  %v3295_v18 = vld [vmem:[#allocation5 + $0x2c0] sm:$0xf]  ;;  %v3871_v19 = vld [vmem:[#allocation5 + $0x2cc] sm:$0xf0]  ;;  %1304 = vmatpush.bf16.msra.mxu3 %v3440_v12 }
   0xc   :  { %v3423_v20 = vld [vmem:[#allocation5 + $0x3c0] sm:$0xf]  ;;  %v3296_v21 = vor.u32 %v3871_v19, %v3295_v18  ;;  %v3903_v22 = vld [vmem:[#allocation5 + $0x3cc] sm:$0xf0]  ;;  %1218 = vmatpush.bf16.msra.mxu0 %v3040_v16 }
   0xd   :  { %v3023_v23 = vld [vmem:[#allocation5 + $0xa0] sm:$0xf]  ;;  %v3803_v24 = vld [vmem:[#allocation5 + $0xac] sm:$0xf0]  ;;  %v3424_v25 = vor.u32 %v3903_v22, %v3423_v20  ;;  %1247 = vmatpush.bf16.msra.mxu1 %v3168_v17 }
   0xe   :  { %v3151_v26 = vld [vmem:[#allocation5 + $0x1a0] sm:$0xf]  ;;  %v3835_v27 = vld [vmem:[#allocation5 + $0x1ac] sm:$0xf0]  ;;  %v3024_v29 = vor.u32 %v3803_v24, %v3023_v23  ;;  %1276 = vmatpush.bf16.msra.mxu2 %v3296_v21 }
   0xf   :  { %v3279_v28 = vld [vmem:[#allocation5 + $0x2a0] sm:$0xf]  ;;  %v3867_v30 = vld [vmem:[#allocation5 + $0x2ac] sm:$0xf0]  ;;  %v3152_v33 = vor.u32 %v3835_v27, %v3151_v26  ;;  %1305 = vmatpush.bf16.msra.mxu3 %v3424_v25 }
  0x10   :  { %v3407_v31 = vld [vmem:[#allocation5 + $0x3a0] sm:$0xf]  ;;  %v3899_v32 = vld [vmem:[#allocation5 + $0x3ac] sm:$0xf0]  ;;  %v3280_v34 = vor.u32 %v3867_v30, %v3279_v28  ;;  %1219 = vmatpush.bf16.msra.mxu0 %v3024_v29  ;;  %v3760_v29 = vld [vmem:[%s5354_s0 + $0x14] sm:$0xf0] }
  0x11   :  { %v3007_v35 = vld [vmem:[#allocation5 + $0x80] sm:$0xf]  ;;  %v3799_v36 = vld [vmem:[#allocation5 + $0x8c] sm:$0xf0]  ;;  %v3408_v38 = vor.u32 %v3899_v32, %v3407_v31  ;;  %1248 = vmatpush.bf16.msra.mxu1 %v3152_v33  ;;  %v3757_v33 = vld [vmem:[%s5354_s0 + $0x4] sm:$0xf] }
  0x12   :  { %v3135_v37 = vld [vmem:[#allocation5 + $0x180] sm:$0xf]  ;;  %v3831_v39 = vld [vmem:[#allocation5 + $0x18c] sm:$0xf0]  ;;  %v3008_v44 = vor.u32 %v3799_v36, %v3007_v35  ;;  %1277 = vmatpush.bf16.msra.mxu2 %v3280_v34  ;;  %v2849_v34 = vld [vmem:[%s5354_s0 + $0x18] sm:$0xf0] }
  0x13   :  { %v3263_v40 = vld [vmem:[#allocation5 + $0x280] sm:$0xf]  ;;  %v3863_v41 = vld [vmem:[#allocation5 + $0x28c] sm:$0xf0]  ;;  %v3136_v45 = vor.u32 %v3831_v39, %v3135_v37  ;;  %1306 = vmatpush.bf16.msra.mxu3 %v3408_v38  ;;  %v2855_v35 = vld [vmem:[%s5354_s0 + $0x8] sm:$0xf] }
  0x14   :  { %v3391_v42 = vld [vmem:[#allocation5 + $0x380] sm:$0xf]  ;;  %v3895_v43 = vld [vmem:[#allocation5 + $0x38c] sm:$0xf0]  ;;  %v3264_v46 = vor.u32 %v3863_v41, %v3263_v40  ;;  %1220 = vmatpush.bf16.msra.mxu0 %v3008_v44  ;;  %v3758_v39 = vld [vmem:[%s5354_s0 + $0xc] sm:$0xf] }
  0x15   :  { %v2991_v47 = vld [vmem:[#allocation5 + $0x60] sm:$0xf]  ;;  %v3795_v48 = vld [vmem:[#allocation5 + $0x6c] sm:$0xf0]  ;;  %v3392_v50 = vor.u32 %v3895_v43, %v3391_v42  ;;  %1249 = vmatpush.bf16.msra.mxu1 %v3136_v45  ;;  %v3809_v40 = vld [vmem:[#allocation5 + $0xe4] sm:$0xf] }
  0x16   :  { %v3119_v49 = vld [vmem:[#allocation5 + $0x160] sm:$0xf]  ;;  %v3827_v51 = vld [vmem:[#allocation5 + $0x16c] sm:$0xf0]  ;;  %v2992_v56 = vor.u32 %v3795_v48, %v2991_v47  ;;  %1278 = vmatpush.bf16.msra.mxu2 %v3264_v46  ;;  %v2857_v42 = vld [vmem:[%s5354_s0 + $0x20] sm:$0xf0] }
  0x17   :  { %v3247_v52 = vld [vmem:[#allocation5 + $0x260] sm:$0xf]  ;;  %v3859_v53 = vld [vmem:[#allocation5 + $0x26c] sm:$0xf0]  ;;  %v3120_v57 = vor.u32 %v3827_v51, %v3119_v49  ;;  %1307 = vmatpush.bf16.msra.mxu3 %v3392_v50  ;;  %v3057_v45 = vld [vmem:[#allocation5 + $0xf0] sm:$0xf0]  ;;  %v4169_v51 = vor.u32 %v3757_v33, %v2849_v34 }
  0x18   :  { %v3375_v54 = vld [vmem:[#allocation5 + $0x360] sm:$0xf]  ;;  %v3891_v55 = vld [vmem:[#allocation5 + $0x36c] sm:$0xf0]  ;;  %v3248_v58 = vor.u32 %v3859_v53, %v3247_v52  ;;  %1221 = vmatpush.bf16.msra.mxu0 %v2992_v56  ;;  %v3060_v48 = vor.u32 %v3809_v40, %v3057_v45  ;;  %v3841_v49 = vld [vmem:[#allocation5 + $0x1e4] sm:$0xf] }
  0x19   :  { %v2975_v59 = vld [vmem:[#allocation5 + $0x40] sm:$0xf]  ;;  %v3791_v60 = vld [vmem:[#allocation5 + $0x4c] sm:$0xf0]  ;;  %v3376_v62 = vor.u32 %v3891_v55, %v3375_v54  ;;  %1250 = vmatpush.bf16.msra.mxu1 %v3120_v57  ;;  %v3185_v50 = vld [vmem:[#allocation5 + $0x1f0] sm:$0xf0]  ;;  %v4173_v55 = vor.u32 %v3758_v39, %v2857_v42 }
  0x1a   :  { %v3103_v61 = vld [vmem:[#allocation5 + $0x140] sm:$0xf]  ;;  %v3823_v63 = vld [vmem:[#allocation5 + $0x14c] sm:$0xf0]  ;;  %v2976_v4 = vor.u32 %v3791_v60, %v2975_v59  ;;  %1279 = vmatpush.bf16.msra.mxu2 %v3248_v58  ;;  %v3805_v53 = vld [vmem:[#allocation5 + $0xc4] sm:$0xf]  ;;  %v3188_v58 = vor.u32 %v3841_v49, %v3185_v50 }
  0x1b   :  { %v3231_v0 = vld [vmem:[#allocation5 + $0x240] sm:$0xf]  ;;  %v3855_v1 = vld [vmem:[#allocation5 + $0x24c] sm:$0xf0]  ;;  %v3104_v5 = vor.u32 %v3823_v63, %v3103_v61  ;;  %1308 = vmatpush.bf16.msra.mxu3 %v3376_v62  ;;  %v3041_v54 = vld [vmem:[#allocation5 + $0xd0] sm:$0xf0] }
  0x1c   :  { %v3359_v2 = vld [vmem:[#allocation5 + $0x340] sm:$0xf]  ;;  %v3887_v3 = vld [vmem:[#allocation5 + $0x34c] sm:$0xf0]  ;;  %v3232_v6 = vor.u32 %v3855_v1, %v3231_v0  ;;  %1222 = vmatpush.bf16.msra.mxu0 %v2976_v4  ;;  %v3044_v60 = vor.u32 %v3805_v53, %v3041_v54  ;;  %v3837_v61 = vld [vmem:[#allocation5 + $0x1c4] sm:$0xf] }
  0x1d   :  { %v2959_v7 = vld [vmem:[#allocation5 + $0x20] sm:$0xf]  ;;  %v3787_v8 = vld [vmem:[#allocation5 + $0x2c] sm:$0xf0]  ;;  %v3360_v10 = vor.u32 %v3887_v3, %v3359_v2  ;;  %1251 = vmatpush.bf16.msra.mxu1 %v3104_v5  ;;  %v3169_v62 = vld [vmem:[#allocation5 + $0x1d0] sm:$0xf0] }
  0x1e   :  { %v3087_v9 = vld [vmem:[#allocation5 + $0x120] sm:$0xf]  ;;  %v3819_v11 = vld [vmem:[#allocation5 + $0x12c] sm:$0xf0]  ;;  %v2960_v16 = vor.u32 %v3787_v8, %v2959_v7  ;;  %1280 = vmatpush.bf16.msra.mxu2 %v3232_v6  ;;  %v3801_v63 = vld [vmem:[#allocation5 + $0xa4] sm:$0xf]  ;;  %v3172_v2 = vor.u32 %v3837_v61, %v3169_v62 }
  0x1f   :  { %v3215_v12 = vld [vmem:[#allocation5 + $0x220] sm:$0xf]  ;;  %v3851_v13 = vld [vmem:[#allocation5 + $0x22c] sm:$0xf0]  ;;  %v3088_v20 = vor.u32 %v3819_v11, %v3087_v9  ;;  %1309 = vmatpush.bf16.msra.mxu3 %v3360_v10  ;;  %v3025_v3 = vld [vmem:[#allocation5 + $0xb0] sm:$0xf0] }
  0x20   :  { %v3343_v14 = vld [vmem:[#allocation5 + $0x320] sm:$0xf]  ;;  %v3883_v15 = vld [vmem:[#allocation5 + $0x32c] sm:$0xf0]  ;;  %v3216_v21 = vor.u32 %v3851_v13, %v3215_v12  ;;  %1223 = vmatpush.bf16.msra.mxu0 %v2960_v16  ;;  %v3028_v5 = vor.u32 %v3801_v63, %v3025_v3  ;;  %v3833_v6 = vld [vmem:[#allocation5 + $0x1a4] sm:$0xf] }
  0x21   :  { %v2943_v17 = vld [vmem:[#allocation5] sm:$0xf]  ;;  %v3783_v18 = vld [vmem:[#allocation5 + $0xc] sm:$0xf0]  ;;  %v3344_v25 = vor.u32 %v3883_v15, %v3343_v14  ;;  %1252 = vmatpush.bf16.msra.mxu1 %v3088_v20  ;;  %v3153_v7 = vld [vmem:[#allocation5 + $0x1b0] sm:$0xf0] }
  0x22   :  { %v3071_v19 = vld [vmem:[#allocation5 + $0x100] sm:$0xf]  ;;  %v3815_v22 = vld [vmem:[#allocation5 + $0x10c] sm:$0xf0]  ;;  %v2944_v32 = vor.u32 %v3783_v18, %v2943_v17  ;;  %1281 = vmatpush.bf16.msra.mxu2 %v3216_v21  ;;  %v3797_v8 = vld [vmem:[#allocation5 + $0x84] sm:$0xf]  ;;  %v3156_v12 = vor.u32 %v3833_v6, %v3153_v7 }
  0x23   :  { %v3199_v23 = vld [vmem:[#allocation5 + $0x200] sm:$0xf]  ;;  %v3847_v24 = vld [vmem:[#allocation5 + $0x20c] sm:$0xf0]  ;;  %v3072_v36 = vor.u32 %v3815_v22, %v3071_v19  ;;  %1310 = vmatpush.bf16.msra.mxu3 %v3344_v25  ;;  %v3009_v9 = vld [vmem:[#allocation5 + $0x90] sm:$0xf0] }
  0x24   :  { %v3327_v26 = vld [vmem:[#allocation5 + $0x300] sm:$0xf]  ;;  %v3879_v27 = vld [vmem:[#allocation5 + $0x30c] sm:$0xf0]  ;;  %v3200_v37 = vor.u32 %v3847_v24, %v3199_v23  ;;  %1224 = vmatpush.bf16.msra.mxu0 %v2944_v32  ;;  %v3012_v14 = vor.u32 %v3797_v8, %v3009_v9  ;;  %v3829_v15 = vld [vmem:[#allocation5 + $0x184] sm:$0xf] }
  0x25   :  { %v2847_v28 = vld [vmem:[%s5354_s0] sm:$0xf]  ;;  %v3939_v31 = vld [vmem:[#allocation5 + $0x4ec] sm:$0xf0]  ;;  %v3328_v41 = vor.u32 %v3879_v27, %v3327_v26  ;;  %1253 = vmatpush.bf16.msra.mxu1 %v3072_v36  ;;  %v3137_v16 = vld [vmem:[#allocation5 + $0x190] sm:$0xf0] }
  0x26   :  { %v3567_v30 = vld [vmem:[#allocation5 + $0x4e0] sm:$0xf]  ;;  %v4167_v46 = vor.u32 %v3760_v29, %v2847_v28  ;;  %v3935_v47 = vld [vmem:[#allocation5 + $0x4cc] sm:$0xf0]  ;;  %1282 = vmatpush.bf16.msra.mxu2 %v3200_v37  ;;  %v3766_v18 = vld [vmem:[%s5354_s0 + $0x44] sm:$0xf0]  ;;  %v3140_v26 = vor.u32 %v3829_v15, %v3137_v16 }
  0x27   :  { %v3761_v38 = vld [vmem:[%s5354_s0 + $0x1c] sm:$0xf0]  ;;  %v3568_v43 = vor.u32 %v3939_v31, %v3567_v30  ;;  %1311 = vmatpush.bf16.msra.mxu3 %v3328_v41  ;;  %v3931_v59 = vld [vmem:[#allocation5 + $0x4ac] sm:$0xf0]  ;;  %v3763_v19 = vld [vmem:[%s5354_s0 + $0x34] sm:$0xf] }
  0x28   :  { %v3551_v44 = vld [vmem:[#allocation5 + $0x4c0] sm:$0xf]  ;;  %v4171_v52 = vor.u32 %v3761_v38, %v2855_v35  ;;  %1225 = vmatmul.bf16.vlgmr.msra.gmra.mxu0 %v4167_v46  ;;  %1254 = vmatmul.bf16.vlgmr.msra.gmra.mxu1 %v4169_v51  ;;  %v3927_v4 = vld [vmem:[#allocation5 + $0x48c] sm:$0xf0]  ;;  %v2873_v20 = vld [vmem:[%s5354_s0 + $0x48] sm:$0xf0] }
  0x29   :  { %3981 = vmatpush.bf16.msrb.mxu1 %v3568_v43  ;;  %v3552_v56 = vor.u32 %v3935_v47, %v3551_v44  ;;  %v3535_v57 = vld [vmem:[#allocation5 + $0x4a0] sm:$0xf]  ;;  %1333 = vmatpush.bf16.msrb.mxu0 %v3568_v43  ;;  %v3923_v13 = vld [vmem:[#allocation5 + $0x46c] sm:$0xf0]  ;;  %v2879_v21 = vld [vmem:[%s5354_s0 + $0x38] sm:$0xf]  ;;  %v4205_v30 = vor.u32 %v3763_v19, %v2873_v20 }
  0x2a   :  { %1391 = vmatpush.bf16.msrb.mxu2 %v3060_v48  ;;  %1312 = vmatmul.bf16.vlgmr.msra.gmra.mxu3 %v4173_v55  ;;  %v3536_v0 = vor.u32 %v3931_v59, %v3535_v57  ;;  %v3519_v1 = vld [vmem:[#allocation5 + $0x480] sm:$0xf]  ;;  %v2871_v17 = vld [vmem:[%s5354_s0 + $0x30] sm:$0xf]  ;;  %v3764_v23 = vld [vmem:[%s5354_s0 + $0x3c] sm:$0xf] }
  0x2b   :  { %1283 = vmatmul.bf16.vlgmr.msra.gmra.mxu2 %v4171_v52  ;;  %1420 = vmatpush.bf16.msrb.mxu3 %v3188_v58  ;;  %v3520_v10 = vor.u32 %v3927_v4, %v3519_v1  ;;  %v3503_v11 = vld [vmem:[#allocation5 + $0x460] sm:$0xf]  ;;  %v3767_v22 = vld [vmem:[%s5354_s0 + $0x4c] sm:$0xf0]  ;;  %v2881_v24 = vld [vmem:[%s5354_s0 + $0x50] sm:$0xf0]  ;;  %v4203_v27 = vor.u32 %v3766_v18, %v2871_v17 }
  0x2c   :  { %v3504_v25 = vor.u32 %v3923_v13, %v3503_v11  ;;  %v3487_v28 = vld [vmem:[#allocation5 + $0x440] sm:$0xf]  ;;  %v3919_v29 = vld [vmem:[#allocation5 + $0x44c] sm:$0xf0]  ;;  %v4207_v31 = vor.u32 %v3767_v22, %v2879_v21  ;;  %v4209_v32 = vor.u32 %v3764_v23, %v2881_v24  ;;  %v3793_v34 = vld [vmem:[#allocation5 + $0x64] sm:$0xf] }
  0x2d   :  { %3982 = vmatpush.bf16.msrb.mxu1 %v3552_v56  ;;  %1334 = vmatpush.bf16.msrb.mxu0 %v3552_v56  ;;  %v3488_v33 = vor.u32 %v3919_v29, %v3487_v28  ;;  %v2993_v35 = vld [vmem:[#allocation5 + $0x70] sm:$0xf0]  ;;  %v3825_v36 = vld [vmem:[#allocation5 + $0x164] sm:$0xf]  ;;  %v3471_v37 = vld [vmem:[#allocation5 + $0x420] sm:$0xf] }
  0x2e   :  { %1392 = vmatpush.bf16.msrb.mxu2 %v3044_v60  ;;  %v3915_v38 = vld [vmem:[#allocation5 + $0x42c] sm:$0xf0]  ;;  %v2996_v39 = vor.u32 %v3793_v34, %v2993_v35  ;;  %v3121_v40 = vld [vmem:[#allocation5 + $0x170] sm:$0xf0]  ;;  %v3789_v43 = vld [vmem:[#allocation5 + $0x44] sm:$0xf] }
  0x2f   :  { %1421 = vmatpush.bf16.msrb.mxu3 %v3172_v2  ;;  %v3472_v41 = vor.u32 %v3915_v38, %v3471_v37  ;;  %v3124_v42 = vor.u32 %v3825_v36, %v3121_v40  ;;  %v2977_v44 = vld [vmem:[#allocation5 + $0x50] sm:$0xf0]  ;;  %v3821_v45 = vld [vmem:[#allocation5 + $0x144] sm:$0xf]  ;;  %v3455_v49 = vld [vmem:[#allocation5 + $0x400] sm:$0xf] }
  0x30   :  { %v2980_v47 = vor.u32 %v3789_v43, %v2977_v44  ;;  %v3105_v48 = vld [vmem:[#allocation5 + $0x150] sm:$0xf0]  ;;  %v3911_v50 = vld [vmem:[#allocation5 + $0x40c] sm:$0xf0]  ;;  %v3785_v54 = vld [vmem:[#allocation5 + $0x24] sm:$0xf] }
  0x31   :  { %3983 = vmatpush.bf16.msrb.mxu1 %v3536_v0  ;;  %1335 = vmatpush.bf16.msrb.mxu0 %v3536_v0  ;;  %v3108_v53 = vor.u32 %v3821_v45, %v3105_v48  ;;  %v2961_v56 = vld [vmem:[#allocation5 + $0x30] sm:$0xf0]  ;;  %v3817_v57 = vld [vmem:[#allocation5 + $0x124] sm:$0xf]  ;;  %v3456_v59 = vor.u32 %v3911_v50, %v3455_v49  ;;  %v2895_v60 = vld [vmem:[%s5354_s0 + $0x60] sm:$0xf] }
  0x32   :  { %1393 = vmatpush.bf16.msrb.mxu2 %v3028_v5  ;;  %v3089_v58 = vld [vmem:[#allocation5 + $0x130] sm:$0xf0]  ;;  %v3772_v61 = vld [vmem:[%s5354_s0 + $0x74] sm:$0xf0]  ;;  %v2964_v62 = vor.u32 %v3785_v54, %v2961_v56  ;;  %v3769_v63 = vld [vmem:[%s5354_s0 + $0x64] sm:$0xf] }
  0x33   :  { %1422 = vmatpush.bf16.msrb.mxu3 %v3156_v12  ;;  %v3092_v0 = vor.u32 %v3817_v57, %v3089_v58  ;;  %v3781_v1 = vld [vmem:[#allocation5 + $0x4] sm:$0xf]  ;;  %v2945_v2 = vld [vmem:[#allocation5 + $0x10] sm:$0xf0]  ;;  %v2897_v3 = vld [vmem:[%s5354_s0 + $0x78] sm:$0xf0]  ;;  %v4239_v8 = vor.u32 %v3772_v61, %v2895_v60 }
  0x34   :  { %v2903_v4 = vld [vmem:[%s5354_s0 + $0x68] sm:$0xf]  ;;  %v3773_v5 = vld [vmem:[%s5354_s0 + $0x7c] sm:$0xf0]  ;;  %v3770_v6 = vld [vmem:[%s5354_s0 + $0x6c] sm:$0xf]  ;;  %v2948_v9 = vor.u32 %v3781_v1, %v2945_v2  ;;  %v4241_v12 = vor.u32 %v3769_v63, %v2897_v3 }
  0x35   :  { %3984 = vmatpush.bf16.msrb.mxu1 %v3520_v10  ;;  %1336 = vmatpush.bf16.msrb.mxu0 %v3520_v10  ;;  %v2905_v7 = vld [vmem:[%s5354_s0 + $0x80] sm:$0xf0]  ;;  %v3073_v11 = vld [vmem:[#allocation5 + $0x110] sm:$0xf0]  ;;  %v4243_v13 = vor.u32 %v3773_v5, %v2903_v4  ;;  %v3599_v16 = vld [vmem:[#allocation5 + $0x520] sm:$0xf] }
  0x36   :  { %1394 = vmatpush.bf16.msrb.mxu2 %v3012_v14  ;;  %v3813_v10 = vld [vmem:[#allocation5 + $0x104] sm:$0xf]  ;;  %v4245_v14 = vor.u32 %v3770_v6, %v2905_v7  ;;  %v3947_v17 = vld [vmem:[#allocation5 + $0x52c] sm:$0xf0]  ;;  %v3583_v19 = vld [vmem:[#allocation5 + $0x500] sm:$0xf] }
  0x37   :  { %1423 = vmatpush.bf16.msrb.mxu3 %v3140_v26  ;;  %v3076_v15 = vor.u32 %v3813_v10, %v3073_v11  ;;  %v3600_v18 = vor.u32 %v3947_v17, %v3599_v16  ;;  %v3943_v20 = vld [vmem:[#allocation5 + $0x50c] sm:$0xf0]  ;;  %v3778_v23 = vld [vmem:[%s5354_s0 + $0xa4] sm:$0xf0]  ;;  %v3775_v24 = vld [vmem:[%s5354_s0 + $0x94] sm:$0xf] }
  0x38   :  { %1230 = vmatmul.bf16.gmra.mxu0 %v4203_v27  ;;  %1259 = vmatmul.bf16.gmra.mxu1 %v4205_v30  ;;  %v3584_v21 = vor.u32 %v3943_v20, %v3583_v19  ;;  %v2919_v22 = vld [vmem:[%s5354_s0 + $0x90] sm:$0xf]  ;;  %v2927_v26 = vld [vmem:[%s5354_s0 + $0x98] sm:$0xf]  ;;  %v3776_v29 = vld [vmem:[%s5354_s0 + $0x9c] sm:$0xf] }
  0x39   :  { %3985 = vmatpush.bf16.msrb.mxu1 %v3504_v25  ;;  %1337 = vmatpush.bf16.msrb.mxu0 %v3504_v25  ;;  %v2921_v25 = vld [vmem:[%s5354_s0 + $0xa8] sm:$0xf0]  ;;  %v3779_v28 = vld [vmem:[%s5354_s0 + $0xac] sm:$0xf0]  ;;  %v4275_v34 = vor.u32 %v3778_v23, %v2919_v22  ;;  %v3873_v38 = vld [vmem:[#allocation5 + $0x2e4] sm:$0xf] }
  0x3a   :  { %1317 = vmatmul.bf16.gmra.mxu3 %v4209_v32  ;;  %1395 = vmatpush.bf16.msrb.mxu2 %v2996_v39  ;;  %v4277_v35 = vor.u32 %v3775_v24, %v2921_v25  ;;  %v4279_v36 = vor.u32 %v3779_v28, %v2927_v26  ;;  %v3313_v39 = vld [vmem:[#allocation5 + $0x2f0] sm:$0xf0]  ;;  %v3869_v43 = vld [vmem:[#allocation5 + $0x2c4] sm:$0xf]  ;;  %v3762_v63 = vld [vmem:[%s5354_s0 + $0x24] sm:$0xf0] }
  0x3b   :  { %1288 = vmatmul.bf16.gmra.mxu2 %v4207_v31  ;;  %1424 = vmatpush.bf16.msrb.mxu3 %v3124_v42  ;;  %v3316_v40 = vor.u32 %v3873_v38, %v3313_v39  ;;  %v3569_v42 = vld [vmem:[#allocation5 + $0x4f0] sm:$0xf0]  ;;  %v3945_v48 = vld [vmem:[#allocation5 + $0x524] sm:$0xf]  ;;  %v3780_v1 = vld [vmem:[%s5354_s0 + $0xb4] sm:$0xf0] }
  0x3c   :  { %v3297_v44 = vld [vmem:[#allocation5 + $0x2d0] sm:$0xf0]  ;;  %v3865_v57 = vld [vmem:[#allocation5 + $0x2a4] sm:$0xf] }
  0x3d   :  { %3986 = vmatpush.bf16.msrb.mxu1 %v3488_v33  ;;  %1338 = vmatpush.bf16.msrb.mxu0 %v3488_v33  ;;  %v2929_v33 = vld [vmem:[%s5354_s0 + $0xb0] sm:$0xf0]  ;;  %v3861_v60 = vld [vmem:[#allocation5 + $0x284] sm:$0xf] }
  0x3e   :  { %1396 = vmatpush.bf16.msrb.mxu2 %v2980_v47  ;;  %v4281_v37 = vor.u32 %v3776_v29, %v2929_v33  ;;  %v3300_v47 = vor.u32 %v3869_v43, %v3297_v44  ;;  %v3601_v49 = vld [vmem:[#allocation5 + $0x530] sm:$0xf0]  ;;  %v3905_v2 = vld [vmem:[#allocation5 + $0x3e4] sm:$0xf] }
  0x3f   :  { %1425 = vmatpush.bf16.msrb.mxu3 %v3108_v53  ;;  %v3604_v50 = vor.u32 %v3945_v48, %v3601_v49  ;;  %v3933_v53 = vld [vmem:[#allocation5 + $0x4c4] sm:$0xf]  ;;  %v3553_v54 = vld [vmem:[#allocation5 + $0x4d0] sm:$0xf0]  ;;  %v2865_v49 = vld [vmem:[%s5354_s0 + $0x28] sm:$0xf0] }
  0x40   :  { %v3556_v56 = vor.u32 %v3933_v53, %v3553_v54  ;;  %v3281_v58 = vld [vmem:[#allocation5 + $0x2b0] sm:$0xf0]  ;;  %v3857_v11 = vld [vmem:[#allocation5 + $0x264] sm:$0xf] }
  0x41   :  { %3987 = vmatpush.bf16.msrb.mxu1 %v3472_v41  ;;  %1339 = vmatpush.bf16.msrb.mxu0 %v3472_v41  ;;  %v3937_v41 = vld [vmem:[#allocation5 + $0x4e4] sm:$0xf]  ;;  %v3265_v61 = vld [vmem:[#allocation5 + $0x290] sm:$0xf0] }
  0x42   :  { %1397 = vmatpush.bf16.msrb.mxu2 %v2964_v62  ;;  %v3572_v45 = vor.u32 %v3937_v41, %v3569_v42  ;;  %v2863_v62 = vld [vmem:[%s5354_s0 + $0x10] sm:$0xf]  ;;  %v3441_v3 = vld [vmem:[#allocation5 + $0x3f0] sm:$0xf0]  ;;  %v3268_v4 = vor.u32 %v3861_v60, %v3265_v61  ;;  %v3929_v20 = vld [vmem:[#allocation5 + $0x4a4] sm:$0xf] }
  0x43   :  { %1426 = vmatpush.bf16.msrb.mxu3 %v3092_v0  ;;  %v2935_v0 = vld [vmem:[%s5354_s0 + $0xa0] sm:$0xf]  ;;  %v4299_v5 = vor.u32 %v3762_v63, %v2863_v62  ;;  %v3444_v7 = vor.u32 %v3905_v2, %v3441_v3  ;;  %v3425_v10 = vld [vmem:[#allocation5 + $0x3d0] sm:$0xf0]  ;;  %v3853_v22 = vld [vmem:[#allocation5 + $0x244] sm:$0xf] }
  0x44   :  { %v4301_v6 = vor.u32 %v3780_v1, %v2935_v0  ;;  %v3409_v19 = vld [vmem:[#allocation5 + $0x3b0] sm:$0xf0]  ;;  %v3925_v26 = vld [vmem:[#allocation5 + $0x484] sm:$0xf] }
  0x45   :  { %3988 = vmatpush.bf16.msrb.mxu1 %v3456_v59  ;;  %1340 = vmatpush.bf16.msrb.mxu0 %v3456_v59  ;;  %v3284_v59 = vor.u32 %v3865_v57, %v3281_v58  ;;  %v3233_v23 = vld [vmem:[#allocation5 + $0x250] sm:$0xf0]  ;;  %v3849_v29 = vld [vmem:[#allocation5 + $0x224] sm:$0xf] }
  0x46   :  { %1398 = vmatpush.bf16.msrb.mxu2 %v2948_v9  ;;  %v3901_v9 = vld [vmem:[#allocation5 + $0x3c4] sm:$0xf]  ;;  %v3236_v25 = vor.u32 %v3853_v22, %v3233_v23  ;;  %v3521_v28 = vld [vmem:[#allocation5 + $0x490] sm:$0xf0] }
  0x47   :  { %1427 = vmatpush.bf16.msrb.mxu3 %v3076_v15  ;;  %v3249_v15 = vld [vmem:[#allocation5 + $0x270] sm:$0xf0]  ;;  %v3428_v17 = vor.u32 %v3901_v9, %v3425_v10  ;;  %v3524_v39 = vor.u32 %v3925_v26, %v3521_v28  ;;  %v3845_v43 = vld [vmem:[#allocation5 + $0x204] sm:$0xf] }
  0x48   :  { %1235 = vmatmul.bf16.gmra.mxu0 %v4239_v8  ;;  %1264 = vmatmul.bf16.gmra.mxu1 %v4241_v12  ;;  %v3252_v16 = vor.u32 %v3857_v11, %v3249_v15  ;;  %v3217_v33 = vld [vmem:[#allocation5 + $0x230] sm:$0xf0]  ;;  %v3921_v57 = vld [vmem:[#allocation5 + $0x464] sm:$0xf] }
  0x49   :  { %1368 = vmatpush.bf16.msra.mxu1 %v3600_v18  ;;  %1449 = vmatpush.bf16.msra.mxu0 %v3316_v40  ;;  %v3897_v18 = vld [vmem:[#allocation5 + $0x3a4] sm:$0xf]  ;;  %v3393_v41 = vld [vmem:[#allocation5 + $0x390] sm:$0xf0]  ;;  %v3220_v42 = vor.u32 %v3849_v29, %v3217_v33 }
  0x4a   :  { %1322 = vmatmul.bf16.gmra.mxu3 %v4245_v14  ;;  %1507 = vmatpush.bf16.msra.mxu2 %v3572_v45  ;;  %v3412_v38 = vor.u32 %v3897_v18, %v3409_v19  ;;  %v3893_v40 = vld [vmem:[#allocation5 + $0x384] sm:$0xf]  ;;  %v3201_v44 = vld [vmem:[#allocation5 + $0x210] sm:$0xf0]  ;;  %v2887_v45 = vld [vmem:[%s5354_s0 + $0x40] sm:$0xf] }
  0x4b   :  { %1293 = vmatmul.bf16.gmra.mxu2 %v4243_v13  ;;  %1542 = vmatpush.bf16.msra.mxu3 %v3604_v50  ;;  %v3759_v48 = vld [vmem:[%s5354_s0 + $0x14] sm:$0xf]  ;;  %v3396_v50 = vor.u32 %v3893_v40, %v3393_v41  ;;  %v3204_v53 = vor.u32 %v3845_v43, %v3201_v44  ;;  %v3889_v60 = vld [vmem:[#allocation5 + $0x364] sm:$0xf]  ;;  %v3774_v18 = vld [vmem:[%s5354_s0 + $0x84] sm:$0xf0] }
  0x4c   :  { %v3505_v58 = vld [vmem:[#allocation5 + $0x470] sm:$0xf0]  ;;  %v3917_v62 = vld [vmem:[#allocation5 + $0x444] sm:$0xf]  ;;  %v2913_v41 = vld [vmem:[%s5354_s0 + $0x88] sm:$0xf0] }
  0x4d   :  { %1369 = vmatpush.bf16.msra.mxu1 %v3584_v21  ;;  %1450 = vmatpush.bf16.msra.mxu0 %v3300_v47  ;;  %v3537_v21 = vld [vmem:[#allocation5 + $0x4b0] sm:$0xf0]  ;;  %v3768_v47 = vld [vmem:[%s5354_s0 + $0x54] sm:$0xf0]  ;;  %v3941_v1 = vld [vmem:[#allocation5 + $0x504] sm:$0xf] }
  0x4e   :  { %1508 = vmatpush.bf16.msra.mxu2 %v3556_v56  ;;  %v3540_v24 = vor.u32 %v3929_v20, %v3537_v21  ;;  %v4319_v54 = vor.u32 %v3768_v47, %v2887_v45  ;;  %v4321_v56 = vor.u32 %v3759_v48, %v2865_v49  ;;  %v3377_v61 = vld [vmem:[#allocation5 + $0x370] sm:$0xf0]  ;;  %v3913_v10 = vld [vmem:[#allocation5 + $0x424] sm:$0xf]  ;;  %v2889_v20 = vld [vmem:[%s5354_s0 + $0x58] sm:$0xf0] }
  0x4f   :  { %v3380_v63 = vor.u32 %v3889_v60, %v3377_v61  ;;  %v3489_v0 = vld [vmem:[#allocation5 + $0x450] sm:$0xf0]  ;;  %v3765_v19 = vld [vmem:[%s5354_s0 + $0x44] sm:$0xf]  ;;  %v3063_v43 = vld [vmem:[#allocation5 + $0xe8] sm:$0xf] }
  0x50   :  { %v3585_v2 = vld [vmem:[#allocation5 + $0x510] sm:$0xf0]  ;;  %v3492_v3 = vor.u32 %v3917_v62, %v3489_v0  ;;  %v3909_v22 = vld [vmem:[#allocation5 + $0x404] sm:$0xf]  ;;  %v3812_v44 = vld [vmem:[#allocation5 + $0xf4] sm:$0xf0] }
  0x51   :  { %1451 = vmatpush.bf16.msra.mxu0 %v3284_v59  ;;  %v3508_v59 = vor.u32 %v3921_v57, %v3505_v58  ;;  %v3361_v9 = vld [vmem:[#allocation5 + $0x350] sm:$0xf0]  ;;  %v3881_v26 = vld [vmem:[#allocation5 + $0x324] sm:$0xf]  ;;  %v3064_v45 = vor.u32 %v3812_v44, %v3063_v43  ;;  %v3191_v47 = vld [vmem:[#allocation5 + $0x1e8] sm:$0xf] }
  0x52   :  { %1509 = vmatpush.bf16.msra.mxu2 %v3540_v24  ;;  %v3473_v15 = vld [vmem:[#allocation5 + $0x430] sm:$0xf0]  ;;  %v4342_v24 = vor.u32 %v3765_v19, %v2889_v20  ;;  %v3877_v33 = vld [vmem:[#allocation5 + $0x304] sm:$0xf]  ;;  %v3844_v48 = vld [vmem:[#allocation5 + $0x1f4] sm:$0xf0] }
  0x53   :  { %v3457_v23 = vld [vmem:[#allocation5 + $0x410] sm:$0xf0]  ;;  %v3319_v49 = vld [vmem:[#allocation5 + $0x2e8] sm:$0xf]  ;;  %v4365_v57 = vld [vmem:[%s5357_s3] sm:$0xf] }
  0x54   :  { %v3345_v28 = vld [vmem:[#allocation5 + $0x330] sm:$0xf0]  ;;  %v3808_v60 = vld [vmem:[#allocation5 + $0xd4] sm:$0xf0]  ;;  %v4368_v62 = vperm.slane %v4365_v57, 0 }
  0x55   :  { %1452 = vmatpush.bf16.msra.mxu0 %v3268_v4  ;;  %v3588_v4 = vor.u32 %v3941_v1, %v3585_v2  ;;  %v3348_v29 = vor.u32 %v3881_v26, %v3345_v28  ;;  %v3771_v40 = vld [vmem:[%s5354_s0 + $0x74] sm:$0xf]  ;;  %v3447_v0 = vld [vmem:[#allocation5 + $0x3e8] sm:$0xf]  ;;  %v3908_v1 = vld [vmem:[#allocation5 + $0x3f4] sm:$0xf0] }
  0x56   :  { %1510 = vmatpush.bf16.msra.mxu2 %v3524_v39  ;;  %v3175_v2 = vld [vmem:[#allocation5 + $0x1c8] sm:$0xf]  ;;  %v3800_v20 = vld [vmem:[#allocation5 + $0x94] sm:$0xf0] }
  0x57   :  { %1543 = vmatpush.bf16.msra.mxu3 %v3588_v4  ;;  %v3840_v4 = vld [vmem:[#allocation5 + $0x1d4] sm:$0xf0]  ;;  %v3015_v19 = vld [vmem:[#allocation5 + $0x88] sm:$0xf] }
  0x58   :  { %1240 = vmatmul.bf16.gmra.mxu0 %v4275_v34  ;;  %1269 = vmatmul.bf16.gmra.mxu1 %v4277_v35  ;;  %v3016_v28 = vor.u32 %v3800_v20, %v3015_v19  ;;  %v3159_v43 = vld [vmem:[#allocation5 + $0x1a8] sm:$0xf]  ;;  %v3836_v44 = vld [vmem:[#allocation5 + $0x1b4] sm:$0xf0] }
  0x59   :  { %1453 = vmatpush.bf16.msra.mxu0 %v3252_v16  ;;  %v3476_v16 = vor.u32 %v3913_v10, %v3473_v15  ;;  %v2937_v10 = vld [vmem:[%s5354_s0 + $0xb8] sm:$0xf0]  ;;  %v2967_v20 = vld [vmem:[#allocation5 + $0x28] sm:$0xf] }
  0x5a   :  { %1327 = vmatmul.bf16.gmra.mxu3 %v4281_v37  ;;  %1511 = vmatpush.bf16.msra.mxu2 %v3508_v59  ;;  %v3047_v59 = vld [vmem:[#allocation5 + $0xc8] sm:$0xf] }
  0x5b   :  { %1298 = vmatmul.bf16.gmra.mxu2 %v4279_v36  ;;  %v3048_v61 = vor.u32 %v3808_v60, %v3047_v59  ;;  %v3792_v59 = vld [vmem:[#allocation5 + $0x54] sm:$0xf0] }
  0x5d   :  { %1454 = vmatpush.bf16.msra.mxu0 %v3236_v25  ;;  %v3460_v25 = vor.u32 %v3909_v22, %v3457_v23 }
  0x5e   :  { %1512 = vmatpush.bf16.msra.mxu2 %v3492_v3  ;;  %v3448_v3 = vor.u32 %v3908_v1, %v3447_v0 }
  0x61   :  { %1455 = vmatpush.bf16.msra.mxu0 %v3220_v42  ;;  %v4355_v42 = vor.u32 %v3771_v40, %v2913_v41  ;;  %v3796_v41 = vld [vmem:[#allocation5 + $0x74] sm:$0xf0] }
  0x62   :  { %1513 = vmatpush.bf16.msra.mxu2 %v3476_v16  ;;  %v3031_v16 = vld [vmem:[#allocation5 + $0xa8] sm:$0xf] }
  0x65   :  { %1456 = vmatpush.bf16.msra.mxu0 %v3204_v53  ;;  %v3876_v53 = vld [vmem:[#allocation5 + $0x2f4] sm:$0xf0] }
  0x66   :  { %1514 = vmatpush.bf16.msra.mxu2 %v3460_v25  ;;  %v3320_v58 = vor.u32 %v3876_v53, %v3319_v49  ;;  %v3868_v49 = vld [vmem:[#allocation5 + $0x2b4] sm:$0xf0] }
  0x68   :  { %1341 = vmatmul.bf16.vlgmr.msrb.gmra.mxu0 %v4299_v5  ;;  %1356 = vmatmul.bf16.vlgmr.msrb.gmra.mxu1 %v4301_v6 }
  0x69   :  { %1478 = vmatpush.bf16.msrb.mxu1 %v3444_v7  ;;  %v3885_v7 = vld [vmem:[#allocation5 + $0x344] sm:$0xf]  ;;  %1565 = vmatpush.bf16.msrb.mxu0 %v3064_v45  ;;  %v3287_v45 = vld [vmem:[#allocation5 + $0x2a8] sm:$0xf] }
  0x6a   :  { %1428 = vmatmul.bf16.vlgmr.msrb.gmra.mxu3 %v4169_v51  ;;  %v3364_v11 = vor.u32 %v3885_v7, %v3361_v9  ;;  %v3303_v7 = vld [vmem:[#allocation5 + $0x2c8] sm:$0xf]  ;;  %v3872_v9 = vld [vmem:[#allocation5 + $0x2d4] sm:$0xf0]  ;;  %v3288_v53 = vor.u32 %v3868_v49, %v3287_v45 }
  0x6b   :  { %1399 = vmatmul.bf16.vlgmr.msrb.gmra.mxu2 %v4167_v46  ;;  %v3304_v15 = vor.u32 %v3872_v9, %v3303_v7  ;;  %1652 = vmatpush.bf16.msrb.mxu3 %v3448_v3  ;;  %v3415_v7 = vld [vmem:[#allocation5 + $0x3a8] sm:$0xf]  ;;  %v3900_v9 = vld [vmem:[#allocation5 + $0x3b4] sm:$0xf0] }
  0x6c   :  { %1623 = vmatpush.bf16.msrb.mxu2 %v3320_v58  ;;  %v2983_v58 = vld [vmem:[#allocation5 + $0x48] sm:$0xf] }
  0x6d   :  { %1479 = vmatpush.bf16.msrb.mxu1 %v3428_v17  ;;  %v2911_v17 = vld [vmem:[%s5354_s0 + $0x70] sm:$0xf]  ;;  %1566 = vmatpush.bf16.msrb.mxu0 %v3048_v61 }
  0x6e   :  { %v4340_v21 = vor.u32 %v3774_v18, %v2911_v17  ;;  %v3804_v17 = vld [vmem:[#allocation5 + $0xb4] sm:$0xf0] }
  0x6f   :  { %v3032_v18 = vor.u32 %v3804_v17, %v3031_v16  ;;  %v3271_v16 = vld [vmem:[#allocation5 + $0x288] sm:$0xf]  ;;  %v3864_v17 = vld [vmem:[#allocation5 + $0x294] sm:$0xf0] }
  0x70   :  { %1624 = vmatpush.bf16.msrb.mxu2 %v3304_v15  ;;  %v3832_v15 = vld [vmem:[#allocation5 + $0x194] sm:$0xf0]  ;;  %v3272_v19 = vor.u32 %v3864_v17, %v3271_v16 }
  0x71   :  { %1480 = vmatpush.bf16.msrb.mxu1 %v3412_v38  ;;  %v3329_v38 = vld [vmem:[#allocation5 + $0x310] sm:$0xf0]  ;;  %1567 = vmatpush.bf16.msrb.mxu0 %v3032_v18  ;;  %v3888_v17 = vld [vmem:[#allocation5 + $0x354] sm:$0xf0] }
  0x72   :  { %v3332_v39 = vor.u32 %v3877_v33, %v3329_v38  ;;  %v3431_v33 = vld [vmem:[#allocation5 + $0x3c8] sm:$0xf]  ;;  %v3904_v38 = vld [vmem:[#allocation5 + $0x3d4] sm:$0xf0] }
  0x73   :  { %v3432_v40 = vor.u32 %v3904_v38, %v3431_v33  ;;  %v3399_v33 = vld [vmem:[#allocation5 + $0x388] sm:$0xf] }
  0x74   :  { %1625 = vmatpush.bf16.msrb.mxu2 %v3288_v53  ;;  %v3860_v53 = vld [vmem:[#allocation5 + $0x274] sm:$0xf0] }
  0x75   :  { %1481 = vmatpush.bf16.msrb.mxu1 %v3396_v50  ;;  %v3192_v50 = vor.u32 %v3844_v48, %v3191_v47  ;;  %1568 = vmatpush.bf16.msrb.mxu0 %v3016_v28  ;;  %v3160_v48 = vor.u32 %v3836_v44, %v3159_v43  ;;  %v2951_v28 = vld [vmem:[#allocation5 + $0x8] sm:$0xf] }
  0x76   :  { %1653 = vmatpush.bf16.msrb.mxu3 %v3432_v40 }
  0x78   :  { %1346 = vmatmul.bf16.gmra.mxu0 %v4319_v54  ;;  %3613 = vmatmul.msk.bf16.vlgmr.msra.gmra.mxu1 %vm1204_vm0, %v4321_v56 }
  0x79   :  { %1482 = vmatpush.bf16.msrb.mxu1 %v3380_v63  ;;  %v3777_v63 = vld [vmem:[%s5354_s0 + $0xa4] sm:$0xf]  ;;  %1626 = vmatpush.bf16.msrb.mxu2 %v3272_v19 }
  0x7a   :  { %1433 = vmatmul.bf16.gmra.mxu3 %v4205_v30  ;;  %v4376_v23 = vor.u32 %v3777_v63, %v2937_v10  ;;  %v3143_v10 = vld [vmem:[#allocation5 + $0x188] sm:$0xf] }
  0x7b   :  { %1404 = vmatmul.bf16.gmra.mxu2 %v4203_v27  ;;  %v3144_v18 = vor.u32 %v3832_v15, %v3143_v10 }
  0x7d   :  { %1483 = vmatpush.bf16.msrb.mxu1 %v3364_v11  ;;  %v3176_v11 = vor.u32 %v3840_v4, %v3175_v2  ;;  %v2984_v2 = vor.u32 %v3792_v59, %v2983_v58  ;;  %v3383_v58 = vld [vmem:[#allocation5 + $0x368] sm:$0xf] }
  0x81   :  { %1484 = vmatpush.bf16.msrb.mxu1 %v3348_v29 }
  0x85   :  { %1485 = vmatpush.bf16.msrb.mxu1 %v3332_v39  ;;  %v2999_v39 = vld [vmem:[#allocation5 + $0x68] sm:$0xf] }
  0x86   :  { %v3000_v47 = vor.u32 %v3796_v41, %v2999_v39  ;;  %v3896_v41 = vld [vmem:[#allocation5 + $0x394] sm:$0xf0] }
  0x88   :  { %1351 = vmatmul.bf16.gmra.mxu0 %v4340_v21  ;;  %3614 = vmatmul.msk.bf16.gmra.mxu1 %vm1204_vm0, %v4342_v24 }
  0x89   :  { %1594 = vmatpush.bf16.msra.mxu1 %v3192_v50  ;;  %1569 = vmatpush.bf16.msrb.mxu0 %v3000_v47  ;;  %v3400_v47 = vor.u32 %v3896_v41, %v3399_v33 }
  0x8a   :  { %1438 = vmatmul.bf16.gmra.mxu3 %v4241_v12 }
  0x8b   :  { %1409 = vmatmul.bf16.gmra.mxu2 %v4239_v8 }
  0x8d   :  { %1595 = vmatpush.bf16.msra.mxu1 %v3176_v11  ;;  %v3416_v11 = vor.u32 %v3900_v9, %v3415_v7  ;;  %1570 = vmatpush.bf16.msrb.mxu0 %v2984_v2  ;;  %v3856_v7 = vld [vmem:[#allocation5 + $0x254] sm:$0xf0]  ;;  %v3367_v9 = vld [vmem:[#allocation5 + $0x348] sm:$0xf] }
  0x8f   :  { %1654 = vmatpush.bf16.msrb.mxu3 %v3416_v11 }
  0x91   :  { %1596 = vmatpush.bf16.msra.mxu1 %v3160_v48 }
  0x93   :  { %1655 = vmatpush.bf16.msrb.mxu3 %v3400_v47  ;;  %v3848_v47 = vld [vmem:[#allocation5 + $0x214] sm:$0xf0] }
  0x95   :  { %1597 = vmatpush.bf16.msra.mxu1 %v3144_v18 }
  0x98   :  { %1457 = vmatmul.bf16.vlgmr.msra.gmra.mxu0 %v4171_v52  ;;  %3615 = vmatmul.msk.bf16.gmra.mxu1 %vm1204_vm0, %v4355_v42 }
  0x9a   :  { %1443 = vmatmul.bf16.gmra.mxu3 %v4277_v35 }
  0x9b   :  { %1414 = vmatmul.bf16.gmra.mxu2 %v4275_v34 }
  0xa5   :  { %v1226_v22 = vpop.f32.mrf.mxu0  ;;  %v1255_v26 = vpop.f32.mrf.mxu1 }
  0xa6   :  { %v1227_v25 = vadd.f32 %v1226_v22, %v4368_v62  ;;  %v3788_v22 = vld [vmem:[#allocation5 + $0x34] sm:$0xf0] }
  0xa8   :  { %v1256_v29 = vadd.f32 %v1255_v26, %v1227_v25  ;;  %1462 = vmatmul.bf16.gmra.mxu0 %v4207_v31  ;;  %3616 = vmatmul.msk.bf16.gmra.mxu1 %vm1204_vm0, %v4376_v23  ;;  %v2968_v25 = vor.u32 %v3788_v22, %v2967_v20  ;;  %v3368_v20 = vor.u32 %v3888_v17, %v3367_v9 }
  0xaa   :  { %3617 = vmatmul.msk.bf16.vlgmr.msra.gmra.mxu3 %vm1204_vm0, %v4321_v56  ;;  %1571 = vmatpush.bf16.msrb.mxu0 %v2968_v25 }
  0xab   :  { %1515 = vmatmul.bf16.vlgmr.msra.gmra.mxu2 %v4299_v5 }
  0xad   :  { %v1313_v61 = vpop.f32.mrf.mxu3  ;;  %v1228_v63 = vpop.f32.mrf.mxu0 }
  0xae   :  { %v1284_v50 = vpop.f32.mrf.mxu2  ;;  %v1229_v0 = vadd.f32 %v1228_v63, %v4368_v62  ;;  %v1257_v1 = vpop.f32.mrf.mxu1  ;;  %v3828_v63 = vld [vmem:[#allocation5 + $0x174] sm:$0xf0] }
  0xaf   :  { %v1285_v60 = vadd.f32 %v1284_v50, %v1256_v29  ;;  %v3784_v29 = vld [vmem:[#allocation5 + $0x14] sm:$0xf0]  ;;  %v3255_v50 = vld [vmem:[#allocation5 + $0x268] sm:$0xf] }
  0xb0   :  { %v1258_v4 = vadd.f32 %v1257_v1, %v1229_v0  ;;  %v2952_v45 = vor.u32 %v3784_v29, %v2951_v28  ;;  %v3256_v59 = vor.u32 %v3860_v53, %v3255_v50  ;;  %v3824_v28 = vld [vmem:[#allocation5 + $0x154] sm:$0xf0]  ;;  %v3223_v29 = vld [vmem:[#allocation5 + $0x228] sm:$0xf] }
  0xb1   :  { %v4386_v3 = vadd.f32 %v1313_v61, %v1285_v60  ;;  %v3892_v60 = vld [vmem:[#allocation5 + $0x374] sm:$0xf0]  ;;  %v3127_v61 = vld [vmem:[#allocation5 + $0x168] sm:$0xf] }
  0xb2   :  { %1572 = vmatpush.bf16.msrb.mxu0 %v2952_v45  ;;  %v3384_v0 = vor.u32 %v3892_v60, %v3383_v58  ;;  %v3128_v1 = vor.u32 %v3828_v63, %v3127_v61  ;;  %1627 = vmatpush.bf16.msrb.mxu2 %v3256_v59  ;;  %v3207_v45 = vld [vmem:[#allocation5 + $0x208] sm:$0xf]  ;;  %v3880_v60 = vld [vmem:[#allocation5 + $0x314] sm:$0xf0] }
  0xb3   :  { %v3208_v59 = vor.u32 %v3848_v47, %v3207_v45  ;;  %v3575_v45 = vld [vmem:[#allocation5 + $0x4e8] sm:$0xf]  ;;  %v3940_v47 = vld [vmem:[#allocation5 + $0x4f4] sm:$0xf0] }
  0xb4   :  { %1656 = vmatpush.bf16.msrb.mxu3 %v3384_v0  ;;  %1598 = vmatpush.bf16.msra.mxu1 %v3128_v1 }
  0xb5   :  { %v1315_v39 = vpop.f32.mrf.mxu3  ;;  %v1231_v40 = vpop.f32.mrf.mxu0 }
  0xb6   :  { %v1286_v26 = vpop.f32.mrf.mxu2  ;;  %v1232_v43 = vadd.f32 %v1231_v40, %v4368_v62  ;;  %v1260_v44 = vpop.f32.mrf.mxu1  ;;  %v3884_v40 = vld [vmem:[#allocation5 + $0x334] sm:$0xf0] }
  0xb7   :  { %v1287_v38 = vadd.f32 %v1286_v26, %v1258_v4  ;;  %v3239_v4 = vld [vmem:[#allocation5 + $0x248] sm:$0xf] }
  0xb8   :  { %v1261_v49 = vadd.f32 %v1260_v44, %v1232_v43  ;;  %1467 = vmatmul.bf16.gmra.mxu0 %v4243_v13  ;;  %1486 = vmatmul.bf16.vlgmr.msrb.gmra.mxu1 %v4173_v55  ;;  %v3240_v16 = vor.u32 %v3856_v7, %v3239_v4  ;;  %v3111_v26 = vld [vmem:[#allocation5 + $0x148] sm:$0xf]  ;;  %v3820_v7 = vld [vmem:[#allocation5 + $0x134] sm:$0xf0] }
  0xb9   :  { %v4389_v48 = vadd.f32 %v1315_v39, %v1287_v38  ;;  %1657 = vmatpush.bf16.msrb.mxu3 %v3368_v20  ;;  %v3112_v33 = vor.u32 %v3824_v28, %v3111_v26  ;;  %v3852_v38 = vld [vmem:[#allocation5 + $0x234] sm:$0xf0]  ;;  %v3351_v39 = vld [vmem:[#allocation5 + $0x328] sm:$0xf] }
  0xba   :  { %3618 = vmatmul.msk.bf16.gmra.mxu3 %vm1204_vm0, %v4342_v24  ;;  %1628 = vmatpush.bf16.msrb.mxu2 %v3240_v16  ;;  %v3224_v41 = vor.u32 %v3852_v38, %v3223_v29  ;;  %v3352_v43 = vor.u32 %v3884_v40, %v3351_v39  ;;  %v3095_v4 = vld [vmem:[#allocation5 + $0x128] sm:$0xf] }
  0xbb   :  { %1520 = vmatmul.bf16.gmra.mxu2 %v4319_v54  ;;  %1599 = vmatpush.bf16.msra.mxu1 %v3112_v33  ;;  %v3096_v9 = vor.u32 %v3820_v7, %v3095_v4  ;;  %v3079_v20 = vld [vmem:[#allocation5 + $0x108] sm:$0xf] }
  0xbd   :  { %v1318_v11 = vpop.f32.mrf.mxu3  ;;  %v1233_v15 = vpop.f32.mrf.mxu0  ;;  %1658 = vmatpush.bf16.msrb.mxu3 %v3352_v43 }
  0xbe   :  { %v1289_v2 = vpop.f32.mrf.mxu2  ;;  %v1234_v18 = vadd.f32 %v1233_v15, %v4368_v62  ;;  %v1262_v19 = vpop.f32.mrf.mxu1  ;;  %1629 = vmatpush.bf16.msrb.mxu2 %v3224_v41 }
  0xbf   :  { %v1290_v10 = vadd.f32 %v1289_v2, %v1261_v49  ;;  %v3335_v49 = vld [vmem:[#allocation5 + $0x308] sm:$0xf]  ;;  %1600 = vmatpush.bf16.msra.mxu1 %v3096_v9 }
  0xc0   :  { %v1263_v25 = vadd.f32 %v1262_v19, %v1234_v18  ;;  %v3336_v1 = vor.u32 %v3880_v60, %v3335_v49  ;;  %v3576_v49 = vor.u32 %v3940_v47, %v3575_v45  ;;  %v3065_v60 = vld [vmem:[#allocation5 + $0xf8] sm:$0xf0] }
  0xc1   :  { %v4397_v22 = vadd.f32 %v1318_v11, %v1290_v10 }
  0xc2   :  { %1630 = vmatpush.bf16.msrb.mxu2 %v3208_v59  ;;  %1659 = vmatpush.bf16.msrb.mxu3 %v3336_v1  ;;  %v3559_v1 = vld [vmem:[#allocation5 + $0x4c8] sm:$0xf] }
  0xc3   :  { %1681 = vmatpush.bf16.msra.mxu0 %v3576_v49 }
  0xc5   :  { %v1320_v53 = vpop.f32.mrf.mxu3  ;;  %v1236_v58 = vpop.f32.mrf.mxu0 }
  0xc6   :  { %v1291_v44 = vpop.f32.mrf.mxu2  ;;  %v1237_v61 = vadd.f32 %v1236_v58, %v4368_v62  ;;  %v1265_v63 = vpop.f32.mrf.mxu1  ;;  %v3810_v58 = vld [vmem:[#allocation5 + $0xec] sm:$0xf] }
  0xc7   :  { %v1292_v50 = vadd.f32 %v1291_v44, %v1263_v25  ;;  %v3816_v25 = vld [vmem:[#allocation5 + $0x114] sm:$0xf0] }
  0xc8   :  { %v1266_v2 = vadd.f32 %v1265_v63, %v1237_v61  ;;  %1472 = vmatmul.bf16.gmra.mxu0 %v4279_v36  ;;  %1491 = vmatmul.bf16.gmra.mxu1 %v4209_v32  ;;  %v3080_v28 = vor.u32 %v3816_v25, %v3079_v20  ;;  %v3068_v63 = vor.u32 %v3810_v58, %v3065_v60  ;;  %v3806_v20 = vld [vmem:[#allocation5 + $0xcc] sm:$0xf] }
  0xc9   :  { %v4400_v0 = vadd.f32 %v1320_v53, %v1292_v50  ;;  %v3607_v50 = vld [vmem:[#allocation5 + $0x528] sm:$0xf]  ;;  %v3948_v53 = vld [vmem:[#allocation5 + $0x534] sm:$0xf0]  ;;  %v3838_v60 = vld [vmem:[#allocation5 + $0x1cc] sm:$0xf] }
  0xca   :  { %3619 = vmatmul.msk.bf16.gmra.mxu3 %vm1204_vm0, %v4355_v42  ;;  %1601 = vmatpush.bf16.msra.mxu1 %v3080_v28  ;;  %v3608_v59 = vor.u32 %v3948_v53, %v3607_v50  ;;  %v3049_v28 = vld [vmem:[#allocation5 + $0xd8] sm:$0xf0] }
  0xcb   :  { %1525 = vmatmul.bf16.gmra.mxu2 %v4340_v21 }
  0xcc   :  { %1739 = vmatpush.bf16.msra.mxu2 %v3068_v63 }
  0xcd   :  { %v1323_v15 = vpop.f32.mrf.mxu3  ;;  %v1238_v16 = vpop.f32.mrf.mxu0 }
  0xce   :  { %v1294_v10 = vpop.f32.mrf.mxu2  ;;  %v1239_v17 = vadd.f32 %v1238_v16, %v4368_v62  ;;  %v1267_v18 = vpop.f32.mrf.mxu1  ;;  %1716 = vmatpush.bf16.msrb.mxu1 %v3608_v59 }
  0xcf   :  { %v1295_v11 = vadd.f32 %v1294_v10, %v1266_v2  ;;  %v3936_v2 = vld [vmem:[#allocation5 + $0x4d4] sm:$0xf0] }
  0xd0   :  { %v1268_v26 = vadd.f32 %v1267_v18, %v1239_v17  ;;  %v3560_v10 = vor.u32 %v3936_v2, %v3559_v1  ;;  %v3842_v17 = vld [vmem:[#allocation5 + $0x1ec] sm:$0xf]  ;;  %v3193_v18 = vld [vmem:[#allocation5 + $0x1f8] sm:$0xf0]  ;;  %v3511_v1 = vld [vmem:[#allocation5 + $0x468] sm:$0xf] }
  0xd1   :  { %v4408_v19 = vadd.f32 %v1323_v15, %v1295_v11  ;;  %v3924_v2 = vld [vmem:[#allocation5 + $0x474] sm:$0xf0] }
  0xd2   :  { %1682 = vmatpush.bf16.msra.mxu0 %v3560_v10 }
  0xd5   :  { %v1325_v38 = vpop.f32.mrf.mxu3  ;;  %v1241_v39 = vpop.f32.mrf.mxu0 }
  0xd6   :  { %v1296_v29 = vpop.f32.mrf.mxu2  ;;  %v1242_v40 = vadd.f32 %v1241_v39, %v4368_v62  ;;  %v1270_v41 = vpop.f32.mrf.mxu1 }
  0xd7   :  { %v1297_v33 = vadd.f32 %v1296_v29, %v1268_v26  ;;  %v3196_v26 = vor.u32 %v3842_v17, %v3193_v18  ;;  %v3543_v29 = vld [vmem:[#allocation5 + $0x4a8] sm:$0xf] }
  0xd8   :  { %v1271_v44 = vadd.f32 %v1270_v41, %v1242_v40  ;;  %1573 = vmatmul.bf16.vlgmr.msrb.gmra.mxu0 %v4167_v46  ;;  %1496 = vmatmul.bf16.gmra.mxu1 %v4245_v14  ;;  %v3527_v41 = vld [vmem:[#allocation5 + $0x488] sm:$0xf] }
  0xd9   :  { %v4411_v43 = vadd.f32 %v1325_v38, %v1297_v33  ;;  %v3932_v33 = vld [vmem:[#allocation5 + $0x4b4] sm:$0xf0]  ;;  %v3052_v38 = vor.u32 %v3806_v20, %v3049_v28  ;;  %1768 = vmatpush.bf16.msra.mxu3 %v3196_v26 }
  0xda   :  { %3620 = vmatmul.msk.bf16.gmra.mxu3 %vm1204_vm0, %v4376_v23  ;;  %v3544_v39 = vor.u32 %v3932_v33, %v3543_v29  ;;  %v3834_v33 = vld [vmem:[#allocation5 + $0x1ac] sm:$0xf] }
  0xdb   :  { %1530 = vmatmul.bf16.gmra.mxu2 %v4301_v6 }
  0xdc   :  { %1740 = vmatpush.bf16.msra.mxu2 %v3052_v38  ;;  %1683 = vmatpush.bf16.msra.mxu0 %v3544_v39  ;;  %v3161_v38 = vld [vmem:[#allocation5 + $0x1b8] sm:$0xf0]  ;;  %v3798_v39 = vld [vmem:[#allocation5 + $0x8c] sm:$0xf] }
  0xdd   :  { %v1328_v7 = vpop.f32.mrf.mxu3  ;;  %v1243_v9 = vpop.f32.mrf.mxu0 }
  0xde   :  { %v1299_v61 = vpop.f32.mrf.mxu2  ;;  %v1244_v11 = vadd.f32 %v1243_v9, %v4368_v62  ;;  %v1272_v15 = vpop.f32.mrf.mxu1  ;;  %v3928_v62 = vld [vmem:[#allocation5 + $0x494] sm:$0xf0]  ;;  %v3033_v9 = vld [vmem:[#allocation5 + $0xb8] sm:$0xf0] }
  0xdf   :  { %v1300_v4 = vadd.f32 %v1299_v61, %v1271_v44  ;;  %v3528_v49 = vor.u32 %v3928_v62, %v3527_v41  ;;  %v3177_v61 = vld [vmem:[#allocation5 + $0x1d8] sm:$0xf0]  ;;  %v3479_v62 = vld [vmem:[#allocation5 + $0x428] sm:$0xf] }
  0xe0   :  { %v1273_v25 = vadd.f32 %v1272_v15, %v1244_v11  ;;  %v3180_v63 = vor.u32 %v3838_v60, %v3177_v61  ;;  %v3495_v15 = vld [vmem:[#allocation5 + $0x448] sm:$0xf]  ;;  %v3017_v41 = vld [vmem:[#allocation5 + $0x98] sm:$0xf0]  ;;  %v3830_v60 = vld [vmem:[#allocation5 + $0x18c] sm:$0xf] }
  0xe1   :  { %v1329_v16 = vadd.f32 %v1328_v7, %v1300_v4  ;;  %1684 = vmatpush.bf16.msra.mxu0 %v3528_v49  ;;  %v4426_v4 = vperm.slane %v4365_v57, 1  ;;  %v3802_v7 = vld [vmem:[#allocation5 + $0xac] sm:$0xf] }
  0xe2   :  { %1769 = vmatpush.bf16.msra.mxu3 %v3180_v63  ;;  %v3036_v10 = vor.u32 %v3802_v7, %v3033_v9 }
  0xe4   :  { %1741 = vmatpush.bf16.msra.mxu2 %v3036_v10 }
  0xe5   :  { %v1330_v45 = vpop.f32.mrf.mxu3  ;;  %v1342_v47 = vpop.f32.mrf.mxu0 }
  0xe6   :  { %v1301_v40 = vpop.f32.mrf.mxu2  ;;  %v1343_v50 = vadd.f32 %v1342_v47, %v4386_v3  ;;  %v1357_v53 = vpop.f32.mrf.mxu1  ;;  %v3512_v3 = vor.u32 %v3924_v2, %v3511_v1  ;;  %v3145_v2 = vld [vmem:[#allocation5 + $0x198] sm:$0xf0] }
  0xe7   :  { %v1302_v44 = vadd.f32 %v1301_v40, %v1273_v25  ;;  %v4420_v59 = vadd.f32 %v1357_v53, %v1329_v16  ;;  %v3920_v16 = vld [vmem:[#allocation5 + $0x454] sm:$0xf0]  ;;  %v3164_v40 = vor.u32 %v3834_v33, %v3161_v38  ;;  %v3148_v9 = vor.u32 %v3830_v60, %v3145_v2  ;;  %v3790_v38 = vld [vmem:[#allocation5 + $0x4c] sm:$0xf] }
  0xe8   :  { %1578 = vmatmul.bf16.gmra.mxu0 %v4203_v27  ;;  %1501 = vmatmul.bf16.gmra.mxu1 %v4281_v37  ;;  %v3496_v25 = vor.u32 %v3920_v16, %v3495_v15  ;;  %v3912_v53 = vld [vmem:[#allocation5 + $0x414] sm:$0xf0]  ;;  %v3794_v15 = vld [vmem:[#allocation5 + $0x6c] sm:$0xf]  ;;  %v3001_v16 = vld [vmem:[#allocation5 + $0x78] sm:$0xf0] }
  0xe9   :  { %v1331_v58 = vadd.f32 %v1330_v45, %v1302_v44  ;;  %1685 = vmatpush.bf16.msra.mxu0 %v3512_v3  ;;  %v3916_v44 = vld [vmem:[#allocation5 + $0x434] sm:$0xf0]  ;;  %v3020_v45 = vor.u32 %v3798_v39, %v3017_v41  ;;  %1770 = vmatpush.bf16.msra.mxu3 %v3164_v40  ;;  %v2985_v39 = vld [vmem:[#allocation5 + $0x58] sm:$0xf0]  ;;  %v3822_v40 = vld [vmem:[#allocation5 + $0x14c] sm:$0xf] }
  0xea   :  { %1660 = vmatmul.bf16.vlgmr.msrb.gmra.mxu3 %v4173_v55  ;;  %v3480_v47 = vor.u32 %v3916_v44, %v3479_v62 }
  0xeb   :  { %1631 = vmatmul.bf16.vlgmr.msrb.gmra.mxu2 %v4171_v52 }
  0xec   :  { %1742 = vmatpush.bf16.msra.mxu2 %v3020_v45  ;;  %v2988_v45 = vor.u32 %v3790_v38, %v2985_v39 }
  0xed   :  { %v1429_v18 = vpop.f32.mrf.mxu3  ;;  %v1344_v20 = vpop.f32.mrf.mxu0  ;;  %1686 = vmatpush.bf16.msra.mxu0 %v3496_v25  ;;  %1771 = vmatpush.bf16.msra.mxu3 %v3148_v9  ;;  %v3944_v25 = vld [vmem:[#allocation5 + $0x514] sm:$0xf0] }
  0xee   :  { %v1400_v11 = vpop.f32.mrf.mxu2  ;;  %v1345_v57 = vadd.f32 %v1344_v20, %v4389_v48  ;;  %v1359_v26 = vpop.f32.mrf.mxu1  ;;  %v3463_v48 = vld [vmem:[#allocation5 + $0x408] sm:$0xf]  ;;  %v3129_v20 = vld [vmem:[#allocation5 + $0x178] sm:$0xf0] }
  0xef   :  { %v1401_v17 = vadd.f32 %v1400_v11, %v4426_v4  ;;  %v4433_v29 = vadd.f32 %v1359_v26, %v1331_v58  ;;  %v3464_v1 = vor.u32 %v3912_v53, %v3463_v48 }
  0xf1   :  { %v4431_v28 = vadd.f32 %v1429_v18, %v1401_v17  ;;  %1687 = vmatpush.bf16.msra.mxu0 %v3480_v47  ;;  %v3826_v17 = vld [vmem:[#allocation5 + $0x16c] sm:$0xf]  ;;  %v3004_v18 = vor.u32 %v3794_v15, %v3001_v16  ;;  %v3113_v47 = vld [vmem:[#allocation5 + $0x158] sm:$0xf0] }
  0xf2   :  { %v3132_v26 = vor.u32 %v3826_v17, %v3129_v20  ;;  %v3116_v53 = vor.u32 %v3822_v40, %v3113_v47  ;;  %v3782_v16 = vld [vmem:[#allocation5 + $0xc] sm:$0xf]  ;;  %v2953_v17 = vld [vmem:[#allocation5 + $0x18] sm:$0xf0] }
  0xf3   :  { %1743 = vmatpush.bf16.msra.mxu2 %v3004_v18 }
  0xf4   :  { %1772 = vmatpush.bf16.msra.mxu3 %v3132_v26 }
  0xf5   :  { %v1431_v61 = vpop.f32.mrf.mxu3  ;;  %v1347_v63 = vpop.f32.mrf.mxu0  ;;  %1688 = vmatpush.bf16.msra.mxu0 %v3464_v1  ;;  %v3818_v1 = vld [vmem:[#allocation5 + $0x12c] sm:$0xf] }
  0xf6   :  { %v1402_v49 = vpop.f32.mrf.mxu2  ;;  %v1348_v3 = vadd.f32 %v1347_v63, %v4397_v22  ;;  %v1371_v7 = vpop.f32.mrf.mxu1  ;;  %v3591_v22 = vld [vmem:[#allocation5 + $0x508] sm:$0xf]  ;;  %v2969_v63 = vld [vmem:[#allocation5 + $0x38] sm:$0xf0] }
  0xf7   :  { %v1403_v58 = vadd.f32 %v1402_v49, %v4426_v4  ;;  %v4439_v11 = vadd.f32 %v1371_v7, %v1343_v50  ;;  %v3592_v50 = vor.u32 %v3944_v25, %v3591_v22  ;;  %1744 = vmatpush.bf16.msra.mxu2 %v2988_v45  ;;  %v3097_v7 = vld [vmem:[#allocation5 + $0x138] sm:$0xf0] }
  0xf8   :  { %1583 = vmatmul.bf16.gmra.mxu0 %v4239_v8  ;;  %1602 = vmatmul.bf16.vlgmr.msra.gmra.mxu1 %v4169_v51  ;;  %v3100_v9 = vor.u32 %v3818_v1, %v3097_v7  ;;  %v3081_v25 = vld [vmem:[#allocation5 + $0x118] sm:$0xf0] }
  0xf9   :  { %v4437_v10 = vadd.f32 %v1431_v61, %v1403_v58  ;;  %1717 = vmatpush.bf16.msrb.mxu1 %v3592_v50  ;;  %v3786_v61 = vld [vmem:[#allocation5 + $0x2c] sm:$0xf]  ;;  %1773 = vmatpush.bf16.msra.mxu3 %v3116_v53 }
  0xfa   :  { %1665 = vmatmul.bf16.gmra.mxu3 %v4209_v32  ;;  %v2972_v2 = vor.u32 %v3786_v61, %v2969_v63 }
  0xfb   :  { %1636 = vmatmul.bf16.gmra.mxu2 %v4207_v31 }
  0xfc   :  { %1745 = vmatpush.bf16.msra.mxu2 %v2972_v2 }
  0xfd   :  { %v1434_v62 = vpop.f32.mrf.mxu3  ;;  %v1349_v44 = vpop.f32.mrf.mxu0  ;;  %1774 = vmatpush.bf16.msra.mxu3 %v3100_v9 }
  0xfe   :  { %v1405_v33 = vpop.f32.mrf.mxu2  ;;  %v1350_v49 = vadd.f32 %v1349_v44, %v4400_v0  ;;  %v1373_v48 = vpop.f32.mrf.mxu1  ;;  %v3814_v0 = vld [vmem:[#allocation5 + $0x10c] sm:$0xf] }
  0xff   :  { %v1406_v41 = vadd.f32 %v1405_v33, %v4426_v4  ;;  %v4449_v58 = vadd.f32 %v1373_v48, %v1345_v57  ;;  %v2956_v57 = vor.u32 %v3782_v16, %v2953_v17  ;;  %v3084_v33 = vor.u32 %v3814_v0, %v3081_v25  ;;  %v3906_v16 = vld [vmem:[#allocation5 + $0x3ec] sm:$0xf]  ;;  %v3449_v17 = vld [vmem:[#allocation5 + $0x3f8] sm:$0xf0] }
 0x101   :  { %v4447_v60 = vadd.f32 %v1434_v62, %v1406_v41  ;;  %1746 = vmatpush.bf16.msra.mxu2 %v2956_v57  ;;  %1775 = vmatpush.bf16.msra.mxu3 %v3084_v33  ;;  %v3305_v57 = vld [vmem:[#allocation5 + $0x2d8] sm:$0xf0] }
 0x105   :  { %v1436_v20 = vpop.f32.mrf.mxu3  ;;  %v1352_v22 = vpop.f32.mrf.mxu0 }
 0x106   :  { %v1407_v15 = vpop.f32.mrf.mxu2  ;;  %v1353_v26 = vadd.f32 %v1352_v22, %v4408_v19  ;;  %v1376_v50 = vpop.f32.mrf.mxu1  ;;  %v3870_v22 = vld [vmem:[#allocation5 + $0x2cc] sm:$0xf] }
 0x107   :  { %v1408_v18 = vadd.f32 %v1407_v15, %v4426_v4  ;;  %v4455_v39 = vadd.f32 %v1376_v50, %v1348_v3  ;;  %v3321_v15 = vld [vmem:[#allocation5 + $0x2f8] sm:$0xf0] }
 0x108   :  { %1588 = vmatmul.bf16.gmra.mxu0 %v4275_v34  ;;  %1607 = vmatmul.bf16.gmra.mxu1 %v4205_v30 }
 0x109   :  { %v4453_v38 = vadd.f32 %v1436_v20, %v1408_v18  ;;  %v3452_v18 = vor.u32 %v3906_v16, %v3449_v17  ;;  %v3577_v20 = vld [vmem:[#allocation5 + $0x4f8] sm:$0xf0]  ;;  %v3934_v17 = vld [vmem:[#allocation5 + $0x4cc] sm:$0xf] }
 0x10a   :  { %1670 = vmatmul.bf16.gmra.mxu3 %v4245_v14  ;;  %v3433_v16 = vld [vmem:[#allocation5 + $0x3d8] sm:$0xf0] }
 0x10b   :  { %1641 = vmatmul.bf16.gmra.mxu2 %v4243_v13  ;;  %1826 = vmatpush.bf16.msra.mxu1 %v3452_v18 }
 0x10d   :  { %v1439_v19 = vpop.f32.mrf.mxu3  ;;  %v1354_v62 = vpop.f32.mrf.mxu0 }
 0x10e   :  { %v1410_v40 = vpop.f32.mrf.mxu2  ;;  %v1355_v44 = vadd.f32 %v1354_v62, %v4411_v43  ;;  %v1378_v45 = vpop.f32.mrf.mxu1  ;;  %v3874_v43 = vld [vmem:[#allocation5 + $0x2ec] sm:$0xf] }
 0x10f   :  { %v1411_v41 = vadd.f32 %v1410_v40, %v4426_v4  ;;  %v4465_v47 = vadd.f32 %v1378_v45, %v1350_v49  ;;  %v3324_v49 = vor.u32 %v3874_v43, %v3321_v15  ;;  %v3308_v40 = vor.u32 %v3870_v22, %v3305_v57  ;;  %v3902_v43 = vld [vmem:[#allocation5 + $0x3cc] sm:$0xf]  ;;  %v3273_v57 = vld [vmem:[#allocation5 + $0x298] sm:$0xf0] }
 0x110   :  { %v3862_v22 = vld [vmem:[#allocation5 + $0x28c] sm:$0xf] }
 0x111   :  { %v4463_v3 = vadd.f32 %v1439_v19, %v1411_v41  ;;  %1797 = vmatpush.bf16.msrb.mxu0 %v3324_v49 }
 0x115   :  { %v1441_v61 = vpop.f32.mrf.mxu3  ;;  %v1458_v63 = vpop.f32.mrf.mxu0  ;;  %1798 = vmatpush.bf16.msrb.mxu0 %v3308_v40 }
 0x116   :  { %v1412_v48 = vpop.f32.mrf.mxu2  ;;  %v1381_v1 = vpop.f32.mrf.mxu1  ;;  %v4469_v2 = vadd.f32 %v1458_v63, %v4431_v28  ;;  %v3938_v28 = vld [vmem:[#allocation5 + $0x4ec] sm:$0xf] }
 0x117   :  { %v1413_v53 = vadd.f32 %v1412_v48, %v4426_v4  ;;  %v4473_v9 = vadd.f32 %v1381_v1, %v1353_v26  ;;  %v3580_v33 = vor.u32 %v3938_v28, %v3577_v20  ;;  %v3866_v48 = vld [vmem:[#allocation5 + $0x2ac] sm:$0xf]  ;;  %v3609_v1 = vld [vmem:[#allocation5 + $0x538] sm:$0xf0] }
 0x118   :  { %1689 = vmatmul.bf16.vlgmr.msra.gmra.mxu0 %v4299_v5  ;;  %1612 = vmatmul.bf16.gmra.mxu1 %v4241_v12  ;;  %v3946_v63 = vld [vmem:[#allocation5 + $0x52c] sm:$0xf] }
 0x119   :  { %v4471_v7 = vadd.f32 %v1441_v61, %v1413_v53  ;;  %1855 = vmatpush.bf16.msrb.mxu2 %v3580_v33  ;;  %v3289_v53 = vld [vmem:[#allocation5 + $0x2b8] sm:$0xf0]  ;;  %v3612_v49 = vor.u32 %v3946_v63, %v3609_v1 }
 0x11a   :  { %1675 = vmatmul.bf16.gmra.mxu3 %v4281_v37  ;;  %v3292_v61 = vor.u32 %v3866_v48, %v3289_v53  ;;  %v3898_v48 = vld [vmem:[#allocation5 + $0x3ac] sm:$0xf]  ;;  %v3417_v53 = vld [vmem:[#allocation5 + $0x3b8] sm:$0xf0] }
 0x11b   :  { %1646 = vmatmul.bf16.gmra.mxu2 %v4279_v36  ;;  %1890 = vmatpush.bf16.msrb.mxu3 %v3612_v49  ;;  %v3545_v1 = vld [vmem:[#allocation5 + $0x4b8] sm:$0xf0] }
 0x11c   :  { %1799 = vmatpush.bf16.msrb.mxu0 %v3292_v61  ;;  %v3930_v61 = vld [vmem:[#allocation5 + $0x4ac] sm:$0xf] }
 0x11d   :  { %v1444_v26 = vpop.f32.mrf.mxu3  ;;  %v1460_v50 = vpop.f32.mrf.mxu0 }
 0x11e   :  { %v1415_v0 = vpop.f32.mrf.mxu2  ;;  %v1383_v41 = vpop.f32.mrf.mxu1  ;;  %v4481_v19 = vadd.f32 %v1460_v50, %v4437_v10  ;;  %v3561_v10 = vld [vmem:[#allocation5 + $0x4d8] sm:$0xf0]  ;;  %v3276_v50 = vor.u32 %v3862_v22, %v3273_v57  ;;  %v3926_v57 = vld [vmem:[#allocation5 + $0x48c] sm:$0xf] }
 0x11f   :  { %v1416_v25 = vadd.f32 %v1415_v0, %v4426_v4  ;;  %v4485_v45 = vadd.f32 %v1383_v41, %v1355_v44  ;;  %v3436_v44 = vor.u32 %v3902_v43, %v3433_v16  ;;  %v3564_v20 = vor.u32 %v3934_v17, %v3561_v10  ;;  %v3257_v41 = vld [vmem:[#allocation5 + $0x278] sm:$0xf0]  ;;  %v3854_v43 = vld [vmem:[#allocation5 + $0x24c] sm:$0xf] }
 0x120   :  { %1800 = vmatpush.bf16.msrb.mxu0 %v3276_v50  ;;  %v3548_v17 = vor.u32 %v3930_v61, %v3545_v1  ;;  %v3401_v22 = vld [vmem:[#allocation5 + $0x398] sm:$0xf0] }
 0x121   :  { %v4483_v62 = vadd.f32 %v1444_v26, %v1416_v25  ;;  %1827 = vmatpush.bf16.msra.mxu1 %v3436_v44  ;;  %1856 = vmatpush.bf16.msrb.mxu2 %v3564_v20  ;;  %v3894_v20 = vld [vmem:[#allocation5 + $0x38c] sm:$0xf] }
 0x122   :  { %v3404_v50 = vor.u32 %v3894_v20, %v3401_v22 }
 0x125   :  { %v1446_v0 = vpop.f32.mrf.mxu3  ;;  %v1463_v18 = vpop.f32.mrf.mxu0  ;;  %1857 = vmatpush.bf16.msrb.mxu2 %v3548_v17 }
 0x126   :  { %v1417_v15 = vpop.f32.mrf.mxu2  ;;  %v1386_v25 = vpop.f32.mrf.mxu1  ;;  %v4489_v26 = vadd.f32 %v1463_v18, %v4447_v60  ;;  %v3225_v18 = vld [vmem:[#allocation5 + $0x238] sm:$0xf0] }
 0x127   :  { %v1418_v28 = vadd.f32 %v1417_v15, %v4426_v4  ;;  %v4494_v40 = vadd.f32 %v1386_v25, %v4420_v59  ;;  %v3858_v4 = vld [vmem:[#allocation5 + $0x26c] sm:$0xf]  ;;  %v3420_v59 = vor.u32 %v3898_v48, %v3417_v53  ;;  %v3241_v15 = vld [vmem:[#allocation5 + $0x258] sm:$0xf0] }
 0x128   :  { %1694 = vmatmul.bf16.gmra.mxu0 %v4319_v54  ;;  %1617 = vmatmul.bf16.gmra.mxu1 %v4277_v35  ;;  %v3260_v60 = vor.u32 %v3858_v4, %v3257_v41  ;;  %v3529_v4 = vld [vmem:[#allocation5 + $0x498] sm:$0xf0]  ;;  %v3846_v41 = vld [vmem:[#allocation5 + $0x20c] sm:$0xf] }
 0x129   :  { %v4491_v33 = vadd.f32 %v1446_v0, %v1418_v28  ;;  %1828 = vmatpush.bf16.msra.mxu1 %v3420_v59  ;;  %v3850_v0 = vld [vmem:[#allocation5 + $0x22c] sm:$0xf] }
 0x12a   :  { %1776 = vmatmul.bf16.vlgmr.msra.gmra.mxu3 %v4169_v51  ;;  %1801 = vmatpush.bf16.msrb.mxu0 %v3260_v60  ;;  %v3228_v44 = vor.u32 %v3850_v0, %v3225_v18  ;;  %v3532_v60 = vor.u32 %v3926_v57, %v3529_v4  ;;  %v3918_v18 = vld [vmem:[#allocation5 + $0x44c] sm:$0xf]  ;;  %v3481_v4 = vld [vmem:[#allocation5 + $0x438] sm:$0xf0] }
 0x12b   :  { %1747 = vmatmul.bf16.vlgmr.msra.gmra.mxu2 %v4167_v46  ;;  %v3244_v46 = vor.u32 %v3854_v43, %v3241_v15  ;;  %v3922_v43 = vld [vmem:[#allocation5 + $0x46c] sm:$0xf]  ;;  %v3513_v15 = vld [vmem:[#allocation5 + $0x478] sm:$0xf0] }
 0x12c   :  { %1858 = vmatpush.bf16.msrb.mxu2 %v3532_v60  ;;  %v3516_v17 = vor.u32 %v3922_v43, %v3513_v15  ;;  %v3942_v60 = vld [vmem:[#allocation5 + $0x50c] sm:$0xf]  ;;  %v3369_v43 = vld [vmem:[#allocation5 + $0x358] sm:$0xf0] }
 0x12d   :  { %v1545_v49 = vpop.f32.mrf.mxu3  ;;  %v1465_v16 = vpop.f32.mrf.mxu0  ;;  %1829 = vmatpush.bf16.msra.mxu1 %v3404_v50  ;;  %v3910_v15 = vld [vmem:[#allocation5 + $0x40c] sm:$0xf] }
 0x12e   :  { %v1516_v63 = vpop.f32.mrf.mxu2  ;;  %v1388_v10 = vpop.f32.mrf.mxu1  ;;  %v4501_v28 = vadd.f32 %v1465_v16, %v4453_v38  ;;  %1802 = vmatpush.bf16.msrb.mxu0 %v3244_v46  ;;  %v3209_v38 = vld [vmem:[#allocation5 + $0x218] sm:$0xf0] }
 0x12f   :  { %v4504_v51 = vadd.f32 %v1388_v10, %v4433_v29  ;;  %v3212_v59 = vor.u32 %v3846_v41, %v3209_v38  ;;  %v3890_v10 = vld [vmem:[#allocation5 + $0x36c] sm:$0xf]  ;;  %v3385_v46 = vld [vmem:[#allocation5 + $0x378] sm:$0xf0] }
 0x130   :  { %1859 = vmatpush.bf16.msrb.mxu2 %v3516_v17  ;;  %v3388_v0 = vor.u32 %v3890_v10, %v3385_v46 }
 0x132   :  { %1803 = vmatpush.bf16.msrb.mxu0 %v3228_v44  ;;  %v3497_v44 = vld [vmem:[#allocation5 + $0x458] sm:$0xf0]  ;;  %1830 = vmatpush.bf16.msra.mxu1 %v3388_v0 }
 0x135   :  { %v1547_v48 = vpop.f32.mrf.mxu3  ;;  %v1468_v53 = vpop.f32.mrf.mxu0 }
 0x136   :  { %v1518_v25 = vpop.f32.mrf.mxu2  ;;  %v4507_v61 = vadd.f32 %v1468_v53, %v4463_v3  ;;  %v1487_v29 = vpop.f32.mrf.mxu1  ;;  %1804 = vmatpush.bf16.msrb.mxu0 %v3212_v59  ;;  %v3886_v59 = vld [vmem:[#allocation5 + $0x34c] sm:$0xf] }
 0x137   :  { %v1488_v1 = vadd.f32 %v1487_v29, %v4469_v2  ;;  %v3593_v29 = vld [vmem:[#allocation5 + $0x518] sm:$0xf0] }
 0x138   :  { %1699 = vmatmul.bf16.gmra.mxu0 %v4340_v21  ;;  %3621 = vmatmul.msk.bf16.vlgmr.msrb.gmra.mxu1 %vm1204_vm0, %v4321_v56 }
 0x139   :  { %v1517_v16 = vadd.f32 %v1516_v63, %v1488_v1  ;;  %v3500_v63 = vor.u32 %v3918_v18, %v3497_v44  ;;  %v3882_v18 = vld [vmem:[#allocation5 + $0x32c] sm:$0xf] }
 0x13a   :  { %1781 = vmatmul.bf16.gmra.mxu3 %v4205_v30 }
 0x13b   :  { %1752 = vmatmul.bf16.gmra.mxu2 %v4203_v27  ;;  %v1546_v3 = vadd.f32 %v1545_v49, %v1517_v16  ;;  %v3914_v49 = vld [vmem:[#allocation5 + $0x42c] sm:$0xf] }
 0x13c   :  { %1860 = vmatpush.bf16.msrb.mxu2 %v3500_v63  ;;  %v3484_v38 = vor.u32 %v3914_v49, %v3481_v4 }
 0x13d   :  { %v1550_v20 = vpop.f32.mrf.mxu3  ;;  %v1470_v22 = vpop.f32.mrf.mxu0  ;;  %v4516_v57 = vpack.c.bf16 %v1546_v3, %v4439_v11  ;;  %v3596_v11 = vor.u32 %v3942_v60, %v3593_v29  ;;  %v3372_v3 = vor.u32 %v3886_v59, %v3369_v43  ;;  %v3979_v59 = vld [vmem:[%s5356_s2 + $0xec] sm:$0xf0] }
 0x13e   :  { %v1521_v2 = vpop.f32.mrf.mxu2  ;;  %v4519_v27 = vadd.f32 %v1470_v22, %v4471_v7  ;;  %v1489_v50 = vpop.f32.mrf.mxu1  ;;  %v3465_v7 = vld [vmem:[#allocation5 + $0x418] sm:$0xf0] }
 0x13f   :  { %v1490_v30 = vadd.f32 %v1489_v50, %v4481_v19  ;;  %v3468_v10 = vor.u32 %v3910_v15, %v3465_v7  ;;  %1891 = vmatpush.bf16.msrb.mxu3 %v3596_v11  ;;  %1831 = vmatpush.bf16.msra.mxu1 %v3372_v3  ;;  %v3751_v11 = vld [vmem:[%s5356_s2 + $0xe8] sm:$0xf]  ;;  %v4578_v15 = vld [vmem:[%s5357_s3] sm:$0xf] }
 0x140   :  { %1861 = vmatpush.bf16.msrb.mxu2 %v3484_v38  ;;  %v4581_v7 = vperm.slane %v4578_v15, 2  ;;  %v3727_v3 = vld [vmem:[%s5356_s2 + $0xc0] sm:$0xf] }
 0x141   :  { %v1519_v41 = vadd.f32 %v1518_v25, %v1490_v30 }
 0x143   :  { %v1548_v53 = vadd.f32 %v1547_v48, %v1519_v41 }
 0x144   :  { %1862 = vmatpush.bf16.msrb.mxu2 %v3468_v10  ;;  %v3975_v10 = vld [vmem:[%s5356_s2 + $0xcc] sm:$0xf0] }
 0x145   :  { %v1552_v16 = vpop.f32.mrf.mxu3  ;;  %v1473_v17 = vpop.f32.mrf.mxu0  ;;  %v4523_v19 = vpack.c.bf16 %v1548_v53, %v4449_v58 }
 0x146   :  { %v1523_v1 = vpop.f32.mrf.mxu2  ;;  %v4526_v25 = vadd.f32 %v1473_v17, %v4483_v62  ;;  %v1492_v48 = vpop.f32.mrf.mxu1  ;;  %v3353_v62 = vld [vmem:[#allocation5 + $0x338] sm:$0xf0] }
 0x147   :  { %5424 = vst [vmem:[#allocation8_spill] sm:$0xff] %v4523_v19  ;;  %v1493_v46 = vadd.f32 %v1492_v48, %v4489_v26  ;;  %v3356_v22 = vor.u32 %v3882_v18, %v3353_v62 }
 0x148   :  { %1704 = vmatmul.bf16.gmra.mxu0 %v4301_v6  ;;  %3622 = vmatmul.msk.bf16.gmra.mxu1 %vm1204_vm0, %v4342_v24 }
 0x149   :  { %v1522_v0 = vadd.f32 %v1521_v2, %v1493_v46  ;;  %1832 = vmatpush.bf16.msra.mxu1 %v3356_v22  ;;  %v3711_v22 = vld [vmem:[%s5356_s2 + $0xa0] sm:$0xf] }
 0x14a   :  { %1786 = vmatmul.bf16.gmra.mxu3 %v4241_v12  ;;  %v3878_v12 = vld [vmem:[#allocation5 + $0x30c] sm:$0xf] }
 0x14b   :  { %1757 = vmatmul.bf16.gmra.mxu2 %v4239_v8  ;;  %v1551_v58 = vadd.f32 %v1550_v20, %v1522_v0  ;;  %v3337_v20 = vld [vmem:[#allocation5 + $0x318] sm:$0xf0]  ;;  %v4592_v0 = vor.u32 %v3975_v10, %v3727_v3  ;;  %v3679_v3 = vld [vmem:[%s5356_s2 + $0x60] sm:$0xf]  ;;  %v3963_v10 = vld [vmem:[%s5356_s2 + $0x6c] sm:$0xf0] }
 0x14c   :  { %v3340_v38 = vor.u32 %v3878_v12, %v3337_v20  ;;  %v3735_v12 = vld [vmem:[%s5356_s2 + $0xc8] sm:$0xf]  ;;  %v3976_v20 = vld [vmem:[%s5356_s2 + $0xd4] sm:$0xf0] }
 0x14d   :  { %v1555_v63 = vpop.f32.mrf.mxu3  ;;  %v1475_v50 = vpop.f32.mrf.mxu0  ;;  %v4535_v26 = vpack.c.bf16 %v1551_v58, %v4455_v39 }
 0x14e   :  { %v1526_v44 = vpop.f32.mrf.mxu2  ;;  %v4538_v30 = vadd.f32 %v1475_v50, %v4491_v33  ;;  %v1494_v2 = vpop.f32.mrf.mxu1  ;;  %1833 = vmatpush.bf16.msra.mxu1 %v3340_v38  ;;  %v3978_v50 = vld [vmem:[%s5356_s2 + $0xec] sm:$0xf] }
 0x14f   :  { %5425 = vst [vmem:[#allocation9_spill] sm:$0xff] %v4535_v26  ;;  %v1495_v49 = vadd.f32 %v1494_v2, %v4501_v28  ;;  %v3743_v28 = vld [vmem:[%s5356_s2 + $0xe0] sm:$0xf]  ;;  %v3753_v2 = vld [vmem:[%s5356_s2 + $0xf8] sm:$0xf0] }
 0x151   :  { %v1524_v8 = vadd.f32 %v1523_v1, %v1495_v49 }
 0x153   :  { %v1553_v4 = vadd.f32 %v1552_v16, %v1524_v8  ;;  %v4620_v8 = vor.u32 %v3978_v50, %v3753_v2  ;;  %v3663_v2 = vld [vmem:[%s5356_s2 + $0x40] sm:$0xf] }
 0x155   :  { %v1557_v53 = vpop.f32.mrf.mxu3  ;;  %v4541_v60 = vpop.f32.mrf.mxu0  ;;  %v4544_v29 = vpack.c.bf16 %v1553_v4, %v4465_v47  ;;  %v4557_v47 = vor.u32 %v3979_v59, %v3743_v28  ;;  %v3729_v4 = vld [vmem:[%s5356_s2 + $0xd0] sm:$0xf0]  ;;  %2185 = vmatpush.bf16.msra.mxu3 %v4620_v8  ;;  %v3695_v28 = vld [vmem:[%s5356_s2 + $0x80] sm:$0xf]  ;;  %v3967_v59 = vld [vmem:[%s5356_s2 + $0x8c] sm:$0xf0] }
 0x156   :  { %v1528_v41 = vpop.f32.mrf.mxu2  ;;  %v1497_v39 = vpop.f32.mrf.mxu1 }
 0x157   :  { %5426 = vst [vmem:[#allocation10_spill] sm:$0xff] %v4544_v29  ;;  %v1498_v33 = vadd.f32 %v1497_v39, %v4507_v61  ;;  %v3745_v61 = vld [vmem:[%s5356_s2 + $0xf0] sm:$0xf0]  ;;  %2146 = vmatpush.bf16.msra.mxu0 %v4557_v47  ;;  %v4633_v39 = vor.u32 %v3976_v20, %v3735_v12  ;;  %v4969_v29 = vperm.slane %v4578_v15, 3 }
 0x158   :  { %1805 = vmatmul.bf16.vlgmr.msrb.gmra.mxu0 %v4171_v52  ;;  %3623 = vmatmul.msk.bf16.gmra.mxu1 %vm1204_vm0, %v4355_v42  ;;  %v3977_v52 = vld [vmem:[%s5356_s2 + $0xe4] sm:$0xf] }
 0x159   :  { %v1527_v1 = vadd.f32 %v1526_v44, %v1498_v33  ;;  %5430 = vst [vmem:[#allocation14_spill] sm:$0xff] %v4633_v39 }
 0x15a   :  { %1791 = vmatmul.bf16.gmra.mxu3 %v4277_v35  ;;  %v3980_v35 = vld [vmem:[%s5356_s2 + $0xf4] sm:$0xf0] }
 0x15b   :  { %1762 = vmatmul.bf16.gmra.mxu2 %v4275_v34  ;;  %v1556_v43 = vadd.f32 %v1555_v63, %v1527_v1  ;;  %v4570_v34 = vor.u32 %v3977_v52, %v3745_v61  ;;  %v4583_v17 = vor.u32 %v3980_v35, %v3751_v11  ;;  %2147 = vmatpush.bf16.msra.mxu0 %v4592_v0  ;;  %v3971_v63 = vld [vmem:[%s5356_s2 + $0xac] sm:$0xf0] }
 0x15c   :  { %v4618_v49 = vor.u32 %v3971_v63, %v3711_v22 }
 0x15d   :  { %v1560_v48 = vpop.f32.mrf.mxu3  ;;  %v1576_v46 = vpop.f32.mrf.mxu0  ;;  %2159 = vmatpush.bf16.msrb.mxu1 %v4570_v34  ;;  %v4595_v58 = vpack.c.bf16 %v1556_v43, %v4473_v9  ;;  %2172 = vmatpush.bf16.msra.mxu2 %v4583_v17 }
 0x15e   :  { %v1531_v16 = vpop.f32.mrf.mxu2  ;;  %v1499_v18 = vpop.f32.mrf.mxu1  ;;  %v4598_v62 = vadd.f32 %v1576_v46, %v4581_v7  ;;  %5428 = vst [vmem:[#allocation12_spill] sm:$0xff] %v4618_v49  ;;  %v4671_v46 = vor.u32 %v3963_v10, %v3679_v3  ;;  %v3697_v3 = vld [vmem:[%s5356_s2 + $0x90] sm:$0xf0]  ;;  %v3703_v10 = vld [vmem:[%s5356_s2 + $0x88] sm:$0xf] }
 0x15f   :  { %5427 = vst [vmem:[#allocation11_spill] sm:$0xff] %v4595_v58  ;;  %v1500_v44 = vadd.f32 %v1499_v18, %v4519_v27  ;;  %v3973_v27 = vld [vmem:[%s5356_s2 + $0xc4] sm:$0xf]  ;;  %2148 = vmatpush.bf16.msra.mxu0 %v4618_v49  ;;  %v5458_v58 = vmov 0.0|0.0  }
 0x160   :  { %v4631_v38 = vor.u32 %v3973_v27, %v3729_v4  ;;  %5433 = vst [vmem:[#allocation17_spill] sm:$0xff] %v4671_v46 }
 0x161   :  { %v1529_v9 = vadd.f32 %v1528_v41, %v1500_v44  ;;  %2173 = vmatpush.bf16.msra.mxu2 %v4633_v39  ;;  %v3719_v44 = vld [vmem:[%s5356_s2 + $0xa8] sm:$0xf] }
 0x162   :  { %5429 = vst [vmem:[#allocation13_spill] sm:$0xff] %v4631_v38  ;;  %2160 = vmatpush.bf16.msrb.mxu1 %v4631_v38 }
 0x163   :  { %v1558_v41 = vadd.f32 %v1557_v53, %v1529_v9  ;;  %v4645_v53 = vor.u32 %v3967_v59, %v3695_v28  ;;  %v3970_v59 = vld [vmem:[%s5356_s2 + $0xac] sm:$0xf] }
 0x165   :  { %v1562_v1 = vpop.f32.mrf.mxu3  ;;  %v1579_v52 = vpop.f32.mrf.mxu0  ;;  %5431 = vst [vmem:[#allocation15_spill] sm:$0xff] %v4645_v53  ;;  %v4648_v61 = vpack.c.bf16 %v1558_v41, %v4485_v45  ;;  %2149 = vmatpush.bf16.msra.mxu0 %v4645_v53 }
 0x166   :  { %v1533_v33 = vpop.f32.mrf.mxu2  ;;  %v1502_v11 = vpop.f32.mrf.mxu1  ;;  %v4651_v43 = vadd.f32 %v1579_v52, %v4581_v7  ;;  %v3721_v52 = vld [vmem:[%s5356_s2 + $0xb8] sm:$0xf0] }
 0x167   :  { %5432 = vst [vmem:[#allocation16_spill] sm:$0xff] %v4648_v61  ;;  %v1503_v35 = vadd.f32 %v1502_v11, %v4526_v25  ;;  %v3974_v25 = vld [vmem:[%s5356_s2 + $0xcc] sm:$0xf] }
 0x168   :  { %1810 = vmatmul.bf16.gmra.mxu0 %v4207_v31  ;;  %3624 = vmatmul.msk.bf16.gmra.mxu1 %vm1204_vm0, %v4376_v23  ;;  %v3737_v31 = vld [vmem:[%s5356_s2 + $0xd8] sm:$0xf0] }
 0x169   :  { %v1532_v45 = vadd.f32 %v1531_v16, %v1503_v35  ;;  %v4675_v18 = vor.u32 %v3974_v25, %v3737_v31  ;;  %v3969_v16 = vld [vmem:[%s5356_s2 + $0xa4] sm:$0xf]  ;;  %2150 = vmatpush.bf16.msra.mxu0 %v4671_v46  ;;  %v4721_v35 = vor.u32 %v3970_v59, %v3721_v52  ;;  %v3955_v25 = vld [vmem:[%s5356_s2 + $0x2c] sm:$0xf0]  ;;  %v1575_v31 = vadd.f32 %v4541_v60, %v4581_v7  ;;  %v3966_v60 = vld [vmem:[%s5356_s2 + $0x8c] sm:$0xf] }
 0x16a   :  { %3625 = vmatmul.msk.bf16.vlgmr.msrb.gmra.mxu3 %vm1204_vm0, %v4321_v56  ;;  %v3972_v56 = vld [vmem:[%s5356_s2 + $0xb4] sm:$0xf0] }
 0x16b   :  { %1863 = vmatmul.bf16.vlgmr.msrb.gmra.mxu2 %v4299_v5  ;;  %5434 = vst [vmem:[#allocation18_spill] sm:$0xff] %v4675_v18  ;;  %v3713_v5 = vld [vmem:[%s5356_s2 + $0xb0] sm:$0xf0]  ;;  %v1561_v22 = vadd.f32 %v1560_v48, %v1532_v45  ;;  %2186 = vmatpush.bf16.msra.mxu3 %v4675_v18  ;;  %v4693_v50 = vor.u32 %v3972_v56, %v3719_v44  ;;  %v3959_v48 = vld [vmem:[%s5356_s2 + $0x4c] sm:$0xf0] }
 0x16c   :  { %v4686_v63 = vor.u32 %v3969_v16, %v3713_v5  ;;  %v4704_v12 = vor.u32 %v3959_v48, %v3663_v2  ;;  %5439 = vst [vmem:[#allocation23_spill] sm:$0xff] %v4721_v35  ;;  %v3631_v56 = vld [vmem:[%s5356_s2] sm:$0xf]  ;;  %v3951_v2 = vld [vmem:[%s5356_s2 + $0xc] sm:$0xf0] }
 0x16d   :  { %5436 = vst [vmem:[#allocation20_spill] sm:$0xff] %v4693_v50  ;;  %v1661_v27 = vpop.f32.mrf.mxu3  ;;  %v4701_v4 = vpop.f32.mrf.mxu0  ;;  %v4707_v20 = vpack.c.bf16 %v1561_v22, %v4494_v40  ;;  %2174 = vmatpush.bf16.msra.mxu2 %v4693_v50  ;;  %v3647_v40 = vld [vmem:[%s5356_s2 + $0x20] sm:$0xf] }
 0x16e   :  { %5435 = vst [vmem:[#allocation19_spill] sm:$0xff] %v4686_v63  ;;  %v1632_v9 = vpop.f32.mrf.mxu2  ;;  %2161 = vmatpush.bf16.msrb.mxu1 %v4686_v63  ;;  %v1504_v41 = vpop.f32.mrf.mxu1  ;;  %2151 = vmatpush.bf16.msra.mxu0 %v4704_v12  ;;  %v4745_v44 = vor.u32 %v3955_v25, %v3647_v40  ;;  %v4768_v40 = vor.u32 %v3951_v2, %v3631_v56  ;;  %v3689_v25 = vld [vmem:[%s5356_s2 + $0x78] sm:$0xf0]  ;;  %v3671_v56 = vld [vmem:[%s5356_s2 + $0x48] sm:$0xf] }
 0x16f   :  { %5437 = vst [vmem:[#allocation21_spill] sm:$0xff] %v4704_v12  ;;  %v1505_v28 = vadd.f32 %v1504_v41, %v4538_v30  ;;  %v3965_v30 = vld [vmem:[%s5356_s2 + $0x84] sm:$0xf]  ;;  %2187 = vmatpush.bf16.msra.mxu3 %v4721_v35  ;;  %v3705_v41 = vld [vmem:[%s5356_s2 + $0x98] sm:$0xf0] }
 0x170   :  { %5438 = vst [vmem:[#allocation22_spill] sm:$0xff] %v4707_v20  ;;  %v4732_v45 = vor.u32 %v3965_v30, %v3697_v3  ;;  %v3687_v3 = vld [vmem:[%s5356_s2 + $0x68] sm:$0xf]  ;;  %v3960_v2 = vld [vmem:[%s5356_s2 + $0x54] sm:$0xf0] }
 0x171   :  { %v1534_v11 = vadd.f32 %v1533_v33, %v1505_v28  ;;  %v3968_v33 = vld [vmem:[%s5356_s2 + $0x94] sm:$0xf0]  ;;  %5442 = vst [vmem:[#allocation26_spill] sm:$0xff] %v4745_v44 }
 0x172   :  { %5440 = vst [vmem:[#allocation24_spill] sm:$0xff] %v4732_v45  ;;  %v4743_v5 = vor.u32 %v3968_v33, %v3703_v10  ;;  %2162 = vmatpush.bf16.msrb.mxu1 %v4732_v45  ;;  %2152 = vmatpush.bf16.msra.mxu0 %v4745_v44  ;;  %v3962_v10 = vld [vmem:[%s5356_s2 + $0x6c] sm:$0xf] }
 0x173   :  { %v1563_v16 = vadd.f32 %v1562_v1, %v1534_v11  ;;  %5444 = vst [vmem:[#allocation28_spill] sm:$0xff] %v4768_v40  ;;  %v4770_v11 = vor.u32 %v3966_v60, %v3705_v41  ;;  %v4820_v41 = vor.u32 %v3960_v2, %v3671_v56  ;;  %v3657_v2 = vld [vmem:[%s5356_s2 + $0x38] sm:$0xf0] }
 0x174   :  { %5441 = vst [vmem:[#allocation25_spill] sm:$0xff] %v4743_v5  ;;  %2175 = vmatpush.bf16.msra.mxu2 %v4743_v5 }
 0x175   :  { %v1663_v1 = vpop.f32.mrf.mxu3  ;;  %v1584_v48 = vpop.f32.mrf.mxu0  ;;  %v4763_v28 = vpack.c.bf16 %v1563_v16, %v4504_v51  ;;  %5445 = vst [vmem:[#allocation29_spill] sm:$0xff] %v4770_v11  ;;  %2188 = vmatpush.bf16.msra.mxu3 %v4770_v11  ;;  %v3964_v51 = vld [vmem:[%s5356_s2 + $0x74] sm:$0xf0] }
 0x176   :  { %v1634_v22 = vpop.f32.mrf.mxu2  ;;  %v4766_v59 = vadd.f32 %v1584_v48, %v4581_v7  ;;  %v1603_v52 = vpop.f32.mrf.mxu1  ;;  %2153 = vmatpush.bf16.msra.mxu0 %v4768_v40  ;;  %5449 = vst [vmem:[#allocation33_spill] sm:$0xff] %v4820_v41 }
 0x177   :  { %5443 = vst [vmem:[#allocation27_spill] sm:$0xff] %v4763_v28  ;;  %v1604_v30 = vadd.f32 %v1603_v52, %v1575_v31  ;;  %v3961_v31 = vld [vmem:[%s5356_s2 + $0x64] sm:$0xf]  ;;  %v3673_v52 = vld [vmem:[%s5356_s2 + $0x58] sm:$0xf0] }
 0x178   :  { %1815 = vmatmul.bf16.gmra.mxu0 %v4243_v13  ;;  %1834 = vmatmul.bf16.vlgmr.msra.gmra.mxu1 %v4173_v55  ;;  %v4785_v13 = vor.u32 %v3964_v51, %v3687_v3  ;;  %v3681_v55 = vld [vmem:[%s5356_s2 + $0x70] sm:$0xf0] }
 0x179   :  { %v1633_v33 = vadd.f32 %v1632_v9, %v1604_v30  ;;  %v4803_v16 = vor.u32 %v3961_v31, %v3681_v55  ;;  %v3665_v55 = vld [vmem:[%s5356_s2 + $0x50] sm:$0xf0] }
 0x17a   :  { %5446 = vst [vmem:[#allocation30_spill] sm:$0xff] %v4785_v13  ;;  %3626 = vmatmul.msk.bf16.gmra.mxu3 %vm1204_vm0, %v4342_v24  ;;  %2176 = vmatpush.bf16.msra.mxu2 %v4785_v13 }
 0x17b   :  { %1868 = vmatmul.bf16.gmra.mxu2 %v4319_v54  ;;  %v4799_v54 = vor.u32 %v3962_v10, %v3689_v25  ;;  %v4801_v9 = vadd.f32 %v1661_v27, %v1633_v33  ;;  %5448 = vst [vmem:[#allocation32_spill] sm:$0xff] %v4803_v16  ;;  %2228 = vmatpush.bf16.msrb.mxu0 %v4557_v47  ;;  %v3958_v27 = vld [vmem:[%s5356_s2 + $0x4c] sm:$0xf]  ;;  %v3655_v10 = vld [vmem:[%s5356_s2 + $0x28] sm:$0xf] }
 0x17c   :  { %2163 = vmatpush.bf16.msrb.mxu1 %v4803_v16  ;;  %v4825_v3 = vor.u32 %v3958_v27, %v3673_v52  ;;  %v3956_v33 = vld [vmem:[%s5356_s2 + $0x34] sm:$0xf0]  ;;  %v3954_v25 = vld [vmem:[%s5356_s2 + $0x2c] sm:$0xf] }
 0x17d   :  { %5447 = vst [vmem:[#allocation31_spill] sm:$0xff] %v4799_v54  ;;  %2189 = vmatpush.bf16.msra.mxu3 %v4799_v54  ;;  %v1666_v60 = vpop.f32.mrf.mxu3  ;;  %v4817_v48 = vpop.f32.mrf.mxu0  ;;  %v4846_v56 = vor.u32 %v3956_v33, %v3655_v10  ;;  %v4853_v52 = vor.u32 %v3954_v25, %v3657_v2  ;;  %v3952_v10 = vld [vmem:[%s5356_s2 + $0x14] sm:$0xf0] }
 0x17e   :  { %v1637_v24 = vpop.f32.mrf.mxu2  ;;  %v1605_v30 = vpop.f32.mrf.mxu1  ;;  %5450 = vst [vmem:[#allocation34_spill] sm:$0xff] %v4825_v3  ;;  %2177 = vmatpush.bf16.msra.mxu2 %v4820_v41 }
 0x17f   :  { %v1606_v51 = vadd.f32 %v1605_v30, %v4598_v62  ;;  %2229 = vmatpush.bf16.msrb.mxu0 %v4592_v0  ;;  %v3957_v62 = vld [vmem:[%s5356_s2 + $0x44] sm:$0xf]  ;;  %5451 = vst [vmem:[#allocation35_spill] sm:$0xff] %v4846_v56 }
 0x180   :  { %v4851_v27 = vor.u32 %v3957_v62, %v3665_v55  ;;  %5453 = vst [vmem:[#allocation37_spill] sm:$0xff] %v4853_v52  ;;  %v3641_v62 = vld [vmem:[%s5356_s2 + $0x18] sm:$0xf0] }
 0x181   :  { %2190 = vmatpush.bf16.msra.mxu3 %v4825_v3  ;;  %v1635_v31 = vadd.f32 %v1634_v22, %v1606_v51  ;;  %v3639_v51 = vld [vmem:[%s5356_s2 + $0x8] sm:$0xf] }
 0x182   :  { %5452 = vst [vmem:[#allocation36_spill] sm:$0xff] %v4851_v27  ;;  %2178 = vmatpush.bf16.msra.mxu2 %v4846_v56  ;;  %2164 = vmatpush.bf16.msrb.mxu1 %v4851_v27 }
 0x183   :  { %v4855_v30 = vadd.f32 %v1663_v1, %v1635_v31  ;;  %2230 = vmatpush.bf16.msrb.mxu0 %v4618_v49  ;;  %v3950_v1 = vld [vmem:[%s5356_s2 + $0xc] sm:$0xf]  ;;  %v4874_v31 = vor.u32 %v3952_v10, %v3639_v51  ;;  %v3953_v10 = vld [vmem:[%s5356_s2 + $0x24] sm:$0xf] }
 0x184   :  { %v4882_v28 = vor.u32 %v3950_v1, %v3641_v62 }
 0x185   :  { %2191 = vmatpush.bf16.msra.mxu3 %v4853_v52  ;;  %v4872_v33 = vpop.f32.mrf.mxu3  ;;  %v1589_v25 = vpop.f32.mrf.mxu0  ;;  %5454 = vst [vmem:[#allocation38_spill] sm:$0xff] %v4874_v31 }
 0x186   :  { %v4859_v22 = vpop.f32.mrf.mxu2  ;;  %v4880_v55 = vadd.f32 %v1589_v25, %v4581_v7  ;;  %v1608_v2 = vpop.f32.mrf.mxu1  ;;  %5455 = vst [vmem:[#allocation39_spill] sm:$0xff] %v4882_v28  ;;  %2179 = vmatpush.bf16.msra.mxu2 %v4874_v31 }
 0x187   :  { %v1609_v20 = vadd.f32 %v1608_v2, %v4651_v43  ;;  %2231 = vmatpush.bf16.msrb.mxu0 %v4645_v53  ;;  %v3649_v43 = vld [vmem:[%s5356_s2 + $0x30] sm:$0xf0] }
 0x188   :  { %1820 = vmatmul.bf16.gmra.mxu0 %v4279_v36  ;;  %1839 = vmatmul.bf16.gmra.mxu1 %v4209_v32  ;;  %v4899_v1 = vor.u32 %v3953_v10, %v3649_v43 }
 0x189   :  { %2192 = vmatpush.bf16.msra.mxu3 %v4882_v28  ;;  %v1638_v51 = vadd.f32 %v1637_v24, %v1609_v20 }
 0x18a   :  { %3627 = vmatmul.msk.bf16.gmra.mxu3 %vm1204_vm0, %v4355_v42  ;;  %5456 = vst [vmem:[#allocation40_spill] sm:$0xff] %v4899_v1  ;;  %2254 = vmatpush.bf16.msrb.mxu2 %v4583_v17  ;;  %v3949_v42 = vld [vmem:[%s5356_s2 + $0x4] sm:$0xf] }
 0x18b   :  { %1873 = vmatmul.bf16.gmra.mxu2 %v4340_v21  ;;  %v1667_v36 = vadd.f32 %v1666_v60, %v1638_v51  ;;  %2232 = vmatpush.bf16.msrb.mxu0 %v4671_v46  ;;  %v3633_v60 = vld [vmem:[%s5356_s2 + $0x10] sm:$0xf0] }
 0x18c   :  { %2165 = vmatpush.bf16.msrb.mxu1 %v4899_v1  ;;  %v4918_v25 = vor.u32 %v3949_v42, %v3633_v60  ;;  %v5364_v60 = vmov 0.0|0.0  }
 0x18d   :  { %2267 = vmatpush.bf16.msrb.mxu3 %v4620_v8  ;;  %v1671_v21 = vpop.f32.mrf.mxu3  ;;  %v4905_v20 = vpop.f32.mrf.mxu0 }
 0x18e   :  { %v1642_v32 = vpop.f32.mrf.mxu2  ;;  %v4907_v24 = vpop.f32.mrf.mxu1  ;;  %2255 = vmatpush.bf16.msrb.mxu2 %v4633_v39  ;;  %5457 = vst [vmem:[#allocation41_spill] sm:$0xff] %v4918_v25 }
 0x18f   :  { %2233 = vmatpush.bf16.msrb.mxu0 %v4704_v12 }
 0x190   :  { %2166 = vmatpush.bf16.msrb.mxu1 %v4918_v25 }
 0x191   :  { %2268 = vmatpush.bf16.msrb.mxu3 %v4675_v18 }
 0x192   :  { %2256 = vmatpush.bf16.msrb.mxu2 %v4693_v50 }
 0x193   :  { %2234 = vmatpush.bf16.msrb.mxu0 %v4745_v44 }
 0x194   :  { %2241 = vmatpush.bf16.msra.mxu1 %v4570_v34 }
 0x195   :  { %2269 = vmatpush.bf16.msrb.mxu3 %v4721_v35  ;;  %v4926_v2 = vpop.f32.mrf.mxu3  ;;  %v1690_v51 = vpop.f32.mrf.mxu0 }
 0x196   :  { %v4923_v62 = vpop.f32.mrf.mxu2  ;;  %v1613_v10 = vpop.f32.mrf.mxu1  ;;  %v4930_v43 = vadd.f32 %v1690_v51, %v4801_v9  ;;  %2257 = vmatpush.bf16.msrb.mxu2 %v4743_v5 }
 0x197   :  { %v1614_v42 = vadd.f32 %v1613_v10, %v4766_v59  ;;  %2235 = vmatpush.bf16.msrb.mxu0 %v4768_v40 }
 0x198   :  { %2154 = vmatmul.bf16.vlgmr.msra.gmra.mxu0 %v5364_v60  ;;  %1844 = vmatmul.bf16.gmra.mxu1 %v4245_v14 }
 0x199   :  { %2270 = vmatpush.bf16.msrb.mxu3 %v4770_v11  ;;  %v1643_v61 = vadd.f32 %v1642_v32, %v1614_v42  ;;  %2242 = vmatpush.bf16.msra.mxu1 %v4631_v38 }
 0x19a   :  { %3628 = vmatmul.msk.bf16.gmra.mxu3 %vm1204_vm0, %v4376_v23  ;;  %2258 = vmatpush.bf16.msrb.mxu2 %v4785_v13 }
 0x19b   :  { %1878 = vmatmul.bf16.gmra.mxu2 %v4301_v6  ;;  %v1672_v9 = vadd.f32 %v1671_v21, %v1643_v61  ;;  %2310 = vmatpush.bf16.msra.mxu0 %v4557_v47 }
 0x19d   :  { %2271 = vmatpush.bf16.msrb.mxu3 %v4799_v54  ;;  %v1676_v51 = vpop.f32.mrf.mxu3  ;;  %v4945_v10 = vpop.f32.mrf.mxu0  ;;  %2243 = vmatpush.bf16.msra.mxu1 %v4686_v63 }
 0x19e   :  { %v1647_v59 = vpop.f32.mrf.mxu2  ;;  %v4947_v32 = vpop.f32.mrf.mxu1  ;;  %2259 = vmatpush.bf16.msrb.mxu2 %v4820_v41 }
 0x19f   :  { %2311 = vmatpush.bf16.msra.mxu0 %v4592_v0 }
 0x1a1   :  { %2272 = vmatpush.bf16.msrb.mxu3 %v4825_v3  ;;  %2244 = vmatpush.bf16.msra.mxu1 %v4732_v45 }
 0x1a2   :  { %2260 = vmatpush.bf16.msrb.mxu2 %v4846_v56 }
 0x1a3   :  { %2312 = vmatpush.bf16.msra.mxu0 %v4618_v49 }
 0x1a5   :  { %2273 = vmatpush.bf16.msrb.mxu3 %v4853_v52  ;;  %v4959_v6 = vpop.f32.mrf.mxu3  ;;  %v1695_v23 = vpop.f32.mrf.mxu0  ;;  %2245 = vmatpush.bf16.msra.mxu1 %v4803_v16 }
 0x1a6   :  { %v4956_v14 = vpop.f32.mrf.mxu2  ;;  %v1618_v61 = vpop.f32.mrf.mxu1  ;;  %v1696_v21 = vadd.f32 %v1695_v23, %v1667_v36  ;;  %2261 = vmatpush.bf16.msrb.mxu2 %v4874_v31 }
 0x1a7   :  { %v1619_v42 = vadd.f32 %v1618_v61, %v4880_v55  ;;  %2313 = vmatpush.bf16.msra.mxu0 %v4645_v53 }
 0x1a8   :  { %1849 = vmatmul.bf16.gmra.mxu1 %v4281_v37 }
 0x1a9   :  { %2274 = vmatpush.bf16.msrb.mxu3 %v4882_v28  ;;  %v1648_v60 = vadd.f32 %v1647_v59, %v1619_v42  ;;  %2246 = vmatpush.bf16.msra.mxu1 %v4851_v27 }
 0x1aa   :  { %2193 = vmatmul.bf16.vlgmr.msra.gmra.mxu3 %v5458_v58 }
 0x1ab   :  { %2180 = vmatmul.bf16.vlgmr.msra.gmra.mxu2 %v5458_v58  ;;  %v1677_v36 = vadd.f32 %v1676_v51, %v1648_v60  ;;  %2314 = vmatpush.bf16.msra.mxu0 %v4671_v46 }
 0x1ac   :  { %2336 = vmatpush.bf16.msra.mxu2 %v4583_v17 }
 0x1ad   :  { %2349 = vmatpush.bf16.msra.mxu3 %v4620_v8  ;;  %v1777_v37 = vpop.f32.mrf.mxu3  ;;  %v4977_v23 = vpop.f32.mrf.mxu0  ;;  %2247 = vmatpush.bf16.msra.mxu1 %v4899_v1 }
 0x1ae   :  { %v1748_v55 = vpop.f32.mrf.mxu2  ;;  %v4979_v61 = vpop.f32.mrf.mxu1 }
 0x1af   :  { %v1749_v59 = vadd.f32 %v1748_v55, %v4969_v29  ;;  %2315 = vmatpush.bf16.msra.mxu0 %v4704_v12 }
 0x1b0   :  { %2337 = vmatpush.bf16.msra.mxu2 %v4633_v39 }
 0x1b1   :  { %v4982_v15 = vadd.f32 %v1777_v37, %v1749_v59  ;;  %2350 = vmatpush.bf16.msra.mxu3 %v4675_v18  ;;  %2248 = vmatpush.bf16.msra.mxu1 %v4918_v25 }
 0x1b3   :  { %2316 = vmatpush.bf16.msra.mxu0 %v4745_v44 }
 0x1b4   :  { %2338 = vmatpush.bf16.msra.mxu2 %v4693_v50 }
 0x1b5   :  { %2351 = vmatpush.bf16.msra.mxu3 %v4721_v35  ;;  %v1779_v51 = vpop.f32.mrf.mxu3  ;;  %v1700_v42 = vpop.f32.mrf.mxu0 }
 0x1b6   :  { %v1750_v60 = vpop.f32.mrf.mxu2  ;;  %v1701_v55 = vadd.f32 %v1700_v42, %v1672_v9  ;;  %v1719_v59 = vpop.f32.mrf.mxu1 }
 0x1b7   :  { %v4992_v37 = vadd.f32 %v1719_v59, %v4930_v43  ;;  %2317 = vmatpush.bf16.msra.mxu0 %v4768_v40 }
 0x1b8   :  { %2339 = vmatpush.bf16.msra.mxu2 %v4743_v5  ;;  %2167 = vmatmul.bf16.vlgmr.msrb.gmra.mxu1 %v5458_v58 }
 0x1b9   :  { %2352 = vmatpush.bf16.msra.mxu3 %v4770_v11  ;;  %2323 = vmatpush.bf16.msrb.mxu1 %v4570_v34 }
 0x1bc   :  { %2340 = vmatpush.bf16.msra.mxu2 %v4785_v13 }
 0x1bd   :  { %2353 = vmatpush.bf16.msra.mxu3 %v4799_v54  ;;  %v1782_v42 = vpop.f32.mrf.mxu3  ;;  %v5002_v43 = vpop.f32.mrf.mxu0  ;;  %2324 = vmatpush.bf16.msrb.mxu1 %v4631_v38 }
 0x1be   :  { %v1753_v26 = vpop.f32.mrf.mxu2  ;;  %v5004_v59 = vpop.f32.mrf.mxu1 }
 0x1bf   :  { %v1754_v9 = vadd.f32 %v1753_v26, %v4969_v29 }
 0x1c0   :  { %2341 = vmatpush.bf16.msra.mxu2 %v4820_v41 }
 0x1c1   :  { %v1783_v19 = vadd.f32 %v1782_v42, %v1754_v9  ;;  %2354 = vmatpush.bf16.msra.mxu3 %v4825_v3  ;;  %2325 = vmatpush.bf16.msrb.mxu1 %v4686_v63 }
 0x1c4   :  { %2342 = vmatpush.bf16.msra.mxu2 %v4846_v56 }
 0x1c5   :  { %2355 = vmatpush.bf16.msra.mxu3 %v4853_v52  ;;  %v1784_v26 = vpop.f32.mrf.mxu3  ;;  %v1705_v40 = vpop.f32.mrf.mxu0  ;;  %2326 = vmatpush.bf16.msrb.mxu1 %v4732_v45 }
 0x1c6   :  { %v1755_v58 = vpop.f32.mrf.mxu2  ;;  %v1706_v44 = vadd.f32 %v1705_v40, %v1677_v36  ;;  %v1724_v12 = vpop.f32.mrf.mxu1 }
 0x1c7   :  { %v5013_v54 = vadd.f32 %v1724_v12, %v1696_v21 }
 0x1c8   :  { %2343 = vmatpush.bf16.msra.mxu2 %v4874_v31 }
 0x1c9   :  { %2356 = vmatpush.bf16.msra.mxu3 %v4882_v28  ;;  %2327 = vmatpush.bf16.msrb.mxu1 %v4803_v16 }
 0x1cd   :  { %v1787_v56 = vpop.f32.mrf.mxu3  ;;  %v5019_v52 = vpop.f32.mrf.mxu0  ;;  %2328 = vmatpush.bf16.msrb.mxu1 %v4851_v27 }
 0x1ce   :  { %v1758_v9 = vpop.f32.mrf.mxu2  ;;  %v5021_v3 = vpop.f32.mrf.mxu1 }
 0x1cf   :  { %v1759_v42 = vadd.f32 %v1758_v9, %v4969_v29  ;;  %v1751_v9 = vadd.f32 %v1750_v60, %v4969_v29 }
 0x1d1   :  { %v1788_v40 = vadd.f32 %v1787_v56, %v1759_v42  ;;  %2329 = vmatpush.bf16.msrb.mxu1 %v4899_v1  ;;  %v1780_v41 = vadd.f32 %v1779_v51, %v1751_v9 }
 0x1d5   :  { %v1789_v21 = vpop.f32.mrf.mxu3  ;;  %v1806_v36 = vpop.f32.mrf.mxu0  ;;  %2330 = vmatpush.bf16.msrb.mxu1 %v4918_v25 }
 0x1d6   :  { %v1760_v12 = vpop.f32.mrf.mxu2  ;;  %v1729_v31 = vpop.f32.mrf.mxu1 }
 0x1d7   :  { %v5026_v28 = vadd.f32 %v1729_v31, %v1701_v55  ;;  %v1756_v31 = vadd.f32 %v1755_v58, %v4969_v29 }
 0x1d9   :  { %v1785_v60 = vadd.f32 %v1784_v26, %v1756_v31 }
 0x1dd   :  { %v1792_v46 = vpop.f32.mrf.mxu3  ;;  %v1808_v11 = vpop.f32.mrf.mxu0 }
 0x1de   :  { %v1763_v13 = vpop.f32.mrf.mxu2  ;;  %v5030_v27 = vpop.f32.mrf.mxu1  ;;  %v1809_v56 = vadd.f32 %v1808_v11, %v1780_v41  ;;  %v1807_v11 = vadd.f32 %v1806_v36, %v4982_v15  ;;  %v1693_v15 = vadd.f32 %v4945_v10, %v4855_v30 }
 0x1df   :  { %v1764_v16 = vadd.f32 %v1763_v13, %v4969_v29 }
 0x1e1   :  { %v1793_v42 = vadd.f32 %v1792_v46, %v1764_v16 }
 0x1e5   :  { %v1794_v5 = vpop.f32.mrf.mxu3  ;;  %v1811_v45 = vpop.f32.mrf.mxu0 }
 0x1e6   :  { %v1765_v1 = vpop.f32.mrf.mxu2  ;;  %v1734_v53 = vpop.f32.mrf.mxu1  ;;  %v1812_v35 = vadd.f32 %v1811_v45, %v1783_v19  ;;  %v1761_v19 = vadd.f32 %v1760_v12, %v4969_v29 }
 0x1e7   :  { %v5032_v25 = vadd.f32 %v1734_v53, %v1706_v44 }
 0x1e8   :  { %v1790_v44 = vadd.f32 %v1789_v21, %v1761_v19  ;;  %v1766_v19 = vadd.f32 %v1765_v1, %v4969_v29 }
 0x1ea   :  { %v1795_v10 = vadd.f32 %v1794_v5, %v1766_v19  ;;  %v1587_v5 = vadd.f32 %v4817_v48, %v4581_v7 }
 0x1ed   :  { %v1893_v55 = vpop.f32.mrf.mxu3  ;;  %v1813_v9 = vpop.f32.mrf.mxu0 }
 0x1ee   :  { %v1864_v51 = vpop.f32.mrf.mxu2  ;;  %v5035_v13 = vpop.f32.mrf.mxu1  ;;  %v1814_v50 = vadd.f32 %v1813_v9, %v1785_v60 }
 0x1f5   :  { %v1895_v46 = vpop.f32.mrf.mxu3  ;;  %v1816_v16 = vpop.f32.mrf.mxu0 }
 0x1f6   :  { %v1866_v63 = vpop.f32.mrf.mxu2  ;;  %v1817_v41 = vadd.f32 %v1816_v16, %v1788_v40  ;;  %v1835_v49 = vpop.f32.mrf.mxu1 }
 0x1f7   :  { %v1836_v18 = vadd.f32 %v1835_v49, %v1807_v11  ;;  %v1722_v49 = vadd.f32 %v5004_v59, %v1693_v15  ;;  %v1616_v15 = vadd.f32 %v4947_v32, %v1587_v5 }
 0x1f9   :  { %v1865_v53 = vadd.f32 %v1864_v51, %v1836_v18  ;;  %v1582_v18 = vadd.f32 %v4701_v4, %v4581_v7 }
 0x1fb   :  { %v1894_v45 = vadd.f32 %v1893_v55, %v1865_v53  ;;  %v1611_v16 = vadd.f32 %v4907_v24, %v1582_v18 }
 0x1fd   :  { %v1898_v26 = vpop.f32.mrf.mxu3  ;;  %v1818_v31 = vpop.f32.mrf.mxu0  ;;  %v5040_v39 = vpack.c.bf16 %v1894_v45, %v4992_v37 }
 0x1fe   :  { %v1869_v58 = vpop.f32.mrf.mxu2  ;;  %v1819_v60 = vadd.f32 %v1818_v31, %v1790_v44  ;;  %v1837_v9 = vpop.f32.mrf.mxu1 }
 0x1ff   :  { %v1838_v38 = vadd.f32 %v1837_v9, %v1809_v56 }
 0x201   :  { %v1867_v40 = vadd.f32 %v1866_v63, %v1838_v38  ;;  %v1640_v38 = vadd.f32 %v4859_v22, %v1611_v16 }
 0x203   :  { %v1896_v36 = vadd.f32 %v1895_v46, %v1867_v40 }
 0x205   :  { %v1900_v21 = vpop.f32.mrf.mxu3  ;;  %v1821_v51 = vpop.f32.mrf.mxu0  ;;  %v5047_v55 = vpack.c.bf16 %v1896_v36, %v1722_v49 }
 0x206   :  { %v1871_v12 = vpop.f32.mrf.mxu2  ;;  %v1822_v37 = vadd.f32 %v1821_v51, %v1793_v42  ;;  %v1840_v11 = vpop.f32.mrf.mxu1  ;;  %v1669_v42 = vadd.f32 %v4872_v33, %v1640_v38 }
 0x207   :  { %v1841_v56 = vadd.f32 %v1840_v11, %v1812_v35 }
 0x208   :  { %v1698_v35 = vadd.f32 %v4977_v23, %v1669_v42 }
 0x209   :  { %v1870_v30 = vadd.f32 %v1869_v58, %v1841_v56 }
 0x20a   :  { %v1727_v29 = vadd.f32 %v5021_v3, %v1698_v35  ;;  %v1949_v3 = vunpack.c.l.bf16 %v4516_v57 }
 0x20b   :  { %v1899_v63 = vadd.f32 %v1898_v26, %v1870_v30  ;;  %v1592_v30 = vadd.f32 %v4905_v20, %v4581_v7 }
 0x20d   :  { %v1903_v46 = vpop.f32.mrf.mxu3  ;;  %v1823_v53 = vpop.f32.mrf.mxu0  ;;  %v5053_v4 = vpack.c.bf16 %v1899_v63, %v5013_v54 }
 0x20e   :  { %v1874_v59 = vpop.f32.mrf.mxu2  ;;  %v1824_v45 = vadd.f32 %v1823_v53, %v1795_v10  ;;  %v1842_v44 = vpop.f32.mrf.mxu1  ;;  %v1621_v10 = vadd.f32 %v4979_v61, %v1592_v30  ;;  %v5466_v30 = vld [vmem:[#allocation15_spill] sm:$0xff] }
 0x20f   :  { %v1843_v31 = vadd.f32 %v1842_v44, %v1814_v50  ;;  %v1645_v50 = vadd.f32 %v4923_v62, %v1616_v15 }
 0x211   :  { %v1872_v24 = vadd.f32 %v1871_v12, %v1843_v31 }
 0x213   :  { %v1901_v1 = vadd.f32 %v1900_v21, %v1872_v24  ;;  %v1674_v21 = vadd.f32 %v4926_v2, %v1645_v50 }
 0x215   :  { %v1905_v58 = vpop.f32.mrf.mxu3  ;;  %v2155_v26 = vpop.f32.mrf.mxu0  ;;  %v5060_v9 = vpack.c.bf16 %v1901_v1, %v1727_v29  ;;  %v1703_v32 = vadd.f32 %v5002_v43, %v1674_v21  ;;  %v1650_v43 = vadd.f32 %v4956_v14, %v1621_v10  ;;  %v5469_v10 = vld [vmem:[#allocation29_spill] sm:$0xff] }
 0x216   :  { %v1876_v22 = vpop.f32.mrf.mxu2  ;;  %v1845_v54 = vpop.f32.mrf.mxu1  ;;  %v2198_v51 = vadd.f32 %v2155_v26, %v1949_v3 }
 0x217   :  { %v1846_v40 = vadd.f32 %v1845_v54, %v1817_v41  ;;  %v1732_v16 = vadd.f32 %v5030_v27, %v1703_v32  ;;  %v1951_v27 = vunpack.c.l.bf16 %v5040_v39  ;;  %v1679_v31 = vadd.f32 %v4959_v6, %v1650_v43  ;;  %v5460_v32 = vld [vmem:[#allocation14_spill] sm:$0xff] }
 0x218   :  { %v2202_v62 = vmul.f32 0.5, %v2198_v51  ;;  %v5472_v43 = vld [vmem:[#allocation30_spill] sm:$0xff] }
 0x219   :  { %v1875_v33 = vadd.f32 %v1874_v59, %v1846_v40 }
 0x21a   :  { %3994 = vtanh.f32 %v2202_v62  ;;  %v5463_v62 = vld [vmem:[#allocation19_spill] sm:$0xff] }
 0x21b   :  { %v1904_v23 = vadd.f32 %v1903_v46, %v1875_v33 }
 0x21d   :  { %v1908_v36 = vpop.f32.mrf.mxu3  ;;  %v2157_v12 = vpop.f32.mrf.mxu0  ;;  %v5066_v18 = vpack.c.bf16 %v1904_v23, %v5026_v28 }
 0x21e   :  { %v1879_v49 = vpop.f32.mrf.mxu2  ;;  %v1847_v48 = vpop.f32.mrf.mxu1 }
 0x21f   :  { %v1848_v11 = vadd.f32 %v1847_v48, %v1819_v60 }
 0x220   :  { %v3995_v53 = vpop.eup %3994 }
 0x221   :  { %v1877_v41 = vadd.f32 %v1876_v22, %v1848_v11  ;;  %v2204_v35 = vmul.f32 0.5, %v3995_v53  ;;  %v5459_v11 = vld [vmem:[#allocation13_spill] sm:$0xff] }
 0x222   :  { %v5476_v53 = vld [vmem:[#allocation33_spill] sm:$0xff] }
 0x223   :  { %v1906_v56 = vadd.f32 %v1905_v58, %v1877_v41  ;;  %v2205_v1 = vadd.f32 0.5, %v2204_v35  ;;  %v1950_v58 = vunpack.c.h.bf16 %v4516_v57  ;;  %v5461_v41 = vld [vmem:[#allocation18_spill] sm:$0xff]  ;;  %v5482_v35 = vld [vmem:[#allocation28_spill] sm:$0xff] }
 0x225   :  { %v1910_v38 = vpop.f32.mrf.mxu3  ;;  %v5073_v63 = vpack.c.bf16 %v1906_v56, %v1732_v16  ;;  %v5462_v16 = vld [vmem:[#allocation12_spill] sm:$0xff] }
 0x226   :  { %v1881_v19 = vpop.f32.mrf.mxu2  ;;  %v1850_v28 = vpop.f32.mrf.mxu1  ;;  %v5464_v56 = vld [vmem:[#allocation20_spill] sm:$0xff] }
 0x227   :  { %v1851_v2 = vadd.f32 %v1850_v28, %v1822_v37  ;;  %v1708_v37 = vadd.f32 %v5019_v52, %v1679_v31  ;;  %v5468_v28 = vld [vmem:[#allocation25_spill] sm:$0xff]  ;;  %v5480_v31 = vld [vmem:[#allocation35_spill] sm:$0xff] }
 0x229   :  { %v1880_v60 = vadd.f32 %v1879_v49, %v1851_v2  ;;  %v1737_v14 = vadd.f32 %v5035_v13, %v1708_v37  ;;  %v5470_v2 = vld [vmem:[#allocation17_spill] sm:$0xff] }
 0x22a   :  { %v5483_v37 = vld [vmem:[#allocation41_spill] sm:$0xff] }
 0x22b   :  { %v1909_v59 = vadd.f32 %v1908_v36, %v1880_v60  ;;  %v5471_v60 = vld [vmem:[#allocation32_spill] sm:$0xff] }
 0x22d   :  { %v2194_v42 = vpop.f32.mrf.mxu3  ;;  %v5079_v7 = vpack.c.bf16 %v1909_v59, %v5032_v25  ;;  %v5473_v59 = vld [vmem:[#allocation31_spill] sm:$0xff] }
 0x22e   :  { %v2181_v46 = vpop.f32.mrf.mxu2  ;;  %v1852_v20 = vpop.f32.mrf.mxu1 }
 0x22f   :  { %v2200_v44 = vadd.f32 %v2181_v46, %v1951_v27  ;;  %v1853_v61 = vadd.f32 %v1852_v20, %v1824_v45  ;;  %v1952_v45 = vunpack.c.h.bf16 %v5040_v39  ;;  %v5474_v27 = vld [vmem:[#allocation21_spill] sm:$0xff]  ;;  %v5475_v46 = vld [vmem:[#allocation36_spill] sm:$0xff] }
 0x230   :  { %v5479_v20 = vld [vmem:[#allocation40_spill] sm:$0xff] }
 0x231   :  { %3996 = vtanh.f32 %v2200_v44  ;;  %v1882_v24 = vadd.f32 %v1881_v19, %v1853_v61  ;;  %v2201_v33 = vadd.f32 %v2194_v42, %v1952_v45  ;;  %v5465_v19 = vld [vmem:[#allocation23_spill] sm:$0xff]  ;;  %v5477_v44 = vld [vmem:[#allocation34_spill] sm:$0xff]  ;;  %v5481_v61 = vld [vmem:[#allocation37_spill] sm:$0xff]  ;;  %v2225_v45 = vunpack.c.l.bf16 %v5047_v55 }
 0x232   :  { %v5478_v42 = vld [vmem:[#allocation26_spill] sm:$0xff] }
 0x233   :  { %v1911_v29 = vadd.f32 %v1910_v38, %v1882_v24  ;;  %v2211_v52 = vmul.f32 0.5, %v2201_v33  ;;  %v5467_v38 = vld [vmem:[#allocation24_spill] sm:$0xff]  ;;  %v5484_v24 = vld [vmem:[#allocation38_spill] sm:$0xff] }
 0x235   :  { %v2196_v26 = vpop.f32.mrf.mxu3  ;;  %v5085_v25 = vpack.c.bf16 %v1911_v29, %v1737_v14  ;;  %v5485_v14 = vld [vmem:[#allocation39_spill] sm:$0xff]  ;;  %v5486_v29 = vld [vmem:[#allocation8_spill] sm:$0xff] }
 0x236   :  { %v2183_v22 = vpop.f32.mrf.mxu2  ;;  %v2168_v15 = vpop.f32.mrf.mxu1 }
 0x237   :  { %v3997_v5 = vpop.eup %3996  ;;  %v2199_v6 = vadd.f32 %v2168_v15, %v1950_v58  ;;  %v2224_v22 = vunpack.c.h.bf16 %v5486_v29 }
 0x238   :  { %v2216_v54 = vmul.f32 %v3997_v5, %v2205_v1  ;;  %v2223_v1 = vunpack.c.l.bf16 %v5486_v29 }
 0x239   :  { %v2206_v40 = vmul.f32 0.5, %v2199_v6 }
 0x23b   :  { %3998 = vtanh.f32 %v2206_v40  ;;  %v2226_v40 = vunpack.c.h.bf16 %v5047_v55 }
 0x23c   :  { %4000 = vtanh.f32 %v2211_v52 }
 0x23e   :  { %v2170_v50 = vpop.f32.mrf.mxu1 }
 0x241   :  { %v3999_v13 = vpop.eup %3998 }
 0x242   :  { %v2208_v23 = vmul.f32 0.5, %v3999_v13  ;;  %v4001_v36 = vpop.eup %4000 }
 0x243   :  { %v2213_v12 = vmul.f32 0.5, %v4001_v36 }
 0x244   :  { %v2209_v49 = vadd.f32 0.5, %v2208_v23 }
 0x245   :  { %v2214_v48 = vadd.f32 0.5, %v2213_v12 }
 0x246   :  { %v2215_v3 = vmul.f32 0.0, %v2209_v49 }
 0x248   :  { %v5088_v57 = vadd.f32 %v2216_v54, %v2215_v3 }
 0x24a   :  { %4002 = vtanh.f32 %v5088_v57 }
 0x250   :  { %v4003_v21 = vpop.eup %4002 }
 0x251   :  { %v2219_v51 = vmul.f32 %v4003_v21, %v2214_v48 }
 0x253   :  { %v2227_v39 = vpack.c.bf16 %v2219_v51, %v2219_v51 }
 0x255   :  { %2236 = vmatmul.bf16.vlgmr.msrb.gmra.mxu0 %v2227_v39  ;;  %2249 = vmatmul.bf16.vlgmr.msra.gmra.mxu1 %v2227_v39 }
 0x256   :  { %2262 = vmatmul.bf16.vlgmr.msrb.gmra.mxu2 %v2227_v39  ;;  %2275 = vmatmul.bf16.vlgmr.msrb.gmra.mxu3 %v2227_v39 }
 0x257   :  { %2392 = vmatpush.bf16.msrb.mxu0 %v4557_v47  ;;  %2405 = vmatpush.bf16.msra.mxu1 %v4570_v34 }
 0x258   :  { %2418 = vmatpush.bf16.msrb.mxu2 %v4583_v17  ;;  %2431 = vmatpush.bf16.msrb.mxu3 %v4620_v8 }
 0x25b   :  { %2393 = vmatpush.bf16.msrb.mxu0 %v4592_v0  ;;  %2406 = vmatpush.bf16.msra.mxu1 %v5459_v11 }
 0x25c   :  { %2419 = vmatpush.bf16.msrb.mxu2 %v5460_v32  ;;  %2432 = vmatpush.bf16.msrb.mxu3 %v5461_v41 }
 0x25f   :  { %2394 = vmatpush.bf16.msrb.mxu0 %v5462_v16  ;;  %2407 = vmatpush.bf16.msra.mxu1 %v5463_v62 }
 0x260   :  { %2420 = vmatpush.bf16.msrb.mxu2 %v5464_v56  ;;  %2433 = vmatpush.bf16.msrb.mxu3 %v5465_v19 }
 0x263   :  { %2395 = vmatpush.bf16.msrb.mxu0 %v5466_v30  ;;  %2408 = vmatpush.bf16.msra.mxu1 %v5467_v38 }
 0x264   :  { %2421 = vmatpush.bf16.msrb.mxu2 %v5468_v28  ;;  %2434 = vmatpush.bf16.msrb.mxu3 %v5469_v10 }
 0x267   :  { %2396 = vmatpush.bf16.msrb.mxu0 %v5470_v2  ;;  %2409 = vmatpush.bf16.msra.mxu1 %v5471_v60 }
 0x268   :  { %2422 = vmatpush.bf16.msrb.mxu2 %v5472_v43  ;;  %2435 = vmatpush.bf16.msrb.mxu3 %v5473_v59 }
 0x26b   :  { %2397 = vmatpush.bf16.msrb.mxu0 %v5474_v27  ;;  %2410 = vmatpush.bf16.msra.mxu1 %v5475_v46 }
 0x26c   :  { %2423 = vmatpush.bf16.msrb.mxu2 %v5476_v53  ;;  %2436 = vmatpush.bf16.msrb.mxu3 %v5477_v44 }
 0x26f   :  { %2398 = vmatpush.bf16.msrb.mxu0 %v5478_v42  ;;  %2411 = vmatpush.bf16.msra.mxu1 %v5479_v20 }
 0x270   :  { %2424 = vmatpush.bf16.msrb.mxu2 %v5480_v31  ;;  %2437 = vmatpush.bf16.msrb.mxu3 %v5481_v61 }
 0x273   :  { %2399 = vmatpush.bf16.msrb.mxu0 %v5482_v35  ;;  %2412 = vmatpush.bf16.msra.mxu1 %v5483_v37 }
 0x274   :  { %2425 = vmatpush.bf16.msrb.mxu2 %v5484_v24  ;;  %2438 = vmatpush.bf16.msrb.mxu3 %v5485_v14 }
 0x2d2   :  { %v2237_v5 = vpop.f32.mrf.mxu0  ;;  %v2250_v58 = vpop.f32.mrf.mxu1 }
 0x2d3   :  { %v2280_v26 = vadd.f32 %v2237_v5, %v2223_v1  ;;  %v2281_v54 = vadd.f32 %v2250_v58, %v2224_v22 }
 0x2d5   :  { %v2284_v15 = vmul.f32 0.5, %v2280_v26  ;;  %v2288_v6 = vmul.f32 0.5, %v2281_v54 }
 0x2d7   :  { %4004 = vtanh.f32 %v2284_v15 }
 0x2d8   :  { %4006 = vtanh.f32 %v2288_v6 }
 0x2d9   :  { %v2263_v33 = vpop.f32.mrf.mxu2  ;;  %v2276_v52 = vpop.f32.mrf.mxu3 }
 0x2da   :  { %v2282_v50 = vadd.f32 %v2263_v33, %v2225_v45  ;;  %v2283_v13 = vadd.f32 %v2276_v52, %v2226_v40  ;;  %v2239_v23 = vpop.f32.mrf.mxu0  ;;  %v2252_v49 = vpop.f32.mrf.mxu1 }
 0x2dc   :  { %4008 = vtanh.f32 %v2282_v50  ;;  %v2293_v3 = vmul.f32 0.5, %v2283_v13 }
 0x2dd   :  { %v4005_v36 = vpop.eup %4004 }
 0x2de   :  { %v4007_v12 = vpop.eup %4006  ;;  %v2286_v48 = vmul.f32 0.5, %v4005_v36  ;;  %4010 = vtanh.f32 %v2293_v3 }
 0x2df   :  { %v2290_v21 = vmul.f32 0.5, %v4007_v12  ;;  %v2307_v12 = vunpack.c.l.bf16 %v5053_v4 }
 0x2e0   :  { %v2287_v51 = vadd.f32 0.5, %v2286_v48  ;;  %v2308_v48 = vunpack.c.h.bf16 %v5053_v4 }
 0x2e1   :  { %v2291_v39 = vadd.f32 0.5, %v2290_v21  ;;  %v2265_v29 = vpop.f32.mrf.mxu2  ;;  %v2278_v1 = vpop.f32.mrf.mxu3 }
 0x2e2   :  { %v4009_v22 = vpop.eup %4008 }
 0x2e3   :  { %v2297_v55 = vmul.f32 %v2291_v39, %v5088_v57  ;;  %v2298_v5 = vmul.f32 %v4009_v22, %v2287_v51  ;;  %v5487_v57 = vld [vmem:[#allocation9_spill] sm:$0xff] }
 0x2e4   :  { %v4011_v58 = vpop.eup %4010  ;;  %v2305_v33 = vunpack.c.l.bf16 %v5487_v57  ;;  %v2306_v52 = vunpack.c.h.bf16 %v5487_v57 }
 0x2e5   :  { %v5128_v26 = vadd.f32 %v2298_v5, %v2297_v55  ;;  %v2295_v54 = vmul.f32 0.5, %v4011_v58 }
 0x2e7   :  { %4012 = vtanh.f32 %v5128_v26  ;;  %v2296_v15 = vadd.f32 0.5, %v2295_v54 }
 0x2ed   :  { %v4013_v6 = vpop.eup %4012 }
 0x2ee   :  { %v2301_v45 = vmul.f32 %v4013_v6, %v2296_v15 }
 0x2f0   :  { %v2309_v40 = vpack.c.bf16 %v2301_v45, %v2301_v45 }
 0x2f2   :  { %2318 = vmatmul.bf16.vlgmr.msra.gmra.mxu0 %v2309_v40  ;;  %2331 = vmatmul.bf16.vlgmr.msrb.gmra.mxu1 %v2309_v40 }
 0x2f3   :  { %2344 = vmatmul.bf16.vlgmr.msra.gmra.mxu2 %v2309_v40  ;;  %2357 = vmatmul.bf16.vlgmr.msra.gmra.mxu3 %v2309_v40 }
 0x2f4   :  { %2474 = vmatpush.bf16.msra.mxu0 %v4557_v47  ;;  %2487 = vmatpush.bf16.msrb.mxu1 %v4570_v34 }
 0x2f5   :  { %2500 = vmatpush.bf16.msra.mxu2 %v4583_v17  ;;  %2513 = vmatpush.bf16.msra.mxu3 %v4620_v8 }
 0x2f8   :  { %2475 = vmatpush.bf16.msra.mxu0 %v4592_v0  ;;  %2488 = vmatpush.bf16.msrb.mxu1 %v5459_v11 }
 0x2f9   :  { %2501 = vmatpush.bf16.msra.mxu2 %v5460_v32  ;;  %2514 = vmatpush.bf16.msra.mxu3 %v5461_v41 }
 0x2fc   :  { %2476 = vmatpush.bf16.msra.mxu0 %v5462_v16  ;;  %2489 = vmatpush.bf16.msrb.mxu1 %v5463_v62 }
 0x2fd   :  { %2502 = vmatpush.bf16.msra.mxu2 %v5464_v56  ;;  %2515 = vmatpush.bf16.msra.mxu3 %v5465_v19 }
 0x300   :  { %2477 = vmatpush.bf16.msra.mxu0 %v5466_v30  ;;  %2490 = vmatpush.bf16.msrb.mxu1 %v5467_v38 }
 0x301   :  { %2503 = vmatpush.bf16.msra.mxu2 %v5468_v28  ;;  %2516 = vmatpush.bf16.msra.mxu3 %v5469_v10 }
 0x304   :  { %2478 = vmatpush.bf16.msra.mxu0 %v5470_v2  ;;  %2491 = vmatpush.bf16.msrb.mxu1 %v5471_v60 }
 0x305   :  { %2504 = vmatpush.bf16.msra.mxu2 %v5472_v43  ;;  %2517 = vmatpush.bf16.msra.mxu3 %v5473_v59 }
 0x308   :  { %2479 = vmatpush.bf16.msra.mxu0 %v5474_v27  ;;  %2492 = vmatpush.bf16.msrb.mxu1 %v5475_v46 }
 0x309   :  { %2505 = vmatpush.bf16.msra.mxu2 %v5476_v53  ;;  %2518 = vmatpush.bf16.msra.mxu3 %v5477_v44 }
 0x30c   :  { %2480 = vmatpush.bf16.msra.mxu0 %v5478_v42  ;;  %2493 = vmatpush.bf16.msrb.mxu1 %v5479_v20 }
 0x30d   :  { %2506 = vmatpush.bf16.msra.mxu2 %v5480_v31  ;;  %2519 = vmatpush.bf16.msra.mxu3 %v5481_v61 }
 0x310   :  { %2481 = vmatpush.bf16.msra.mxu0 %v5482_v35  ;;  %2494 = vmatpush.bf16.msrb.mxu1 %v5483_v37 }
 0x311   :  { %2507 = vmatpush.bf16.msra.mxu2 %v5484_v24  ;;  %2520 = vmatpush.bf16.msra.mxu3 %v5485_v14 }
 0x36f   :  { %v2319_v50 = vpop.f32.mrf.mxu0  ;;  %v2332_v13 = vpop.f32.mrf.mxu1 }
 0x370   :  { %v2362_v23 = vadd.f32 %v2319_v50, %v2305_v33  ;;  %v2363_v49 = vadd.f32 %v2332_v13, %v2306_v52 }
 0x372   :  { %v2366_v3 = vmul.f32 0.5, %v2362_v23  ;;  %v2370_v36 = vmul.f32 0.5, %v2363_v49 }
 0x374   :  { %4014 = vtanh.f32 %v2366_v3 }
 0x375   :  { %4016 = vtanh.f32 %v2370_v36 }
 0x376   :  { %v2345_v21 = vpop.f32.mrf.mxu2  ;;  %v2358_v51 = vpop.f32.mrf.mxu3 }
 0x377   :  { %v2364_v39 = vadd.f32 %v2345_v21, %v2307_v12  ;;  %v2365_v29 = vadd.f32 %v2358_v51, %v2308_v48  ;;  %v2321_v1 = vpop.f32.mrf.mxu0  ;;  %v2334_v22 = vpop.f32.mrf.mxu1 }
 0x379   :  { %4018 = vtanh.f32 %v2364_v39  ;;  %v2375_v55 = vmul.f32 0.5, %v2365_v29 }
 0x37a   :  { %v4015_v5 = vpop.eup %4014 }
 0x37b   :  { %v4017_v58 = vpop.eup %4016  ;;  %v2368_v54 = vmul.f32 0.5, %v4015_v5  ;;  %4020 = vtanh.f32 %v2375_v55  ;;  %v2389_v5 = vunpack.c.l.bf16 %v5060_v9 }
 0x37c   :  { %v2372_v15 = vmul.f32 0.5, %v4017_v58  ;;  %v2390_v58 = vunpack.c.h.bf16 %v5060_v9 }
 0x37d   :  { %v2369_v6 = vadd.f32 0.5, %v2368_v54 }
 0x37e   :  { %v2373_v45 = vadd.f32 0.5, %v2372_v15  ;;  %v2347_v40 = vpop.f32.mrf.mxu2  ;;  %v2360_v57 = vpop.f32.mrf.mxu3 }
 0x37f   :  { %v4019_v33 = vpop.eup %4018 }
 0x380   :  { %v2379_v4 = vmul.f32 %v2373_v45, %v5128_v26  ;;  %v2380_v52 = vmul.f32 %v4019_v33, %v2369_v6  ;;  %v5488_v26 = vld [vmem:[#allocation10_spill] sm:$0xff] }
 0x381   :  { %v4021_v50 = vpop.eup %4020  ;;  %v2387_v48 = vunpack.c.l.bf16 %v5488_v26  ;;  %v2388_v21 = vunpack.c.h.bf16 %v5488_v26 }
 0x382   :  { %v5168_v13 = vadd.f32 %v2380_v52, %v2379_v4  ;;  %v2377_v23 = vmul.f32 0.5, %v4021_v50 }
 0x384   :  { %4022 = vtanh.f32 %v5168_v13  ;;  %v2378_v49 = vadd.f32 0.5, %v2377_v23 }
 0x38a   :  { %v4023_v3 = vpop.eup %4022 }
 0x38b   :  { %v2383_v36 = vmul.f32 %v4023_v3, %v2378_v49 }
 0x38d   :  { %v2391_v12 = vpack.c.bf16 %v2383_v36, %v2383_v36 }
 0x38f   :  { %2400 = vmatmul.bf16.vlgmr.msrb.gmra.mxu0 %v2391_v12  ;;  %2413 = vmatmul.bf16.vlgmr.msra.gmra.mxu1 %v2391_v12 }
 0x390   :  { %2426 = vmatmul.bf16.vlgmr.msrb.gmra.mxu2 %v2391_v12  ;;  %2439 = vmatmul.bf16.vlgmr.msrb.gmra.mxu3 %v2391_v12 }
 0x391   :  { %2556 = vmatpush.bf16.msrb.mxu0 %v4557_v47  ;;  %2569 = vmatpush.bf16.msra.mxu1 %v4570_v34 }
 0x392   :  { %2582 = vmatpush.bf16.msrb.mxu2 %v4583_v17  ;;  %2595 = vmatpush.bf16.msrb.mxu3 %v4620_v8 }
 0x395   :  { %2557 = vmatpush.bf16.msrb.mxu0 %v4592_v0  ;;  %2570 = vmatpush.bf16.msra.mxu1 %v5459_v11 }
 0x396   :  { %2583 = vmatpush.bf16.msrb.mxu2 %v5460_v32  ;;  %2596 = vmatpush.bf16.msrb.mxu3 %v5461_v41 }
 0x399   :  { %2558 = vmatpush.bf16.msrb.mxu0 %v5462_v16  ;;  %2571 = vmatpush.bf16.msra.mxu1 %v5463_v62 }
 0x39a   :  { %2584 = vmatpush.bf16.msrb.mxu2 %v5464_v56  ;;  %2597 = vmatpush.bf16.msrb.mxu3 %v5465_v19 }
 0x39d   :  { %2559 = vmatpush.bf16.msrb.mxu0 %v5466_v30  ;;  %2572 = vmatpush.bf16.msra.mxu1 %v5467_v38 }
 0x39e   :  { %2585 = vmatpush.bf16.msrb.mxu2 %v5468_v28  ;;  %2598 = vmatpush.bf16.msrb.mxu3 %v5469_v10 }
 0x3a1   :  { %2560 = vmatpush.bf16.msrb.mxu0 %v5470_v2  ;;  %2573 = vmatpush.bf16.msra.mxu1 %v5471_v60 }
 0x3a2   :  { %2586 = vmatpush.bf16.msrb.mxu2 %v5472_v43  ;;  %2599 = vmatpush.bf16.msrb.mxu3 %v5473_v59 }
 0x3a5   :  { %2561 = vmatpush.bf16.msrb.mxu0 %v5474_v27  ;;  %2574 = vmatpush.bf16.msra.mxu1 %v5475_v46 }
 0x3a6   :  { %2587 = vmatpush.bf16.msrb.mxu2 %v5476_v53  ;;  %2600 = vmatpush.bf16.msrb.mxu3 %v5477_v44 }
 0x3a9   :  { %2562 = vmatpush.bf16.msrb.mxu0 %v5478_v42  ;;  %2575 = vmatpush.bf16.msra.mxu1 %v5479_v20 }
 0x3aa   :  { %2588 = vmatpush.bf16.msrb.mxu2 %v5480_v31  ;;  %2601 = vmatpush.bf16.msrb.mxu3 %v5481_v61 }
 0x3ad   :  { %2563 = vmatpush.bf16.msrb.mxu0 %v5482_v35  ;;  %2576 = vmatpush.bf16.msra.mxu1 %v5483_v37 }
 0x3ae   :  { %2589 = vmatpush.bf16.msrb.mxu2 %v5484_v24  ;;  %2602 = vmatpush.bf16.msrb.mxu3 %v5485_v14 }
 0x40c   :  { %v2401_v51 = vpop.f32.mrf.mxu0  ;;  %v2414_v39 = vpop.f32.mrf.mxu1 }
 0x40d   :  { %v2444_v29 = vadd.f32 %v2401_v51, %v2387_v48  ;;  %v2445_v1 = vadd.f32 %v2414_v39, %v2388_v21 }
 0x40f   :  { %v2448_v22 = vmul.f32 0.5, %v2444_v29  ;;  %v2452_v55 = vmul.f32 0.5, %v2445_v1 }
 0x411   :  { %4024 = vtanh.f32 %v2448_v22 }
 0x412   :  { %4026 = vtanh.f32 %v2452_v55 }
 0x413   :  { %v2427_v54 = vpop.f32.mrf.mxu2  ;;  %v2440_v15 = vpop.f32.mrf.mxu3 }
 0x414   :  { %v2446_v6 = vadd.f32 %v2427_v54, %v2389_v5  ;;  %v2447_v45 = vadd.f32 %v2440_v15, %v2390_v58  ;;  %v2403_v40 = vpop.f32.mrf.mxu0  ;;  %v2416_v57 = vpop.f32.mrf.mxu1 }
 0x416   :  { %4028 = vtanh.f32 %v2446_v6  ;;  %v2457_v33 = vmul.f32 0.5, %v2447_v45 }
 0x417   :  { %v4025_v4 = vpop.eup %4024 }
 0x418   :  { %v4027_v52 = vpop.eup %4026  ;;  %v2450_v50 = vmul.f32 0.5, %v4025_v4  ;;  %4030 = vtanh.f32 %v2457_v33  ;;  %v2471_v33 = vunpack.c.l.bf16 %v5066_v18  ;;  %v2472_v4 = vunpack.c.h.bf16 %v5066_v18 }
 0x419   :  { %v2454_v23 = vmul.f32 0.5, %v4027_v52 }
 0x41a   :  { %v2451_v49 = vadd.f32 0.5, %v2450_v50 }
 0x41b   :  { %v2455_v3 = vadd.f32 0.5, %v2454_v23  ;;  %v2429_v36 = vpop.f32.mrf.mxu2  ;;  %v2442_v12 = vpop.f32.mrf.mxu3 }
 0x41c   :  { %v4029_v26 = vpop.eup %4028 }
 0x41d   :  { %v2461_v9 = vmul.f32 %v2455_v3, %v5168_v13  ;;  %v2462_v48 = vmul.f32 %v4029_v26, %v2451_v49  ;;  %v5489_v13 = vld [vmem:[#allocation11_spill] sm:$0xff] }
 0x41e   :  { %v4031_v21 = vpop.eup %4030  ;;  %v2469_v5 = vunpack.c.l.bf16 %v5489_v13  ;;  %v2470_v58 = vunpack.c.h.bf16 %v5489_v13 }
 0x41f   :  { %v5208_v51 = vadd.f32 %v2462_v48, %v2461_v9  ;;  %v2459_v39 = vmul.f32 0.5, %v4031_v21 }
 0x421   :  { %4032 = vtanh.f32 %v5208_v51  ;;  %v2460_v29 = vadd.f32 0.5, %v2459_v39 }
 0x427   :  { %v4033_v1 = vpop.eup %4032 }
 0x428   :  { %v2465_v22 = vmul.f32 %v4033_v1, %v2460_v29 }
 0x42a   :  { %v2473_v55 = vpack.c.bf16 %v2465_v22, %v2465_v22 }
 0x42c   :  { %2482 = vmatmul.bf16.vlgmr.msra.gmra.mxu0 %v2473_v55  ;;  %2495 = vmatmul.bf16.vlgmr.msrb.gmra.mxu1 %v2473_v55 }
 0x42d   :  { %2508 = vmatmul.bf16.vlgmr.msra.gmra.mxu2 %v2473_v55  ;;  %2521 = vmatmul.bf16.vlgmr.msra.gmra.mxu3 %v2473_v55 }
 0x42e   :  { %2638 = vmatpush.bf16.msra.mxu0 %v4557_v47  ;;  %2651 = vmatpush.bf16.msrb.mxu1 %v4570_v34 }
 0x42f   :  { %2664 = vmatpush.bf16.msra.mxu2 %v4583_v17  ;;  %2677 = vmatpush.bf16.msra.mxu3 %v4620_v8 }
 0x432   :  { %2639 = vmatpush.bf16.msra.mxu0 %v4592_v0  ;;  %2652 = vmatpush.bf16.msrb.mxu1 %v5459_v11 }
 0x433   :  { %2665 = vmatpush.bf16.msra.mxu2 %v5460_v32  ;;  %2678 = vmatpush.bf16.msra.mxu3 %v5461_v41 }
 0x436   :  { %2640 = vmatpush.bf16.msra.mxu0 %v5462_v16  ;;  %2653 = vmatpush.bf16.msrb.mxu1 %v5463_v62 }
 0x437   :  { %2666 = vmatpush.bf16.msra.mxu2 %v5464_v56  ;;  %2679 = vmatpush.bf16.msra.mxu3 %v5465_v19 }
 0x43a   :  { %2641 = vmatpush.bf16.msra.mxu0 %v5466_v30  ;;  %2654 = vmatpush.bf16.msrb.mxu1 %v5467_v38 }
 0x43b   :  { %2667 = vmatpush.bf16.msra.mxu2 %v5468_v28  ;;  %2680 = vmatpush.bf16.msra.mxu3 %v5469_v10 }
 0x43e   :  { %2642 = vmatpush.bf16.msra.mxu0 %v5470_v2  ;;  %2655 = vmatpush.bf16.msrb.mxu1 %v5471_v60 }
 0x43f   :  { %2668 = vmatpush.bf16.msra.mxu2 %v5472_v43  ;;  %2681 = vmatpush.bf16.msra.mxu3 %v5473_v59 }
 0x442   :  { %2643 = vmatpush.bf16.msra.mxu0 %v5474_v27  ;;  %2656 = vmatpush.bf16.msrb.mxu1 %v5475_v46 }
 0x443   :  { %2669 = vmatpush.bf16.msra.mxu2 %v5476_v53  ;;  %2682 = vmatpush.bf16.msra.mxu3 %v5477_v44 }
 0x446   :  { %2644 = vmatpush.bf16.msra.mxu0 %v5478_v42  ;;  %2657 = vmatpush.bf16.msrb.mxu1 %v5479_v20 }
 0x447   :  { %2670 = vmatpush.bf16.msra.mxu2 %v5480_v31  ;;  %2683 = vmatpush.bf16.msra.mxu3 %v5481_v61 }
 0x44a   :  { %2645 = vmatpush.bf16.msra.mxu0 %v5482_v35  ;;  %2658 = vmatpush.bf16.msrb.mxu1 %v5483_v37 }
 0x44b   :  { %2671 = vmatpush.bf16.msra.mxu2 %v5484_v24  ;;  %2684 = vmatpush.bf16.msra.mxu3 %v5485_v14 }
 0x4a9   :  { %v2483_v54 = vpop.f32.mrf.mxu0  ;;  %v2496_v15 = vpop.f32.mrf.mxu1 }
 0x4aa   :  { %v2526_v6 = vadd.f32 %v2483_v54, %v2469_v5  ;;  %v2527_v45 = vadd.f32 %v2496_v15, %v2470_v58 }
 0x4ac   :  { %v2530_v40 = vmul.f32 0.5, %v2526_v6  ;;  %v2534_v57 = vmul.f32 0.5, %v2527_v45 }
 0x4ae   :  { %4034 = vtanh.f32 %v2530_v40 }
 0x4af   :  { %4036 = vtanh.f32 %v2534_v57 }
 0x4b0   :  { %v2509_v52 = vpop.f32.mrf.mxu2  ;;  %v2522_v50 = vpop.f32.mrf.mxu3 }
 0x4b1   :  { %v2528_v23 = vadd.f32 %v2509_v52, %v2471_v33  ;;  %v2529_v49 = vadd.f32 %v2522_v50, %v2472_v4  ;;  %v2485_v3 = vpop.f32.mrf.mxu0  ;;  %v2498_v36 = vpop.f32.mrf.mxu1  ;;  %v5491_v4 = vld [vmem:[#allocation22_spill] sm:$0xff] }
 0x4b2   :  { %v2633_v52 = vunpack.c.l.bf16 %v5491_v4  ;;  %v2634_v50 = vunpack.c.h.bf16 %v5491_v4 }
 0x4b3   :  { %4038 = vtanh.f32 %v2528_v23  ;;  %v2539_v12 = vmul.f32 0.5, %v2529_v49 }
 0x4b4   :  { %v4035_v26 = vpop.eup %4034 }
 0x4b5   :  { %v4037_v9 = vpop.eup %4036  ;;  %v2532_v48 = vmul.f32 0.5, %v4035_v26  ;;  %4040 = vtanh.f32 %v2539_v12  ;;  %v2814_v12 = vld [vmem:[%s5358_s4 + $0x78] sm:$0xff] }
 0x4b6   :  { %v2536_v21 = vmul.f32 0.5, %v4037_v9 }
 0x4b7   :  { %v2533_v39 = vadd.f32 0.5, %v2532_v48  ;;  %v2635_v48 = vunpack.c.l.bf16 %v5079_v7 }
 0x4b8   :  { %v2537_v29 = vadd.f32 0.5, %v2536_v21  ;;  %v2511_v1 = vpop.f32.mrf.mxu2  ;;  %v2524_v22 = vpop.f32.mrf.mxu3  ;;  %v2636_v21 = vunpack.c.h.bf16 %v5079_v7 }
 0x4b9   :  { %v4039_v55 = vpop.eup %4038 }
 0x4ba   :  { %v2543_v18 = vmul.f32 %v2537_v29, %v5208_v51  ;;  %v2544_v13 = vmul.f32 %v4039_v55, %v2533_v39 }
 0x4bb   :  { %v4041_v5 = vpop.eup %4040 }
 0x4bc   :  { %v5248_v58 = vadd.f32 %v2544_v13, %v2543_v18  ;;  %v2541_v54 = vmul.f32 0.5, %v4041_v5 }
 0x4be   :  { %4042 = vtanh.f32 %v5248_v58  ;;  %v2542_v15 = vadd.f32 0.5, %v2541_v54 }
 0x4c4   :  { %v4043_v6 = vpop.eup %4042 }
 0x4c5   :  { %v2547_v45 = vmul.f32 %v4043_v6, %v2542_v15 }
 0x4c7   :  { %v2555_v40 = vpack.c.bf16 %v2547_v45, %v2547_v45 }
 0x4c9   :  { %2564 = vmatmul.bf16.vlgmr.msrb.gmra.mxu0 %v2555_v40  ;;  %2577 = vmatmul.bf16.vlgmr.msra.gmra.mxu1 %v2555_v40 }
 0x4ca   :  { %2590 = vmatmul.bf16.vlgmr.msrb.gmra.mxu2 %v2555_v40  ;;  %2603 = vmatmul.bf16.vlgmr.msrb.gmra.mxu3 %v2555_v40 }
 0x4cb   :  { %2720 = vmatpush.bf16.msrb.mxu0 %v4557_v47  ;;  %2733 = vmatpush.bf16.msra.mxu1 %v4570_v34  ;;  %v5490_v47 = vld [vmem:[#allocation16_spill] sm:$0xff] }
 0x4cc   :  { %2746 = vmatpush.bf16.msrb.mxu2 %v4583_v17  ;;  %2759 = vmatpush.bf16.msrb.mxu3 %v4620_v8  ;;  %v2551_v34 = vunpack.c.l.bf16 %v5490_v47  ;;  %v2552_v17 = vunpack.c.h.bf16 %v5490_v47 }
 0x4cf   :  { %2721 = vmatpush.bf16.msrb.mxu0 %v4592_v0  ;;  %2734 = vmatpush.bf16.msra.mxu1 %v5459_v11 }
 0x4d0   :  { %2747 = vmatpush.bf16.msrb.mxu2 %v5460_v32  ;;  %2760 = vmatpush.bf16.msrb.mxu3 %v5461_v41 }
 0x4d3   :  { %2722 = vmatpush.bf16.msrb.mxu0 %v5462_v16  ;;  %2735 = vmatpush.bf16.msra.mxu1 %v5463_v62  ;;  %v2553_v62 = vunpack.c.l.bf16 %v5073_v63 }
 0x4d4   :  { %2748 = vmatpush.bf16.msrb.mxu2 %v5464_v56  ;;  %2761 = vmatpush.bf16.msrb.mxu3 %v5465_v19  ;;  %v2554_v56 = vunpack.c.h.bf16 %v5073_v63 }
 0x4d7   :  { %2723 = vmatpush.bf16.msrb.mxu0 %v5466_v30  ;;  %2736 = vmatpush.bf16.msra.mxu1 %v5467_v38 }
 0x4d8   :  { %2749 = vmatpush.bf16.msrb.mxu2 %v5468_v28  ;;  %2762 = vmatpush.bf16.msrb.mxu3 %v5469_v10 }
 0x4db   :  { %2724 = vmatpush.bf16.msrb.mxu0 %v5470_v2  ;;  %2737 = vmatpush.bf16.msra.mxu1 %v5471_v60 }
 0x4dc   :  { %2750 = vmatpush.bf16.msrb.mxu2 %v5472_v43  ;;  %2763 = vmatpush.bf16.msrb.mxu3 %v5473_v59 }
 0x4df   :  { %2725 = vmatpush.bf16.msrb.mxu0 %v5474_v27  ;;  %2738 = vmatpush.bf16.msra.mxu1 %v5475_v46 }
 0x4e0   :  { %2751 = vmatpush.bf16.msrb.mxu2 %v5476_v53  ;;  %2764 = vmatpush.bf16.msrb.mxu3 %v5477_v44 }
 0x4e3   :  { %2726 = vmatpush.bf16.msrb.mxu0 %v5478_v42  ;;  %2739 = vmatpush.bf16.msra.mxu1 %v5479_v20 }
 0x4e4   :  { %2752 = vmatpush.bf16.msrb.mxu2 %v5480_v31  ;;  %2765 = vmatpush.bf16.msrb.mxu3 %v5481_v61 }
 0x4e7   :  { %2727 = vmatpush.bf16.msrb.mxu0 %v5482_v35  ;;  %2740 = vmatpush.bf16.msra.mxu1 %v5483_v37 }
 0x4e8   :  { %2753 = vmatpush.bf16.msrb.mxu2 %v5484_v24  ;;  %2766 = vmatpush.bf16.msrb.mxu3 %v5485_v14 }
 0x546   :  { %v2565_v0 = vpop.f32.mrf.mxu0  ;;  %v2578_v8 = vpop.f32.mrf.mxu1 }
 0x547   :  { %v2608_v11 = vadd.f32 %v2565_v0, %v2551_v34  ;;  %v2609_v32 = vadd.f32 %v2578_v8, %v2552_v17 }
 0x549   :  { %v2612_v41 = vmul.f32 0.5, %v2608_v11  ;;  %v2616_v16 = vmul.f32 0.5, %v2609_v32 }
 0x54b   :  { %4044 = vtanh.f32 %v2612_v41 }
 0x54c   :  { %4046 = vtanh.f32 %v2616_v16 }
 0x54d   :  { %v2591_v19 = vpop.f32.mrf.mxu2  ;;  %v2604_v30 = vpop.f32.mrf.mxu3 }
 0x54e   :  { %v2610_v38 = vadd.f32 %v2591_v19, %v2553_v62  ;;  %v2611_v28 = vadd.f32 %v2604_v30, %v2554_v56  ;;  %v2567_v10 = vpop.f32.mrf.mxu0  ;;  %v2580_v2 = vpop.f32.mrf.mxu1  ;;  %v2813_v56 = vld [vmem:[%s5358_s4 + $0x70] sm:$0xff]  ;;  %v2812_v19 = vld [vmem:[%s5358_s4 + $0x68] sm:$0xff]  ;;  %v2811_v30 = vld [vmem:[%s5358_s4 + $0x60] sm:$0xff] }
 0x54f   :  { %v2808_v10 = vld [vmem:[%s5358_s4 + $0x48] sm:$0xff]  ;;  %v2807_v2 = vld [vmem:[%s5358_s4 + $0x40] sm:$0xff] }
 0x550   :  { %4048 = vtanh.f32 %v2610_v38  ;;  %v2621_v60 = vmul.f32 0.5, %v2611_v28  ;;  %v2810_v38 = vld [vmem:[%s5358_s4 + $0x58] sm:$0xff]  ;;  %v2809_v28 = vld [vmem:[%s5358_s4 + $0x50] sm:$0xff] }
 0x551   :  { %v4045_v43 = vpop.eup %4044 }
 0x552   :  { %v4047_v59 = vpop.eup %4046  ;;  %v2614_v27 = vmul.f32 0.5, %v4045_v43  ;;  %4050 = vtanh.f32 %v2621_v60  ;;  %v2806_v60 = vld [vmem:[%s5358_s4 + $0x38] sm:$0xff]  ;;  %v2805_v43 = vld [vmem:[%s5358_s4 + $0x30] sm:$0xff] }
 0x553   :  { %v2618_v46 = vmul.f32 0.5, %v4047_v59  ;;  %v2804_v59 = vld [vmem:[%s5358_s4 + $0x28] sm:$0xff] }
 0x554   :  { %v2615_v53 = vadd.f32 0.5, %v2614_v27  ;;  %v2803_v27 = vld [vmem:[%s5358_s4 + $0x20] sm:$0xff] }
 0x555   :  { %v2619_v44 = vadd.f32 0.5, %v2618_v46  ;;  %v2593_v42 = vpop.f32.mrf.mxu2  ;;  %v2606_v20 = vpop.f32.mrf.mxu3  ;;  %v2802_v46 = vld [vmem:[%s5358_s4 + $0x18] sm:$0xff] }
 0x556   :  { %v4049_v31 = vpop.eup %4048  ;;  %v2799_v42 = vld [vmem:[%s5358_s4] sm:$0xff]  ;;  %v5492_v20 = vld [vmem:[#allocation27_spill] sm:$0xff] }
 0x557   :  { %v2625_v63 = vmul.f32 %v2619_v44, %v5248_v58  ;;  %v2626_v61 = vmul.f32 %v4049_v31, %v2615_v53  ;;  %v2801_v53 = vld [vmem:[%s5358_s4 + $0x10] sm:$0xff]  ;;  %v2800_v44 = vld [vmem:[%s5358_s4 + $0x8] sm:$0xff]  ;;  %v2715_v31 = vunpack.c.l.bf16 %v5492_v20 }
 0x558   :  { %v4051_v35 = vpop.eup %4050 }
 0x559   :  { %v2627_v37 = vadd.f32 %v2626_v61, %v2625_v63  ;;  %v2623_v24 = vmul.f32 0.5, %v4051_v35  ;;  %v2716_v63 = vunpack.c.h.bf16 %v5492_v20 }
 0x55b   :  { %4052 = vtanh.f32 %v2627_v37  ;;  %v2624_v14 = vadd.f32 0.5, %v2623_v24 }
 0x561   :  { %v4053_v51 = vpop.eup %4052 }
 0x562   :  { %v2629_v57 = vmul.f32 %v4053_v51, %v2624_v14 }
 0x564   :  { %v2637_v33 = vpack.c.bf16 %v2629_v57, %v2629_v57  ;;  %v2717_v57 = vunpack.c.l.bf16 %v5085_v25 }
 0x566   :  { %2646 = vmatmul.bf16.vlgmr.msra.gmra.mxu0 %v2637_v33  ;;  %2659 = vmatmul.bf16.vlgmr.msrb.gmra.mxu1 %v2637_v33 }
 0x567   :  { %2672 = vmatmul.bf16.vlgmr.msra.gmra.mxu2 %v2637_v33  ;;  %2685 = vmatmul.bf16.vlgmr.msra.gmra.mxu3 %v2637_v33  ;;  %v2718_v33 = vunpack.c.h.bf16 %v5085_v25 }
 0x568   :  { %2819 = vmatpush.msra.mxu0 %v2814_v12 }
 0x56a   :  { %2820 = vmatpush.msra.mxu0 %v2813_v56 }
 0x56c   :  { %2821 = vmatpush.msra.mxu0 %v2812_v19 }
 0x56e   :  { %2822 = vmatpush.msra.mxu0 %v2811_v30 }
 0x570   :  { %2823 = vmatpush.msra.mxu0 %v2810_v38 }
 0x572   :  { %2824 = vmatpush.msra.mxu0 %v2809_v28 }
 0x574   :  { %2825 = vmatpush.msra.mxu0 %v2808_v10 }
 0x576   :  { %2826 = vmatpush.msra.mxu0 %v2807_v2 }
 0x578   :  { %2827 = vmatpush.msra.mxu0 %v2806_v60 }
 0x57a   :  { %2828 = vmatpush.msra.mxu0 %v2805_v43 }
 0x57c   :  { %2829 = vmatpush.msra.mxu0 %v2804_v59 }
 0x57e   :  { %2830 = vmatpush.msra.mxu0 %v2803_v27 }
 0x580   :  { %2831 = vmatpush.msra.mxu0 %v2802_v46 }
 0x582   :  { %2832 = vmatpush.msra.mxu0 %v2801_v53 }
 0x584   :  { %2833 = vmatpush.msra.mxu0 %v2800_v44 }
 0x586   :  { %2834 = vmatpush.msra.mxu0 %v2799_v42 }
 0x5e3   :  { %v2647_v23 = vpop.f32.mrf.mxu0  ;;  %v2660_v49 = vpop.f32.mrf.mxu1 }
 0x5e4   :  { %v2690_v3 = vadd.f32 %v2647_v23, %v2633_v52  ;;  %v2691_v36 = vadd.f32 %v2660_v49, %v2634_v50 }
 0x5e6   :  { %v2694_v26 = vmul.f32 0.5, %v2690_v3  ;;  %v2698_v9 = vmul.f32 0.5, %v2691_v36 }
 0x5e8   :  { %4054 = vtanh.f32 %v2694_v26 }
 0x5e9   :  { %4056 = vtanh.f32 %v2698_v9 }
 0x5ea   :  { %v2673_v39 = vpop.f32.mrf.mxu2  ;;  %v2686_v29 = vpop.f32.mrf.mxu3 }
 0x5eb   :  { %v2692_v1 = vadd.f32 %v2673_v39, %v2635_v48  ;;  %v2693_v22 = vadd.f32 %v2686_v29, %v2636_v21  ;;  %v2649_v55 = vpop.f32.mrf.mxu0  ;;  %v2662_v18 = vpop.f32.mrf.mxu1 }
 0x5ed   :  { %4058 = vtanh.f32 %v2692_v1  ;;  %v2703_v13 = vmul.f32 0.5, %v2693_v22 }
 0x5ee   :  { %v4055_v5 = vpop.eup %4054 }
 0x5ef   :  { %v4057_v58 = vpop.eup %4056  ;;  %v2696_v54 = vmul.f32 0.5, %v4055_v5  ;;  %4060 = vtanh.f32 %v2703_v13 }
 0x5f0   :  { %v2700_v15 = vmul.f32 0.5, %v4057_v58 }
 0x5f1   :  { %v2697_v6 = vadd.f32 0.5, %v2696_v54 }
 0x5f2   :  { %v2701_v45 = vadd.f32 0.5, %v2700_v15  ;;  %v2675_v40 = vpop.f32.mrf.mxu2  ;;  %v2688_v47 = vpop.f32.mrf.mxu3 }
 0x5f3   :  { %v4059_v34 = vpop.eup %4058 }
 0x5f4   :  { %v2707_v17 = vmul.f32 %v2701_v45, %v2627_v37  ;;  %v2708_v7 = vmul.f32 %v4059_v34, %v2697_v6  ;;  %v3993_v6 = vld [vmem:[%s5359_s5] ss:$0 sm:$0xff] }
 0x5f5   :  { %v4061_v0 = vpop.eup %4060 }
 0x5f6   :  { %v5295_v8 = vadd.f32 %v2708_v7, %v2707_v17  ;;  %v2705_v11 = vmul.f32 0.5, %v4061_v0 }
 0x5f8   :  { %4062 = vtanh.f32 %v5295_v8  ;;  %v2706_v32 = vadd.f32 0.5, %v2705_v11 }
 0x5fe   :  { %v4063_v41 = vpop.eup %4062 }
 0x5ff   :  { %v2711_v16 = vmul.f32 %v4063_v41, %v2706_v32 }
 0x601   :  { %v2719_v62 = vpack.c.bf16 %v2711_v16, %v2711_v16 }
 0x603   :  { %2728 = vmatmul.bf16.vlgmr.msrb.gmra.mxu0 %v2719_v62  ;;  %2741 = vmatmul.bf16.vlgmr.msra.gmra.mxu1 %v2719_v62 }
 0x604   :  { %2754 = vmatmul.bf16.vlgmr.msrb.gmra.mxu2 %v2719_v62  ;;  %2767 = vmatmul.bf16.vlgmr.msrb.gmra.mxu3 %v2719_v62 }
 0x680   :  { %v2729_v61 = vpop.f32.mrf.mxu0  ;;  %v2742_v35 = vpop.f32.mrf.mxu1 }
 0x681   :  { %v2772_v37 = vadd.f32 %v2729_v61, %v2715_v31  ;;  %v2773_v24 = vadd.f32 %v2742_v35, %v2716_v63 }
 0x683   :  { %v2776_v14 = vmul.f32 0.5, %v2772_v37  ;;  %v2780_v51 = vmul.f32 0.5, %v2773_v24 }
 0x685   :  { %4064 = vtanh.f32 %v2776_v14 }
 0x686   :  { %4066 = vtanh.f32 %v2780_v51 }
 0x687   :  { %v2755_v4 = vpop.f32.mrf.mxu2  ;;  %v2768_v52 = vpop.f32.mrf.mxu3 }
 0x688   :  { %v2774_v50 = vadd.f32 %v2755_v4, %v2717_v57  ;;  %v2775_v23 = vadd.f32 %v2768_v52, %v2718_v33  ;;  %v2731_v49 = vpop.f32.mrf.mxu0  ;;  %v2744_v3 = vpop.f32.mrf.mxu1 }
 0x68a   :  { %4068 = vtanh.f32 %v2774_v50  ;;  %v2785_v36 = vmul.f32 0.5, %v2775_v23 }
 0x68b   :  { %v4065_v12 = vpop.eup %4064 }
 0x68c   :  { %v4067_v26 = vpop.eup %4066  ;;  %v2778_v9 = vmul.f32 0.5, %v4065_v12  ;;  %4070 = vtanh.f32 %v2785_v36 }
 0x68d   :  { %v2782_v48 = vmul.f32 0.5, %v4067_v26 }
 0x68e   :  { %v2779_v21 = vadd.f32 0.5, %v2778_v9 }
 0x68f   :  { %v2783_v39 = vadd.f32 0.5, %v2782_v48  ;;  %v2757_v29 = vpop.f32.mrf.mxu2  ;;  %v2770_v1 = vpop.f32.mrf.mxu3 }
 0x690   :  { %v4069_v22 = vpop.eup %4068 }
 0x691   :  { %v2789_v25 = vmul.f32 %v2783_v39, %v5295_v8  ;;  %v2790_v55 = vmul.f32 %v4069_v22, %v2779_v21 }
 0x692   :  { %v4071_v18 = vpop.eup %4070 }
 0x693   :  { %v2791_v13 = vadd.f32 %v2790_v55, %v2789_v25  ;;  %v2787_v5 = vmul.f32 0.5, %v4071_v18 }
 0x695   :  { %4072 = vtanh.f32 %v2791_v13  ;;  %v2788_v58 = vadd.f32 0.5, %v2787_v5 }
 0x69b   :  { %v4073_v54 = vpop.eup %4072 }
 0x69c   :  { %v2793_v15 = vmul.f32 %v4073_v54, %v2788_v58 }
 0x69e   :  { %2835 = vmatmul.f32.vlgmr.msra.gmra.mxu0 %v2793_v15 }
 0x71b   :  { %v2836_v45 = vpop.f32.mrf.mxu0 }
 0x71c   :  { %v2837_v40 = vadd.f32 %v3993_v6, %v2836_v45 }
 0x71e   :  { %2839 = vst [vmem:[%s5360_s6] sm:$0xff] %v2837_v40 }
 0x71f   :  { %2844 = vsyncpa [#allocation6], 1 }

</bundles_post_ra>
